<compile_context>
chip_gen: v7x
topology: tpu7x:2x2x1
jax: 0.10.0
libtpu: 0.0.40
codegen_flags: <defaults>
</compile_context>

<pallas_src>
import jax
import jax.numpy as jnp
from jax.experimental import pallas as pl
from jax.experimental.pallas import tpu as pltpu

BN_EPS = 1e-5


def _round_up(x, m):
    return (x + m - 1) // m * m


def _pick_row_strip(H, W, K, C8, budget_bytes=2 * 1024 * 1024):
    """Output-row strip height for kernel 1.

    Legal strips keep the conv-output tile lane-dense (TH*W % 128 == 0, or the
    whole image).  Among legal strips, pick the largest whose im2col scratch
    (bf16) + f32 accumulator stay within a modest VMEM budget.
    """
    legal = [t for t in range(1, H + 1)
             if H % t == 0 and (t == H or (t * W) % 128 == 0)]
    fitting = [t for t in legal if t * W * (2 * K + 8 * C8) <= budget_bytes]
    return max(fitting) if fitting else min(legal)


def _pick_tm(HW, C8, budget_bytes=8 * 1024 * 1024):
    """Lane-tile for kernel 2: whole row if it fits, else a fat 128-multiple."""
    def fits(t):
        # in + out blocks, double buffered, f32.
        return 4 * (2 * C8) * t * 4 <= budget_bytes
    if fits(HW):
        return HW
    cands = [t for t in range(128, HW, 128) if HW % t == 0 and fits(t)]
    if cands:
        return max(cands)
    # Fallback (non-128-multiple divisor -> masked stores; legal but slower).
    return max(t for t in range(1, HW + 1) if HW % t == 0 and fits(t))


def conv3x3_stats_kernel(xpad_ref, w_ref, b_ref,
                         conv_ref, sum_ref, sq_ref, col_ref):
    """3x3 'same' conv for one (image, row-strip) + fused BN partial sums.

    xpad_ref: (1, H+2, W+2, Cin) bf16  padded NHWC input (whole image, reused
                                       across the strip axis)
    w_ref:    (C8, 9*Cin)        bf16  im2col weights, Cout padded to C8
    b_ref:    (C8, 1)            f32   conv bias (zero-padded)
    conv_ref: (1, C8, TH*W)      f32   channel-major conv tile (lanes = HW)
    sum_ref:  (1, 1, C8, 1)      f32   per-strip per-channel sum
    sq_ref:   (1, 1, C8, 1)      f32   per-strip per-channel sum of squares
    col_ref:  (TH*W, 9*Cin)      bf16  VMEM scratch: im2col slab for this strip
    """
    Cin = xpad_ref.shape[3]
    W = xpad_ref.shape[2] - 2
    M, K = col_ref.shape
    TH = M // W

    s = pl.program_id(1)
    h0 = pl.multiple_of(s * TH, TH)

    # Assemble the im2col slab for this strip, written directly as bf16.
    # TODO(synk): for small Cin the lane offsets c0 are not 128-aligned
    # (masked stores); benchmark the 9-accumulating-dot form for Cin < 32.
    for ky in range(3):
        for kx in range(3):
            c0 = (ky * 3 + kx) * Cin
            tap = xpad_ref[0, pl.ds(h0 + ky, TH), kx:kx + W, :]   # (TH, W, Cin)
            col_ref[:, c0:c0 + Cin] = tap.reshape(M, Cin)

    # One MXU contraction with K = 9*Cin, contracting K on BOTH operands so the
    # channel-major (C8, TH*W) result comes straight out of the matmul
    # (no full-size transpose, no 128-wide channel padding).
    acc = jax.lax.dot_general(
        w_ref[...], col_ref[...],
        dimension_numbers=(((1,), (1,)), ((), ())),
        preferred_element_type=jnp.float32)                        # (C8, M) f32
    acc = acc + b_ref[...]

    conv_ref[0] = acc
    # Fused BatchNorm partial statistics for this strip.
    # TODO(synk): E[x^2]-E[x]^2 in f32 can cancel badly if |mean| >> std;
    # subtract a per-channel offset or use Welford if such inputs are expected.
    sum_ref[0, 0] = jnp.sum(acc, axis=1, keepdims=True)
    sq_ref[0, 0] = jnp.sum(acc * acc, axis=1, keepdims=True)


def bn_relu_kernel(conv_ref, scale_ref, shift_ref, out_ref):
    """Affine BatchNorm (pre-computed scale/shift) + ReLU, lane-dense.

    conv_ref:  (1, C8, TM)   f32  channel-major conv tile
    scale_ref: (C8, 1)       f32  gamma / sqrt(var + eps)
    shift_ref: (C8, 1)       f32  beta - mean * scale
    out_ref:   (1, Cout, TM) f32
    """
    cout = out_ref.shape[1]
    y = conv_ref[0] * scale_ref[...] + shift_ref[...]
    out_ref[0] = jnp.maximum(y[:cout, :], 0.0)


def conv_block_forward(x_nchw, w_oihw, bias, gamma, beta):
    """Conv2d(3x3, pad=1) + BatchNorm2d (batch stats) + ReLU.

    x_nchw: (N, Cin, H, W). Returns (N, Cout, H, W), matching PyTorch layout.
    """
    N, Cin, H, W = x_nchw.shape
    Cout = w_oihw.shape[0]
    HW = H * W
    Hp, Wp = H + 2, W + 2
    C8 = _round_up(Cout, 8)           # sublane-granular channel padding only
    K = 9 * Cin
    TH = _pick_row_strip(H, W, K, C8)
    S = H // TH
    M = TH * W
    TM = _pick_tm(HW, C8)
    VMEM_LIMIT = 64 * 1024 * 1024

    # NCHW -> NHWC in bf16 + explicit zero padding for the 'same' 3x3 conv.
    # TODO(synk): fold this transpose/pad into kernel 1 (memory_space=pl.ANY +
    # halo'd strip DMA, or masked border taps) to drop two input-sized HBM passes.
    x = jnp.transpose(x_nchw, (0, 2, 3, 1)).astype(jnp.bfloat16)
    xpad = jnp.pad(x, ((0, 0), (1, 1), (1, 1), (0, 0)))

    # OIHW -> (C8, 9*Cin) im2col weights (K index = (ky*3+kx)*Cin + ci), bf16.
    w_mat = jnp.transpose(w_oihw, (0, 2, 3, 1)).reshape(Cout, K)
    w_mat = jnp.pad(w_mat, ((0, C8 - Cout), (0, 0))).astype(jnp.bfloat16)
    b_col = jnp.pad(bias, (0, C8 - Cout)).reshape(C8, 1).astype(jnp.float32)

    conv_out, ch_sum, ch_sq = pl.pallas_call(
        conv3x3_stats_kernel,
        out_shape=(
            jax.ShapeDtypeStruct((N, C8, HW), jnp.float32),
            jax.ShapeDtypeStruct((N, S, C8, 1), jnp.float32),
            jax.ShapeDtypeStruct((N, S, C8, 1), jnp.float32),
        ),
        grid=(N, S),
        in_specs=[
            pl.BlockSpec((1, Hp, Wp, Cin), lambda n, s: (n, 0, 0, 0)),
            pl.BlockSpec((C8, K), lambda n, s: (0, 0)),
            pl.BlockSpec((C8, 1), lambda n, s: (0, 0)),
        ],
        out_specs=(
            pl.BlockSpec((1, C8, M), lambda n, s: (n, 0, s)),
            pl.BlockSpec((1, 1, C8, 1), lambda n, s: (n, s, 0, 0)),
            pl.BlockSpec((1, 1, C8, 1), lambda n, s: (n, s, 0, 0)),
        ),
        scratch_shapes=[pltpu.VMEM((M, K), jnp.bfloat16)],
        compiler_params=pltpu.CompilerParams(
            dimension_semantics=("parallel", "parallel"),
            vmem_limit_bytes=VMEM_LIMIT),
    )(xpad, w_mat, b_col)

    # Hoisted BatchNorm statistics: one tiny cross-batch reduction to
    # per-channel (scale, shift); kernel 2 then does only FMA + ReLU.
    count = float(N * HW)
    mean = jnp.sum(ch_sum, axis=(0, 1)) / count                  # (C8, 1)
    ex2 = jnp.sum(ch_sq, axis=(0, 1)) / count
    var = jnp.maximum(ex2 - mean * mean, 0.0)                    # biased variance
    inv = jax.lax.rsqrt(var + BN_EPS)
    g_col = jnp.pad(gamma, (0, C8 - Cout)).reshape(C8, 1).astype(jnp.float32)
    bt_col = jnp.pad(beta, (0, C8 - Cout)).reshape(C8, 1).astype(jnp.float32)
    scale = g_col * inv
    shift = bt_col - mean * scale

    out_packed = pl.pallas_call(
        bn_relu_kernel,
        out_shape=jax.ShapeDtypeStruct((N, Cout, HW), jnp.float32),
        grid=(N, HW // TM),
        in_specs=[
            pl.BlockSpec((1, C8, TM), lambda n, t: (n, 0, t)),
            pl.BlockSpec((C8, 1), lambda n, t: (0, 0)),
            pl.BlockSpec((C8, 1), lambda n, t: (0, 0)),
        ],
        out_specs=pl.BlockSpec((1, Cout, TM), lambda n, t: (n, 0, t)),
        compiler_params=pltpu.CompilerParams(
            dimension_semantics=("parallel", "parallel"),
            vmem_limit_bytes=VMEM_LIMIT),
    )(conv_out, scale, shift)

    # (N, Cout, H*W) -> (N, Cout, H, W): contiguous reshape, no output transpose.
    return out_packed.reshape(N, Cout, H, W)


def _reference(x_nchw, w_oihw, bias, gamma, beta):
    # Same bf16-input / f32-accumulation convention as the kernel.
    conv = jax.lax.conv_general_dilated(
        x_nchw.astype(jnp.bfloat16), w_oihw.astype(jnp.bfloat16),
        window_strides=(1, 1), padding="SAME",
        dimension_numbers=("NCHW", "OIHW", "NCHW"),
        preferred_element_type=jnp.float32)
    conv = conv + bias[None, :, None, None]
    mean = jnp.mean(conv, axis=(0, 2, 3), keepdims=True)
    var = jnp.mean((conv - mean) ** 2, axis=(0, 2, 3), keepdims=True)
    norm = (conv - mean) * jax.lax.rsqrt(var + BN_EPS)
    norm = norm * gamma[None, :, None, None] + beta[None, :, None, None]
    return jnp.maximum(norm, 0.0)


if __name__ == "__main__":
    key = jax.random.PRNGKey(0)
    k_x, k_w, k_b = jax.random.split(key, 3)

    N, Cin, Cout, H, W = 2, 4, 8, 16, 16

    x = jax.random.normal(k_x, (N, Cin, H, W), dtype=jnp.float32)
    # Parameter shapes follow nn.Conv2d / nn.BatchNorm2d; BN affine params at
    # their freshly-constructed defaults (weight=1, bias=0, training-mode stats).
    w = jax.random.normal(k_w, (Cout, Cin, 3, 3), dtype=jnp.float32) * 0.1
    b = jax.random.normal(k_b, (Cout,), dtype=jnp.float32) * 0.1
    gamma = jnp.ones((Cout,), dtype=jnp.float32)
    beta = jnp.zeros((Cout,), dtype=jnp.float32)

    fwd = jax.jit(conv_block_forward)
    out = jax.block_until_ready(fwd(x, w, b, gamma, beta))

    ref = jax.block_until_ready(_reference(x, w, b, gamma, beta))
    assert out.shape == (N, Cout, H, W)
    err = float(jnp.max(jnp.abs(out - ref)))
    assert err < 1e-3, f"max abs error {err}"

    print("KERNEL_OK")
</pallas_src>

<mosaic_0001>
module attributes {stable_mosaic.version = 11 : i64} {
  func.func @conv3x3_stats_kernel(%arg0: i32, %arg1: i32, %arg2: memref<1x18x18x4xbf16, #tpu.memory_space<vmem>>, %arg3: memref<8x36xbf16, #tpu.memory_space<vmem>>, %arg4: memref<8x1xf32, #tpu.memory_space<vmem>>, %arg5: memref<1x8x256xf32, #tpu.memory_space<vmem>>, %arg6: memref<1x1x8x1xf32, #tpu.memory_space<vmem>>, %arg7: memref<1x1x8x1xf32, #tpu.memory_space<vmem>>, %arg8: memref<256x36xbf16, #tpu.memory_space<vmem>>) attributes {dimension_semantics = [#tpu.dimension_semantics<parallel>, #tpu.dimension_semantics<parallel>], iteration_bounds = array<i64: 2, 1>, scalar_prefetch = 0 : i64, scratch_operands = 1 : i64, tpu.core_type = #tpu.core_type<tc>, window_params = [{transform_indices = @transform_0, window_bounds = array<i64: 1, 18, 18, 4>}, {pipeline_mode = #tpu.pipeline_mode<synchronous>, transform_indices = @transform_1, window_bounds = array<i64: 8, 36>}, {pipeline_mode = #tpu.pipeline_mode<synchronous>, transform_indices = @transform_2, window_bounds = array<i64: 8, 1>}, {transform_indices = @transform_3, window_bounds = array<i64: 1, 8, 256>}, {transform_indices = @transform_4, window_bounds = array<i64: 1, 1, 8, 1>}, {transform_indices = @transform_5, window_bounds = array<i64: 1, 1, 8, 1>}]} {
    %c16_i32 = arith.constant 16 : i32
    %0 = arith.muli %arg1, %c16_i32 : i32
    %1 = tpu.assume_multiple %0, 16 : i32
    %c0_i32 = arith.constant 0 : i32
    %2 = arith.addi %1, %c0_i32 : i32
    %c0 = arith.constant 0 : index
    %3 = arith.index_cast %2 : i32 to index
    %c0_0 = arith.constant 0 : index
    %c0_1 = arith.constant 0 : index
    %4 = vector.load %arg2[%c0, %3, %c0_0, %c0_1] : memref<1x18x18x4xbf16, #tpu.memory_space<vmem>>, vector<1x16x16x4xbf16>
    %5 = vector.shape_cast %4 : vector<1x16x16x4xbf16> to vector<16x16x4xbf16>
    %6 = vector.shape_cast %5 : vector<16x16x4xbf16> to vector<256x4xbf16>
    %c0_2 = arith.constant 0 : index
    %c0_3 = arith.constant 0 : index
    %7 = vector.load %arg8[%c0_2, %c0_3] : memref<256x36xbf16, #tpu.memory_space<vmem>>, vector<256x4xbf16>
    tpu.vector_store %arg8[%c0_2, %c0_3], %6 {strides = array<i32>} : memref<256x36xbf16, #tpu.memory_space<vmem>>, vector<256x4xbf16>,
    %c0_i32_4 = arith.constant 0 : i32
    %8 = arith.addi %1, %c0_i32_4 : i32
    %c0_5 = arith.constant 0 : index
    %9 = arith.index_cast %8 : i32 to index
    %c1 = arith.constant 1 : index
    %c0_6 = arith.constant 0 : index
    %10 = vector.load %arg2[%c0_5, %9, %c1, %c0_6] : memref<1x18x18x4xbf16, #tpu.memory_space<vmem>>, vector<1x16x16x4xbf16>
    %11 = vector.shape_cast %10 : vector<1x16x16x4xbf16> to vector<16x16x4xbf16>
    %12 = vector.shape_cast %11 : vector<16x16x4xbf16> to vector<256x4xbf16>
    %c0_7 = arith.constant 0 : index
    %c4 = arith.constant 4 : index
    %13 = vector.load %arg8[%c0_7, %c4] : memref<256x36xbf16, #tpu.memory_space<vmem>>, vector<256x4xbf16>
    tpu.vector_store %arg8[%c0_7, %c4], %12 {strides = array<i32>} : memref<256x36xbf16, #tpu.memory_space<vmem>>, vector<256x4xbf16>,
    %c0_i32_8 = arith.constant 0 : i32
    %14 = arith.addi %1, %c0_i32_8 : i32
    %c0_9 = arith.constant 0 : index
    %15 = arith.index_cast %14 : i32 to index
    %c2 = arith.constant 2 : index
    %c0_10 = arith.constant 0 : index
    %16 = vector.load %arg2[%c0_9, %15, %c2, %c0_10] : memref<1x18x18x4xbf16, #tpu.memory_space<vmem>>, vector<1x16x16x4xbf16>
    %17 = vector.shape_cast %16 : vector<1x16x16x4xbf16> to vector<16x16x4xbf16>
    %18 = vector.shape_cast %17 : vector<16x16x4xbf16> to vector<256x4xbf16>
    %c0_11 = arith.constant 0 : index
    %c8 = arith.constant 8 : index
    %19 = vector.load %arg8[%c0_11, %c8] : memref<256x36xbf16, #tpu.memory_space<vmem>>, vector<256x4xbf16>
    tpu.vector_store %arg8[%c0_11, %c8], %18 {strides = array<i32>} : memref<256x36xbf16, #tpu.memory_space<vmem>>, vector<256x4xbf16>,
    %c1_i32 = arith.constant 1 : i32
    %20 = arith.addi %1, %c1_i32 : i32
    %c0_12 = arith.constant 0 : index
    %21 = arith.index_cast %20 : i32 to index
    %c0_13 = arith.constant 0 : index
    %c0_14 = arith.constant 0 : index
    %22 = vector.load %arg2[%c0_12, %21, %c0_13, %c0_14] : memref<1x18x18x4xbf16, #tpu.memory_space<vmem>>, vector<1x16x16x4xbf16>
    %23 = vector.shape_cast %22 : vector<1x16x16x4xbf16> to vector<16x16x4xbf16>
    %24 = vector.shape_cast %23 : vector<16x16x4xbf16> to vector<256x4xbf16>
    %c0_15 = arith.constant 0 : index
    %c12 = arith.constant 12 : index
    %25 = vector.load %arg8[%c0_15, %c12] : memref<256x36xbf16, #tpu.memory_space<vmem>>, vector<256x4xbf16>
    tpu.vector_store %arg8[%c0_15, %c12], %24 {strides = array<i32>} : memref<256x36xbf16, #tpu.memory_space<vmem>>, vector<256x4xbf16>,
    %c1_i32_16 = arith.constant 1 : i32
    %26 = arith.addi %1, %c1_i32_16 : i32
    %c0_17 = arith.constant 0 : index
    %27 = arith.index_cast %26 : i32 to index
    %c1_18 = arith.constant 1 : index
    %c0_19 = arith.constant 0 : index
    %28 = vector.load %arg2[%c0_17, %27, %c1_18, %c0_19] : memref<1x18x18x4xbf16, #tpu.memory_space<vmem>>, vector<1x16x16x4xbf16>
    %29 = vector.shape_cast %28 : vector<1x16x16x4xbf16> to vector<16x16x4xbf16>
    %30 = vector.shape_cast %29 : vector<16x16x4xbf16> to vector<256x4xbf16>
    %c0_20 = arith.constant 0 : index
    %c16 = arith.constant 16 : index
    %31 = vector.load %arg8[%c0_20, %c16] : memref<256x36xbf16, #tpu.memory_space<vmem>>, vector<256x4xbf16>
    tpu.vector_store %arg8[%c0_20, %c16], %30 {strides = array<i32>} : memref<256x36xbf16, #tpu.memory_space<vmem>>, vector<256x4xbf16>,
    %c1_i32_21 = arith.constant 1 : i32
    %32 = arith.addi %1, %c1_i32_21 : i32
    %c0_22 = arith.constant 0 : index
    %33 = arith.index_cast %32 : i32 to index
    %c2_23 = arith.constant 2 : index
    %c0_24 = arith.constant 0 : index
    %34 = vector.load %arg2[%c0_22, %33, %c2_23, %c0_24] : memref<1x18x18x4xbf16, #tpu.memory_space<vmem>>, vector<1x16x16x4xbf16>
    %35 = vector.shape_cast %34 : vector<1x16x16x4xbf16> to vector<16x16x4xbf16>
    %36 = vector.shape_cast %35 : vector<16x16x4xbf16> to vector<256x4xbf16>
    %c0_25 = arith.constant 0 : index
    %c20 = arith.constant 20 : index
    %37 = vector.load %arg8[%c0_25, %c20] : memref<256x36xbf16, #tpu.memory_space<vmem>>, vector<256x4xbf16>
    tpu.vector_store %arg8[%c0_25, %c20], %36 {strides = array<i32>} : memref<256x36xbf16, #tpu.memory_space<vmem>>, vector<256x4xbf16>,
    %c2_i32 = arith.constant 2 : i32
    %38 = arith.addi %1, %c2_i32 : i32
    %c0_26 = arith.constant 0 : index
    %39 = arith.index_cast %38 : i32 to index
    %c0_27 = arith.constant 0 : index
    %c0_28 = arith.constant 0 : index
    %40 = vector.load %arg2[%c0_26, %39, %c0_27, %c0_28] : memref<1x18x18x4xbf16, #tpu.memory_space<vmem>>, vector<1x16x16x4xbf16>
    %41 = vector.shape_cast %40 : vector<1x16x16x4xbf16> to vector<16x16x4xbf16>
    %42 = vector.shape_cast %41 : vector<16x16x4xbf16> to vector<256x4xbf16>
    %c0_29 = arith.constant 0 : index
    %c24 = arith.constant 24 : index
    %43 = vector.load %arg8[%c0_29, %c24] : memref<256x36xbf16, #tpu.memory_space<vmem>>, vector<256x4xbf16>
    tpu.vector_store %arg8[%c0_29, %c24], %42 {strides = array<i32>} : memref<256x36xbf16, #tpu.memory_space<vmem>>, vector<256x4xbf16>,
    %c2_i32_30 = arith.constant 2 : i32
    %44 = arith.addi %1, %c2_i32_30 : i32
    %c0_31 = arith.constant 0 : index
    %45 = arith.index_cast %44 : i32 to index
    %c1_32 = arith.constant 1 : index
    %c0_33 = arith.constant 0 : index
    %46 = vector.load %arg2[%c0_31, %45, %c1_32, %c0_33] : memref<1x18x18x4xbf16, #tpu.memory_space<vmem>>, vector<1x16x16x4xbf16>
    %47 = vector.shape_cast %46 : vector<1x16x16x4xbf16> to vector<16x16x4xbf16>
    %48 = vector.shape_cast %47 : vector<16x16x4xbf16> to vector<256x4xbf16>
    %c0_34 = arith.constant 0 : index
    %c28 = arith.constant 28 : index
    %49 = vector.load %arg8[%c0_34, %c28] : memref<256x36xbf16, #tpu.memory_space<vmem>>, vector<256x4xbf16>
    tpu.vector_store %arg8[%c0_34, %c28], %48 {strides = array<i32>} : memref<256x36xbf16, #tpu.memory_space<vmem>>, vector<256x4xbf16>,
    %c2_i32_35 = arith.constant 2 : i32
    %50 = arith.addi %1, %c2_i32_35 : i32
    %c0_36 = arith.constant 0 : index
    %51 = arith.index_cast %50 : i32 to index
    %c2_37 = arith.constant 2 : index
    %c0_38 = arith.constant 0 : index
    %52 = vector.load %arg2[%c0_36, %51, %c2_37, %c0_38] : memref<1x18x18x4xbf16, #tpu.memory_space<vmem>>, vector<1x16x16x4xbf16>
    %53 = vector.shape_cast %52 : vector<1x16x16x4xbf16> to vector<16x16x4xbf16>
    %54 = vector.shape_cast %53 : vector<16x16x4xbf16> to vector<256x4xbf16>
    %c0_39 = arith.constant 0 : index
    %c32 = arith.constant 32 : index
    %55 = vector.load %arg8[%c0_39, %c32] : memref<256x36xbf16, #tpu.memory_space<vmem>>, vector<256x4xbf16>
    tpu.vector_store %arg8[%c0_39, %c32], %54 {strides = array<i32>} : memref<256x36xbf16, #tpu.memory_space<vmem>>, vector<256x4xbf16>,
    %c0_40 = arith.constant 0 : index
    %c0_41 = arith.constant 0 : index
    %56 = vector.load %arg3[%c0_40, %c0_41] : memref<8x36xbf16, #tpu.memory_space<vmem>>, vector<8x36xbf16>
    %c0_42 = arith.constant 0 : index
    %c0_43 = arith.constant 0 : index
    %57 = vector.load %arg8[%c0_42, %c0_43] : memref<256x36xbf16, #tpu.memory_space<vmem>>, vector<256x36xbf16>
    %cst = arith.constant dense<0.000000e+00> : vector<8x256xf32>
    %58 = tpu.matmul %56, %57, %cst {dimension_numbers = #tpu.dot_dimension_numbers<[1], [1], [0], [0], [0, 0, 1, 0], [], []>} : vector<8x36xbf16>, vector<256x36xbf16>, vector<8x256xf32> -> vector<8x256xf32>
    %c0_44 = arith.constant 0 : index
    %c0_45 = arith.constant 0 : index
    %59 = vector.load %arg4[%c0_44, %c0_45] : memref<8x1xf32, #tpu.memory_space<vmem>>, vector<8x1xf32>
    %60 = vector.broadcast %59 : vector<8x1xf32> to vector<8x256xf32>
    %61 = arith.addf %58, %60 : vector<8x256xf32>
    %c0_46 = arith.constant 0 : index
    %c0_47 = arith.constant 0 : index
    %c0_48 = arith.constant 0 : index
    %62 = vector.load %arg5[%c0_46, %c0_47, %c0_48] : memref<1x8x256xf32, #tpu.memory_space<vmem>>, vector<1x8x256xf32>
    %63 = vector.shape_cast %62 : vector<1x8x256xf32> to vector<8x256xf32>
    %64 = vector.shape_cast %61 : vector<8x256xf32> to vector<1x8x256xf32>
    tpu.vector_store %arg5[%c0_46, %c0_47, %c0_48], %64 {strides = array<i32>} : memref<1x8x256xf32, #tpu.memory_space<vmem>>, vector<1x8x256xf32>,
    %cst_49 = arith.constant dense<0.000000e+00> : vector<8xf32>
    %65 = vector.multi_reduction <add>, %61, %cst_49 [1] : vector<8x256xf32> to vector<8xf32>
    %66 = vector.shape_cast %65 : vector<8xf32> to vector<8x1xf32>
    %c0_50 = arith.constant 0 : index
    %c0_51 = arith.constant 0 : index
    %c0_52 = arith.constant 0 : index
    %c0_53 = arith.constant 0 : index
    %67 = vector.load %arg6[%c0_50, %c0_51, %c0_52, %c0_53] : memref<1x1x8x1xf32, #tpu.memory_space<vmem>>, vector<1x1x8x1xf32>
    %68 = vector.shape_cast %67 : vector<1x1x8x1xf32> to vector<8x1xf32>
    %69 = vector.shape_cast %66 : vector<8x1xf32> to vector<1x1x8x1xf32>
    tpu.vector_store %arg6[%c0_50, %c0_51, %c0_52, %c0_53], %69 {strides = array<i32>} : memref<1x1x8x1xf32, #tpu.memory_space<vmem>>, vector<1x1x8x1xf32>,
    %70 = arith.mulf %61, %61 : vector<8x256xf32>
    %cst_54 = arith.constant dense<0.000000e+00> : vector<8xf32>
    %71 = vector.multi_reduction <add>, %70, %cst_54 [1] : vector<8x256xf32> to vector<8xf32>
    %72 = vector.shape_cast %71 : vector<8xf32> to vector<8x1xf32>
    %c0_55 = arith.constant 0 : index
    %c0_56 = arith.constant 0 : index
    %c0_57 = arith.constant 0 : index
    %c0_58 = arith.constant 0 : index
    %73 = vector.load %arg7[%c0_55, %c0_56, %c0_57, %c0_58] : memref<1x1x8x1xf32, #tpu.memory_space<vmem>>, vector<1x1x8x1xf32>
    %74 = vector.shape_cast %73 : vector<1x1x8x1xf32> to vector<8x1xf32>
    %75 = vector.shape_cast %72 : vector<8x1xf32> to vector<1x1x8x1xf32>
    tpu.vector_store %arg7[%c0_55, %c0_56, %c0_57, %c0_58], %75 {strides = array<i32>} : memref<1x1x8x1xf32, #tpu.memory_space<vmem>>, vector<1x1x8x1xf32>,
    return
  }
  func.func @transform_0(%arg0: i32, %arg1: i32) -> (i32, i32, i32, i32) {
    %c0_i32 = arith.constant 0 : i32
    %c0_i32_0 = arith.constant 0 : i32
    %c0_i32_1 = arith.constant 0 : i32
    %c0_i32_2 = arith.constant 0 : i32
    return %arg0, %c0_i32, %c0_i32_0, %c0_i32_1 : i32, i32, i32, i32
  }
  func.func @transform_1(%arg0: i32, %arg1: i32) -> (i32, i32) {
    %c0_i32 = arith.constant 0 : i32
    %c0_i32_0 = arith.constant 0 : i32
    %c0_i32_1 = arith.constant 0 : i32
    return %c0_i32, %c0_i32_0 : i32, i32
  }
  func.func @transform_2(%arg0: i32, %arg1: i32) -> (i32, i32) {
    %c0_i32 = arith.constant 0 : i32
    %c0_i32_0 = arith.constant 0 : i32
    %c0_i32_1 = arith.constant 0 : i32
    return %c0_i32, %c0_i32_0 : i32, i32
  }
  func.func @transform_3(%arg0: i32, %arg1: i32) -> (i32, i32, i32) {
    %c0_i32 = arith.constant 0 : i32
    %c0_i32_0 = arith.constant 0 : i32
    return %arg0, %c0_i32, %arg1 : i32, i32, i32
  }
  func.func @transform_4(%arg0: i32, %arg1: i32) -> (i32, i32, i32, i32) {
    %c0_i32 = arith.constant 0 : i32
    %c0_i32_0 = arith.constant 0 : i32
    %c0_i32_1 = arith.constant 0 : i32
    return %arg0, %arg1, %c0_i32, %c0_i32_0 : i32, i32, i32, i32
  }
  func.func @transform_5(%arg0: i32, %arg1: i32) -> (i32, i32, i32, i32) {
    %c0_i32 = arith.constant 0 : i32
    %c0_i32_0 = arith.constant 0 : i32
    %c0_i32_1 = arith.constant 0 : i32
    return %arg0, %arg1, %c0_i32, %c0_i32_0 : i32, i32, i32, i32
  }
}

module attributes {stable_mosaic.version = 11 : i64} {
  func.func @bn_relu_kernel(%arg0: i32, %arg1: i32, %arg2: memref<1x8x256xf32, #tpu.memory_space<vmem>>, %arg3: memref<8x1xf32, #tpu.memory_space<vmem>>, %arg4: memref<8x1xf32, #tpu.memory_space<vmem>>, %arg5: memref<1x8x256xf32, #tpu.memory_space<vmem>>) attributes {dimension_semantics = [#tpu.dimension_semantics<parallel>, #tpu.dimension_semantics<parallel>], iteration_bounds = array<i64: 2, 1>, scalar_prefetch = 0 : i64, scratch_operands = 0 : i64, tpu.core_type = #tpu.core_type<tc>, window_params = [{transform_indices = @transform_0, window_bounds = array<i64: 1, 8, 256>}, {pipeline_mode = #tpu.pipeline_mode<synchronous>, transform_indices = @transform_1, window_bounds = array<i64: 8, 1>}, {pipeline_mode = #tpu.pipeline_mode<synchronous>, transform_indices = @transform_2, window_bounds = array<i64: 8, 1>}, {transform_indices = @transform_3, window_bounds = array<i64: 1, 8, 256>}]} {
    %c0 = arith.constant 0 : index
    %c0_0 = arith.constant 0 : index
    %c0_1 = arith.constant 0 : index
    %0 = vector.load %arg2[%c0, %c0_0, %c0_1] : memref<1x8x256xf32, #tpu.memory_space<vmem>>, vector<1x8x256xf32>
    %1 = vector.shape_cast %0 : vector<1x8x256xf32> to vector<8x256xf32>
    %c0_2 = arith.constant 0 : index
    %c0_3 = arith.constant 0 : index
    %2 = vector.load %arg3[%c0_2, %c0_3] : memref<8x1xf32, #tpu.memory_space<vmem>>, vector<8x1xf32>
    %3 = vector.broadcast %2 : vector<8x1xf32> to vector<8x256xf32>
    %4 = arith.mulf %1, %3 : vector<8x256xf32>
    %c0_4 = arith.constant 0 : index
    %c0_5 = arith.constant 0 : index
    %5 = vector.load %arg4[%c0_4, %c0_5] : memref<8x1xf32, #tpu.memory_space<vmem>>, vector<8x1xf32>
    %6 = vector.broadcast %5 : vector<8x1xf32> to vector<8x256xf32>
    %7 = arith.addf %4, %6 : vector<8x256xf32>
    %cst = arith.constant 0.000000e+00 : f32
    %8 = vector.broadcast %cst : f32 to vector<8x256xf32>
    %9 = arith.maximumf %7, %8 : vector<8x256xf32>
    %c0_6 = arith.constant 0 : index
    %c0_7 = arith.constant 0 : index
    %c0_8 = arith.constant 0 : index
    %10 = vector.load %arg5[%c0_6, %c0_7, %c0_8] : memref<1x8x256xf32, #tpu.memory_space<vmem>>, vector<1x8x256xf32>
    %11 = vector.shape_cast %10 : vector<1x8x256xf32> to vector<8x256xf32>
    %12 = vector.shape_cast %9 : vector<8x256xf32> to vector<1x8x256xf32>
    tpu.vector_store %arg5[%c0_6, %c0_7, %c0_8], %12 {strides = array<i32>} : memref<1x8x256xf32, #tpu.memory_space<vmem>>, vector<1x8x256xf32>,
    return
  }
  func.func @transform_0(%arg0: i32, %arg1: i32) -> (i32, i32, i32) {
    %c0_i32 = arith.constant 0 : i32
    %c0_i32_0 = arith.constant 0 : i32
    return %arg0, %c0_i32, %arg1 : i32, i32, i32
  }
  func.func @transform_1(%arg0: i32, %arg1: i32) -> (i32, i32) {
    %c0_i32 = arith.constant 0 : i32
    %c0_i32_0 = arith.constant 0 : i32
    %c0_i32_1 = arith.constant 0 : i32
    return %c0_i32, %c0_i32_0 : i32, i32
  }
  func.func @transform_2(%arg0: i32, %arg1: i32) -> (i32, i32) {
    %c0_i32 = arith.constant 0 : i32
    %c0_i32_0 = arith.constant 0 : i32
    %c0_i32_1 = arith.constant 0 : i32
    return %c0_i32, %c0_i32_0 : i32, i32
  }
  func.func @transform_3(%arg0: i32, %arg1: i32) -> (i32, i32, i32) {
    %c0_i32 = arith.constant 0 : i32
    %c0_i32_0 = arith.constant 0 : i32
    return %arg0, %c0_i32, %arg1 : i32, i32, i32
  }
}

</mosaic_0001>

<bundles_post_ra>
// kernel: conv_block_forward.3
= control target key start
LH: loop header
LB: loop body
LE: loop exit
PB: predicated region body
PF: predicated region fallthrough
CT: control target
= control target key end

     0   :  { %8 = vsyncpa [#allocation3], 0  ;;  %s922_s0 = inlined_call_operand.hbm [shape: f32[2,8,256], index: 0, kind: input, shape index: {}]   ;;  %s923_s1 = inlined_call_operand.hbm [shape: f32[8,1], index: 1, kind: input, shape index: {}]   ;;  %s924_s2 = inlined_call_operand.hbm [shape: f32[8,1], index: 2, kind: input, shape index: {}]   ;;  %s925_s3 = inlined_call_operand.hbm [shape: f32[2,8,256], index: 3, kind: output, shape index: {}]  }
   0x1   :  { %10 = vsyncpa [#allocation3 + $0x1], 0 }
   0x2   :  { %11 = vsyncpa [#allocation6], 0 }
   0x3   :  { %12 = vsyncpa [#allocation4], 0 }
   0x4   :  { %14 = vsyncpa [#allocation4 + $0x1], 0  ;;  %s679_s12 = smov 0   ;;  %s681_s13 = smov 0  }
   0x5   :  { %s683_s14 = smov 0   ;;  %s685_s15 = smov 0  }
   0x6   :  { %s687_s16 = smov 0   ;;  %s689_s17 = smov 0  }
   0x7 LB: > { %s374_s18 = sadd.s32 4294967295, %s652_s17   ;;  %s375_s19 = sadd.s32 4294967294, %s652_s17   ;;  %s652_s17 = sphi %s689_s17, %s20_s17   ;;  %s648_s16 = sphi %s687_s16, %s948_s16   ;;  %s644_s15 = sphi %s685_s15, %s947_s15   ;;  %s640_s14 = sphi %s683_s14, %s946_s14   ;;  %s636_s13 = sphi %s681_s13, %s945_s13   ;;  %s632_s12 = sphi %s679_s12, %s944_s12  }
   0x8   : > { %p54_p0 = scmp.ne.s32.totalorder %s636_s13, %s632_s12  ;;  %p713_p1 = scmp.eq.s32.totalorder %s374_s18, 0 }
   0x9   : > { %p717_p2 = scmp.eq.s32.totalorder %s374_s18, 1  ;;  %p128_p3 = scmp.eq.s32.totalorder %s375_s19, 1 }
   0xa   : > { %s930_s20 = scalar_select %p713_p1, 1, 0 }
   0xb   : > { %s931_s21 = scalar_select %p717_p2, 1, 0 }
   0xc   : > { %p723_p4 = por %p713_p1, %p54_p0  ;;  %p376_p5 = scmp.ge.s32.totalorder %s652_s17, 1 }
   0xd   : > { %p728_p6 = por %p128_p3, %p54_p0  ;;  %p135_p7 = scmp.lt.s32.totalorder %s652_s17, 3 }
   0xe   : > { %s932_s22 = scalar_select %p723_p4, 1, 0 }
   0xf   : > { %s933_s23 = scalar_select %p728_p6, 1, 0 }
  0x10   : > { %p733_p8 = pnand %p376_p5, %p135_p7  ;;  %s654_s25 = smov [#allocation5]  }
  0x11   : > { %s148_s26 = sshll.u32 %s654_s25, 4  ;;  %s655_s27 = smov [#allocation7]   ;;  %s149_s26 = int_to_ptr.vmem [resolvable:$true] %s148_s26 }
  0x12   : > { %s934_s24 = scalar_select %p733_p8, 1, 0 }
  0x13   : > { %p407_p10 = pneg %p733_p8  ;;  %s159_s28 = sshll.u32 %s655_s27, 4  ;;  %s746_s28 = int_to_ptr.vmem [resolvable:$true] %s159_s28 }
  0x14   : > { %s480_s5 = scalar_lea.hbm %s923_s1, 128 }
  0x15   : > { %p742_p11 = pnand %p407_p10, %p713_p1  ;;  %p481_p12 = scmp.ne.s32.totalorder %s923_s1, %s480_s5 }
  0x16   : > { %p487_p5 = scmp.lt.u32.totalorder %s480_s5, %s923_s1 }
  0x17   : > { %p482_p13 = pneg %p742_p11 }
  0x19   : > { %p483_p0 = pnand %p482_p13, %p481_p12 }
  0x1b   : > { %p484_p3 = pneg %p483_p0 }
  0x1d   : > { %p489_p7 = pnand %p487_p5, %p484_p3 }
  0x1f   : > { %492 = shalt.err (!%p489_p7)
}
  0x20   : > { %s493_s10 = scalar_lea.vmem %s149_s26, 128  ;;  %p501_p1 = scmp.lt.s32.totalorder %s149_s26, %s149_s26 }
  0x21   : > { %p494_p10 = scmp.ne.s32.totalorder %s149_s26, %s493_s10  ;;  %p502_p4 = scmp.lt.s32.totalorder %s493_s10, %s493_s10 }
  0x23   : > { %p496_p9 = pnand %p494_p10, %p482_p13  ;;  %p503_p8 = por %p502_p4, %p501_p1 }
  0x25   : > { %p497_p6 = pneg %p496_p9 }
  0x27   : > { %p504_p2 = pnand %p503_p8, %p497_p6 }
  0x29   : > { %507 = shalt.err (!%p504_p2)
}
  0x2a   : > { %410 = dma.hbm_to_vmem [thread:$0]  (!%p742_p11), %s923_s1, 128, %s149_s26, [#allocation6]  }
  0x2b   : > { %s508_s27 = scalar_lea.hbm %s924_s2, 128 }
  0x2c   : > { %p509_p9 = scmp.ne.s32.totalorder %s924_s2, %s508_s27  ;;  %p515_p2 = scmp.lt.u32.totalorder %s508_s27, %s924_s2 }
  0x2e   : > { %p511_p1 = pnand %p509_p9, %p482_p13 }
  0x30   : > { %p512_p4 = pneg %p511_p1 }
  0x32   : > { %p517_p6 = pnand %p515_p2, %p512_p4 }
  0x34   : > { %520 = shalt.err (!%p517_p6)
}
  0x35   : > { %s521_s26 = scalar_lea.vmem %s746_s28, 128  ;;  %p529_p3 = scmp.lt.s32.totalorder %s746_s28, %s746_s28 }
  0x36   : > { %p522_p8 = scmp.ne.s32.totalorder %s746_s28, %s521_s26  ;;  %p530_p5 = scmp.lt.s32.totalorder %s521_s26, %s521_s26 }
  0x38   : > { %p524_p12 = pnand %p522_p8, %p482_p13  ;;  %p531_p7 = por %p530_p5, %p529_p3 }
  0x3a   : > { %p525_p0 = pneg %p524_p12 }
  0x3c   : > { %p532_p10 = pnand %p531_p7, %p525_p0 }
  0x3e   : > { %535 = shalt.err (!%p532_p10)
}
  0x3f   : > { %413 = dma.hbm_to_vmem [thread:$0]  (!%p742_p11), %s924_s2, 128, %s746_s28, [#allocation6]  }
  0x40   : > { %s32_s9 = sadd.s32 1, %s648_s16  ;;  %s41_s10 = sadd.s32 1, %s640_s14 }
  0x41   : > { %p34_p13 = scmp.ge.s32.totalorder %s32_s9, 2  ;;  %p48_p9 = scmp.ne.s32.totalorder %s640_s14, %s636_s13 }
  0x42   : > { %p49_p1 = scmp.eq.s32.totalorder %s652_s17, 0  ;;  %p424_p4 = scmp.lt.s32.totalorder %s652_s17, 2 }
  0x43   : > { %s950_s9 = smov (%p34_p13, %s32_s9), 0  ;;  %p936_p6 = scmp.ne.s32.totalorder %s931_s21, 0 }
  0x44   : > { %p50_p2 = por %p49_p1, %p48_p9  ;;  %s36_s11 = ssub.s32 %s648_s16, %s950_s9 }
  0x45   : > { %p805_p8 = por %p936_p6, %p48_p9  ;;  %s170_s18 = sand.u32 1, %s640_s14  }
  0x46   : > { %p39_p12 = scmp.eq.s32.totalorder %s36_s11, 0  ;;  %s380_s28 = sshll.u32 %s170_s18, 4 }
  0x47   : > { %s393_s19 = sshll.u32 %s648_s16, 8  ;;  %s174_s21 = scalar_lea.vmem [#allocation2], %s380_s28 }
  0x48   : > { %s814_s25 = scalar_select %p39_p12, %s640_s14, %s41_s10  }
  0x49   : > { %s819_s4 = scalar_lea.hbm %s922_s0, %s393_s19  ;;  %s184_s5 = sshll.u32 %s174_s21, 4  ;;  %s827_s5 = int_to_ptr.vmem [resolvable:$true] %s184_s5 }
  0x4a   : > { %p823_p11 = pnand %p424_p4, %p50_p2  ;;  %s171_s26 = scalar_lea.sflag [#allocation3], %s170_s18 }
  0x4b   : > { %s536_s7 = scalar_lea.hbm %s819_s4, 256  ;;  %s541_s11 = scalar_lea.hbm %s922_s0, 512 }
  0x4c   : > { %p537_p0 = scmp.ne.s32.totalorder %s819_s4, %s536_s7  ;;  %p538_p3 = pneg %p823_p11 }
  0x4d   : > { %p542_p10 = scmp.lt.u32.totalorder %s819_s4, %s922_s0  ;;  %p543_p13 = scmp.lt.u32.totalorder %s541_s11, %s536_s7 }
  0x4e   : > { %p539_p5 = pnand %p538_p3, %p537_p0  ;;  %p545_p1 = scmp.lt.u32.totalorder %s536_s7, %s819_s4 }
  0x4f   : > { %p544_p9 = por %p543_p13, %p542_p10 }
  0x50   : > { %p540_p7 = pneg %p539_p5 }
  0x51   : > { %p546_p4 = por %p545_p1, %p544_p9 }
  0x53   : > { %p547_p2 = pnand %p546_p4, %p540_p7 }
  0x55   : > { %550 = shalt.err (!%p547_p2)
}
  0x56   : > { %s551_s18 = scalar_lea.vmem %s827_s5, 256  ;;  %s656_s27 = smov [#allocation2]  }
  0x57   : > { %p552_p6 = scmp.ne.s32.totalorder %s827_s5, %s551_s18  ;;  %s556_s30 = sshll.u32 %s656_s27, 4  ;;  %s557_s30 = int_to_ptr.vmem [resolvable:$false] %s556_s30 }
  0x58   : > { %s558_s21 = scalar_lea.vmem %s557_s30, 512  ;;  %p559_p5 = scmp.lt.s32.totalorder %s827_s5, %s557_s30 }
  0x59   : > { %p554_p12 = pnand %p552_p6, %p538_p3  ;;  %p560_p10 = scmp.lt.s32.totalorder %s558_s21, %s551_s18 }
  0x5b   : > { %p555_p0 = pneg %p554_p12  ;;  %p561_p13 = por %p560_p10, %p559_p5 }
  0x5d   : > { %p562_p9 = pnand %p561_p13, %p555_p0 }
  0x5f   : > { %565 = shalt.err (!%p562_p9)
}
  0x60   : > { %417 = dma.hbm_to_vmem [thread:$0]  (!%p823_p11), %s819_s4, 256, %s827_s5, %s171_s26  }
  0x61   : > { %p939_p7 = scmp.ne.s32.totalorder %s934_s24, 0 }
  0x62   : > { %s857_s7 = sand.u32 (!%p939_p7), 1, %s636_s13   ;;  %p940_p3 = scmp.ne.s32.totalorder (!%p939_p7), %s932_s22, 0 }
  0x63   : > { %193 = sbr.rel (%p939_p7) target bundleno = 262 (0x106), region = 32  ;;  %s384_s8 = sshll.u32 (!%p939_p7), %s857_s7, 4 }
  0x64   : > { %s196_s10 = scalar_lea.sflag (!%p939_p7), [#allocation3], %s857_s7  ;;  %s199_s11 = scalar_lea.vmem (!%p939_p7), [#allocation2], %s384_s8 }
  0x6a   : > { %619 = dma.done.wait (%p940_p3), %s196_s10, 256  }
  0x6b   : > { %621 = vsyncadd (%p940_p3), %s196_s10, 4294967040  ;;  %p941_p1 = scmp.ne.s32.totalorder %s930_s20, 0 }
  0x6d   : > { %623 = dma.done.wait (%p941_p1), [#allocation6], 256  }
  0x6e   : > { %625 = vsyncadd (%p941_p1), [#allocation6], 4294967040  ;;  %v657_v0 = vmov 0   ;;  %v234_v1 = vld [vmem:[#allocation5] sm:$0xff]  ;;  %v242_v2 = vld [vmem:[#allocation7] sm:$0xff]  ;;  %s394_s22 = sshll.u32 %s644_s15, 8 }
  0x6f   : > { %479 = vset.pattern.permute.xlu0 %v657_v0  ;;  %v232_v4 = vld [vmem:[%s199_s11] sm:$0xff]  ;;  %v233_v5 = vld [vmem:[%s199_s11 + $0x8] sm:$0xff]  ;;  %s229_s24 = scalar_lea.vmem [#allocation8], %s384_s8  ;;  %s873_s6 = scalar_lea.hbm %s925_s3, %s394_s22 }
  0x70   : > { %237 = vperm.xlu0 %479, %v234_v1   ;;  %s271_s4 = sshll.u32 %s229_s24, 4  ;;  %s255_s26 = scalar_lea.sflag [#allocation4], %s857_s7  ;;  %s875_s4 = int_to_ptr.vmem [resolvable:$true] %s271_s4 }
  0x71   : > { %s566_s15 = scalar_lea.vmem %s875_s4, 256  ;;  %s658_s28 = smov [#allocation8]  }
  0x72   : > { %p567_p11 = scmp.ne.s32.totalorder %s875_s4, %s566_s15  ;;  %s570_s19 = sshll.u32 %s658_s28, 4  ;;  %s571_s19 = int_to_ptr.vmem [resolvable:$false] %s570_s19 }
  0x73   : > { %s572_s18 = scalar_lea.vmem %s571_s19, 512  ;;  %p573_p6 = scmp.lt.s32.totalorder %s875_s4, %s571_s19 }
  0x74   : > { %245 = vperm.xlu0 %479, %v242_v2   ;;  %p568_p4 = pnand %p567_p11, %p805_p8  ;;  %p574_p12 = scmp.lt.s32.totalorder %s572_s18, %s566_s15 }
  0x76   : > { %p569_p2 = pneg %p568_p4  ;;  %p575_p0 = por %p574_p12, %p573_p6 }
  0x78   : > { %p576_p5 = pnand %p575_p0, %p569_p2 }
  0xef   : > { %v238_v3 = vpop.permute.xlu0 %237 }
  0xf0   : > { %v240_v6 = vmul.f32 %v238_v3, %v232_v4  ;;  %v241_v7 = vmul.f32 %v238_v3, %v233_v5 }
  0xf3   : > { %v246_v8 = vpop.permute.xlu0 %245 }
  0xf4   : > { %v248_v9 = vadd.f32 %v246_v8, %v240_v6  ;;  %v249_v10 = vadd.f32 %v246_v8, %v241_v7 }
  0xf6   : > { %v250_v11 = vmax.f32 %v248_v9, 0.0  ;;  %v251_v12 = vmax.f32 %v249_v10, 0.0 }
  0xf8   : > { %252 = vst [vmem:[%s229_s24] sm:$0xff] %v250_v11  ;;  %253 = vst [vmem:[%s229_s24 + $0x8] sm:$0xff] %v251_v12 }
  0xf9   : > { %579 = shalt.err (!%p576_p5)
}
  0xfa   : > { %s580_s27 = scalar_lea.hbm %s873_s6, 256  ;;  %s584_s7 = scalar_lea.hbm %s925_s3, 512 }
  0xfb   : > { %p581_p10 = scmp.ne.s32.totalorder %s873_s6, %s580_s27  ;;  %p585_p7 = scmp.lt.u32.totalorder %s873_s6, %s925_s3 }
  0xfc   : > { %p586_p3 = scmp.lt.u32.totalorder %s584_s7, %s580_s27  ;;  %p588_p11 = scmp.lt.u32.totalorder %s580_s27, %s873_s6 }
  0xfd   : > { %p582_p13 = pnand %p581_p10, %p805_p8 }
  0xfe   : > { %p587_p1 = por %p586_p3, %p585_p7 }
  0xff   : > { %p583_p9 = pneg %p582_p13 }
 0x100   : > { %p589_p4 = por %p588_p11, %p587_p1 }
 0x102   : > { %p590_p2 = pnand %p589_p4, %p583_p9 }
 0x104   : > { %593 = shalt.err (!%p590_p2)
}
 0x105   : > { %405 = dma.vmem_to_hbm [thread:$0]  (%p805_p8), %s875_s4, 256, %s873_s6, %s255_s26  }
 0x106 PF: > { %s283_s11 = sand.u32 1, %s632_s12   ;;  %p942_p6 = scmp.ne.s32.totalorder %s933_s23, 0 }
 0x107   : > { %p943_p12 = scmp.ge.s32.totalorder %s652_s17, 2  ;;  %s284_s22 = scalar_lea.sflag [#allocation4], %s283_s11 }
 0x109   : > { %p419_p0 = pnand %p943_p12, %p942_p6 }
 0x10b   : > { %627 = dma.done.wait (!%p419_p0), %s284_s22, 256  }
 0x10c   : > { %629 = vsyncadd (!%p419_p0), %s284_s22, 4294967040  ;;  %s20_s17 = sadd.s32 1, %s652_s17   ;;  %s944_s12 = smov %s636_s13 }
 0x10d   : > { %p17_p5 = scmp.ge.s32.totalorder %s20_s17, 4   ;;  %s945_s13 = smov %s640_s14 }
 0x10e   : > { %s946_s14 = smov %s814_s25  ;;  %s947_s15 = smov %s648_s16 }
 0x10f   : > { %s948_s16 = smov %s950_s9  ;;  %19 = sbr.rel (!%p17_p5) target bundleno = 7 (0x7), region = 85 }
 0x116   :  { %289 = vsyncpa [#allocation3], 1 }
 0x117   :  { %291 = vsyncpa [#allocation3 + $0x1], 1 }
 0x118   :  { %292 = vsyncpa [#allocation6], 1 }
 0x119   :  { %293 = vsyncpa [#allocation4], 1 }
 0x11a   :  { %295 = vsyncpa [#allocation4 + $0x1], 1 }

// kernel: conv_block_forward.2
= control target key start
LH: loop header
LB: loop body
LE: loop exit
PB: predicated region body
PF: predicated region fallthrough
CT: control target
= control target key end

     0   :  { %s6090_s0 = inlined_call_operand.hbm [shape: bf16[2,18,18,4], index: 0, kind: input, shape index: {}]   ;;  %s6091_s1 = inlined_call_operand.hbm [shape: bf16[8,36], index: 1, kind: input, shape index: {}]   ;;  %s6092_s2 = inlined_call_operand.hbm [shape: f32[8,1], index: 2, kind: input, shape index: {}]   ;;  %s6093_s3 = inlined_call_operand.hbm [shape: f32[2,8,256], index: 3, kind: output, shape index: {0}]   ;;  %s6094_s4 = inlined_call_operand.hbm [shape: f32[2,1,8,1], index: 4, kind: output, shape index: {1}]   ;;  %s6095_s5 = inlined_call_operand.hbm [shape: f32[2,1,8,1], index: 5, kind: output, shape index: {2}]  }
   0x1   :  { %6102 = sst [smem:[#allocation17_spill]] %s6091_s1 }
   0x2   :  { %11 = vsyncpa [#allocation4], 0 }
   0x3   :  { %13 = vsyncpa [#allocation4 + $0x1], 0 }
   0x4   :  { %14 = vsyncpa [#allocation7], 0 }
   0x5   :  { %15 = vsyncpa [#allocation5], 0 }
   0x6   :  { %17 = vsyncpa [#allocation5 + $0x1], 0 }
   0x7   :  { %18 = vsyncpa [#allocation11], 0 }
   0x8   :  { %20 = vsyncpa [#allocation11 + $0x1], 0  ;;  %s4713_s18 = smov 0   ;;  %s4715_s19 = smov 0  }
   0x9   :  { %s4717_s20 = smov 0   ;;  %s4719_s21 = smov 0  }
   0xa   :  { %s4721_s22 = smov 0   ;;  %s4723_s23 = smov 0  }
   0xb LB: > { %s4744_s24 = sadd.s32 4294967295, %s4664_s23   ;;  %s6101_s25 = sadd.s32 4294967294, %s4664_s23   ;;  %s4664_s23 = sphi %s4723_s23, %s26_s23   ;;  %s4660_s22 = sphi %s4721_s22, %s6128_s22   ;;  %s4656_s21 = sphi %s4719_s21, %s6127_s21   ;;  %s4652_s20 = sphi %s4717_s20, %s6126_s20   ;;  %s4648_s19 = sphi %s4715_s19, %s6125_s19   ;;  %s4644_s18 = sphi %s4713_s18, %s6124_s18  }
   0xc   : > { %s45_s26 = sadd.s32 1, %s4652_s20  ;;  %p52_p0 = scmp.ne.s32.totalorder %s4652_s20, %s4648_s19 }
   0xd   : > { %p53_p1 = scmp.eq.s32.totalorder %s4664_s23, 0  ;;  %p58_p2 = scmp.ne.s32.totalorder %s4648_s19, %s4644_s18 }
   0xe   : > { %p6096_p3 = scmp.eq.s32.totalorder %s4744_s24, 0  ;;  %p126_p4 = scmp.eq.s32.totalorder %s4744_s24, 1 }
   0xf   : > { %p4755_p5 = por %p53_p1, %p52_p0  ;;  %p132_p6 = scmp.eq.s32.totalorder %s6101_s25, 1 }
  0x10   : > { %p4763_p7 = por %p6096_p3, %p58_p2  ;;  %p4767_p8 = por %p126_p4, %p52_p0 }
  0x11   : > { %p4771_p9 = por %p132_p6, %p58_p2  ;;  %p3780_p10 = scmp.ge.s32.totalorder %s4664_s23, 1 }
  0x12   : > { %s6104_s28 = scalar_select %p4763_p7, 1, 0 }
  0x13   : > { %s6105_s29 = scalar_select %p4767_p8, 1, 0 }
  0x14   : > { %s6106_s30 = scalar_select %p4771_p9, 1, 0 }
  0x15   : > { %p195_p11 = scmp.lt.s32.totalorder %s4664_s23, 3  ;;  %s4666_s7 = smov [#allocation6]  }
  0x16   : > { %s208_s8 = sshll.u32 %s4666_s7, 4  ;;  %p4318_p1 = scmp.lt.s32.totalorder %s4664_s23, 2  ;;  %s209_s8 = int_to_ptr.vmem [resolvable:$true] %s208_s8 }
  0x17   : > { %p4778_p13 = pnand %p3780_p10, %p195_p11  ;;  %s4667_s10 = smov [#allocation8]  }
  0x18   : > { %p4787_p4 = pnand %p4318_p1, %p4755_p5  ;;  %s219_s11 = sshll.u32 %s4667_s10, 4  ;;  %s4797_s11 = int_to_ptr.vmem [resolvable:$true] %s219_s11 }
  0x19   : > { %s6107_s6 = scalar_select %p4778_p13, 1, 0 }
  0x1a   : > { %p4295_p0 = pneg %p4778_p13  ;;  %s6110_s1 = sld [smem:[#allocation17_spill]] }
  0x1b   : > { %s6108_s9 = scalar_select %p4787_p4, 1, 0 }
  0x1c   : > { %p4793_p2 = pnand %p4295_p0, %p6096_p3 }
  0x1e   : > { %p4434_p6 = pneg %p4793_p2 }
  0x20   : > { %s4432_s15 = scalar_lea.hbm %s6110_s1, 64 }
  0x21   : > { %p4433_p5 = scmp.ne.s32.totalorder %s6110_s1, %s4432_s15  ;;  %p4439_p1 = scmp.lt.u32.totalorder %s4432_s15, %s6110_s1 }
  0x23   : > { %p4435_p10 = pnand %p4434_p6, %p4433_p5 }
  0x25   : > { %p4436_p11 = pneg %p4435_p10 }
  0x27   : > { %p4441_p0 = pnand %p4439_p1, %p4436_p11 }
  0x29   : > { %4444 = shalt.err (!%p4441_p0)
}
  0x2a   : > { %s4445_s10 = scalar_lea.vmem %s209_s8, 64  ;;  %p4453_p8 = scmp.lt.s32.totalorder %s209_s8, %s209_s8 }
  0x2b   : > { %p4446_p12 = scmp.ne.s32.totalorder %s209_s8, %s4445_s10  ;;  %p4454_p7 = scmp.lt.s32.totalorder %s4445_s10, %s4445_s10 }
  0x2d   : > { %p4448_p3 = pnand %p4446_p12, %p4434_p6  ;;  %p4455_p13 = por %p4454_p7, %p4453_p8 }
  0x2f   : > { %p4449_p9 = pneg %p4448_p3 }
  0x31   : > { %p4456_p4 = pnand %p4455_p13, %p4449_p9 }
  0x33   : > { %4459 = shalt.err (!%p4456_p4)
}
  0x34   : > { %4298 = dma.hbm_to_vmem [thread:$0]  (!%p4793_p2), %s6110_s1, 64, %s209_s8, [#allocation7]  }
  0x35   : > { %s4460_s17 = scalar_lea.hbm %s6092_s2, 128 }
  0x36   : > { %p4461_p3 = scmp.ne.s32.totalorder %s6092_s2, %s4460_s17  ;;  %p4467_p9 = scmp.lt.u32.totalorder %s4460_s17, %s6092_s2 }
  0x38   : > { %p4463_p7 = pnand %p4461_p3, %p4434_p6 }
  0x3a   : > { %p4464_p8 = pneg %p4463_p7 }
  0x3c   : > { %p4469_p12 = pnand %p4467_p9, %p4464_p8 }
  0x3e   : > { %4472 = shalt.err (!%p4469_p12)
}
  0x3f   : > { %s4473_s8 = scalar_lea.vmem %s4797_s11, 128  ;;  %p4481_p10 = scmp.lt.s32.totalorder %s4797_s11, %s4797_s11 }
  0x40   : > { %p4474_p13 = scmp.ne.s32.totalorder %s4797_s11, %s4473_s8  ;;  %p4482_p11 = scmp.lt.s32.totalorder %s4473_s8, %s4473_s8 }
  0x42   : > { %p4476_p4 = pnand %p4474_p13, %p4434_p6  ;;  %p4483_p1 = por %p4482_p11, %p4481_p10 }
  0x44   : > { %p4477_p5 = pneg %p4476_p4 }
  0x46   : > { %p4484_p0 = pnand %p4483_p1, %p4477_p5 }
  0x48   : > { %4487 = shalt.err (!%p4484_p0)
}
  0x49   : > { %4301 = dma.hbm_to_vmem [thread:$0]  (!%p4793_p2), %s6092_s2, 128, %s4797_s11, [#allocation7]  }
  0x4a   : > { %s38_s14 = sadd.s32 1, %s4660_s22  ;;  %s230_s15 = sand.u32 1, %s4652_s20  }
  0x4b   : > { %p40_p6 = scmp.ge.s32.totalorder %s38_s14, 2  ;;  %s4276_s16 = smul.u32 216, %s230_s15 }
  0x4c   : > { %s4277_s12 = smul.u32 3456, %s4660_s22  ;;  %s4865_s13 = scalar_lea.sflag [#allocation4], %s230_s15 }
  0x4d   : > { %s6130_s14 = smov (%p40_p6, %s38_s14), 0  ;;  %s234_s27 = scalar_lea.vmem [#allocation3], %s4276_s16 }
  0x4e   : > { %s42_s17 = ssub.s32 %s4660_s22, %s6130_s14  ;;  %s241_s7 = sshll.u32 %s234_s27, 4  ;;  %s4858_s7 = int_to_ptr.vmem [resolvable:$true] %s241_s7 }
  0x4f   : > { %p43_p3 = scmp.eq.s32.totalorder %s42_s17, 0  ;;  %s4856_s25 = scalar_lea.hbm %s6090_s0, %s4277_s12 }
  0x50   : > { %s4488_s1 = scalar_lea.hbm %s4856_s25, 3456  ;;  %p6111_p7 = scmp.ne.s32.totalorder %s6108_s9, 0 }
  0x51   : > { %s4863_s11 = scalar_select %p43_p3, %s4652_s20, %s45_s26  }
  0x52   : > { %p4489_p2 = scmp.ne.s32.totalorder %s4856_s25, %s4488_s1  ;;  %p4490_p8 = pneg %p6111_p7 }
  0x53   : > { %s4493_s17 = scalar_lea.hbm %s6090_s0, 6912  ;;  %p4494_p13 = scmp.lt.u32.totalorder %s4856_s25, %s6090_s0 }
  0x54   : > { %p4491_p9 = pnand %p4490_p8, %p4489_p2  ;;  %p4495_p4 = scmp.lt.u32.totalorder %s4493_s17, %s4488_s1 }
  0x55   : > { %p4497_p10 = scmp.lt.u32.totalorder %s4488_s1, %s4856_s25 }
  0x56   : > { %p4492_p12 = pneg %p4491_p9  ;;  %p4496_p5 = por %p4495_p4, %p4494_p13 }
  0x58   : > { %p4498_p11 = por %p4497_p10, %p4496_p5 }
  0x5a   : > { %p4499_p1 = pnand %p4498_p11, %p4492_p12 }
  0x5c   : > { %4502 = shalt.err (!%p4499_p1)
}
  0x5d   : > { %s4503_s26 = scalar_lea.vmem %s4858_s7, 3456  ;;  %s4668_s15 = smov [#allocation3]  }
  0x5e   : > { %p4504_p0 = scmp.ne.s32.totalorder %s4858_s7, %s4503_s26  ;;  %s4508_s8 = sshll.u32 %s4668_s15, 4  ;;  %s4509_s8 = int_to_ptr.vmem [resolvable:$false] %s4508_s8 }
  0x5f   : > { %s4510_s16 = scalar_lea.vmem %s4509_s8, 6912  ;;  %p4511_p2 = scmp.lt.s32.totalorder %s4858_s7, %s4509_s8 }
  0x60   : > { %p4506_p6 = pnand %p4504_p0, %p4490_p8  ;;  %p4512_p9 = scmp.lt.s32.totalorder %s4510_s16, %s4503_s26 }
  0x62   : > { %p4507_p3 = pneg %p4506_p6  ;;  %p4513_p13 = por %p4512_p9, %p4511_p2 }
  0x64   : > { %p4514_p4 = pnand %p4513_p13, %p4507_p3 }
  0x66   : > { %4517 = shalt.err (!%p4514_p4)
}
  0x67   : > { %s4669_s1 = smov 64   ;;  %s4670_s12 = smov 4  }
  0x68   : > { %4305 = dma.hbm_to_vmem [thread:$0]  (!%p6111_p7), %s4856_s25, 3456, %s4858_s7, %s4865_s13, %s4669_s1, %s4669_s1, %s4670_s12  }
  0x69   : > { %p6112_p8 = scmp.ne.s32.totalorder %s6107_s6, 0 }
  0x6a   : > { %s4896_s17 = sand.u32 (!%p6112_p8), 1, %s4648_s19   ;;  %p6113_p12 = scmp.ne.s32.totalorder (!%p6112_p8), %s6104_s28, 0 }
  0x6b   : > { %253 = sbr.rel (%p6112_p8) target bundleno = 946 (0x3b2), region = 32  ;;  %s256_s10 = scalar_lea.sflag (!%p6112_p8), [#allocation4], %s4896_s17 }
  0x6c   : > { %s4278_s27 = smul.u32 (!%p6112_p8), 216, %s4896_s17 }
  0x6e   : > { %s4900_s26 = scalar_lea.vmem (!%p6112_p8), [#allocation3], %s4278_s27 }
  0x72   : > { %4627 = dma.done.wait (%p6113_p12), %s256_s10, 3456  }
  0x73   : > { %4629 = vsyncadd (%p6113_p12), %s256_s10, 4294963840  ;;  %p6114_p7 = scmp.eq.s32.totalorder %s4744_s24, 0 }
  0x75   : > { %4631 = dma.done.wait (%p6114_p7), [#allocation7], 192   ;;  %p6115_p5 = pmov %p6114_p7 }
  0x76   : > { %vm1099_vm0 = vcmask 1042432   ;;  %vm1100_vm1 = vcmask 1046532   ;;  %v4384_v1 = vld [vmem:[%s4900_s26 + $0x6c] sm:$0xff]   ;;  %s4671_s28 = smov 12   ;;  %v3969_v5 = vld [vmem:[%s4900_s26 + $0x14] sm:$0x1] }
  0x77   : > { %4633 = vsyncadd (%p6115_p5), [#allocation7], 4294967104  ;;  %v4385_v2 = vld [vmem:[%s4900_s26 + $0xc] sm:$0xff]   ;;  %1459 = vrot.lane.b32.xlu1 %v4384_v1, %s4671_s28  ;;  %vm503_vm3 = vsmask.f32 3328  ;;  %v2154_v8 = vrot.slane %v3969_v5, 5 }
  0x78   : > { %vm4910_vm2 = vmor %vm1099_vm0, %vm1100_vm1  ;;  %v3967_v3 = vld [vmem:[%s4900_s26 + $0xc] sm:$0xe]  ;;  %v3968_v4 = vld [vmem:[%s4900_s26 + $0x10] sm:$0xf]  ;;  %vm504_vm4 = vsmask.f32 7440  ;;  %1443 = vrot.lane.b32.xlu0 %v4385_v2, %s4671_s28 }
  0x79   : > { %v4015_v6 = vrot.slane %v3967_v3, 9  ;;  %v2151_v7 = vrot.slane %v3968_v4, 5  ;;  %v1003_v9 = vld [vmem:[%s4900_s26] sm:$0xe]  ;;  %v1004_v10 = vld [vmem:[%s4900_s26 + $0x4] sm:$0xf]  ;;  %vm4951_vm5 = vmor %vm503_vm3, %vm504_vm4 }
  0x7a   : > { %v1005_v11 = vld [vmem:[%s4900_s26 + $0x8] sm:$0x1]  ;;  %v3823_v12 = vrot.slane %v1003_v9, 9  ;;  %v1104_v15 = vrot.slane %v1004_v10, 5  ;;  %v1027_v17 = vld [vmem:[%s4900_s26 + $0x60] sm:$0xe] }
  0x7b   : > { %v2152_v13 = vsel %vm4910_vm2, %v4015_v6, %v2151_v7  ;;  %v2153_v14 = vrot.slane %v2151_v7, 4  ;;  %v1107_v16 = vrot.slane %v1005_v11, 5  ;;  %v1028_v18 = vld [vmem:[%s4900_s26 + $0x64] sm:$0xf]  ;;  %v1029_v19 = vld [vmem:[%s4900_s26 + $0x68] sm:$0x1] }
  0x7c   : > { %v3831_v20 = vrot.slane %v1027_v17, 9  ;;  %v1105_v22 = vsel %vm4910_vm2, %v3823_v12, %v1104_v15  ;;  %v1106_v23 = vrot.slane %v1104_v15, 4  ;;  %v1160_v24 = vrot.slane %v1028_v18, 5  ;;  %v455_v25 = vld [vmem:[%s4900_s26] sm:$0xf]  ;;  %s4672_s6 = smov 20  }
  0x7d   : > { %v2155_v21 = vsel %vm4910_vm2, %v2153_v14, %v2154_v8  ;;  %v456_v26 = vld [vmem:[%s4900_s26 + $0x4] sm:$0xf]  ;;  %v1163_v28 = vrot.slane %v1029_v19, 5  ;;  %v457_v29 = vld [vmem:[%s4900_s26 + $0x8] sm:$0x1]  ;;  %v507_v30 = vshrl.u32 %v455_v25, 16 }
  0x7e   : > { %v4031_v27 = vcombine.low %v2152_v13, %v2155_v21  ;;  %v510_v31 = vshll.u32 %v455_v25, 16  ;;  %v1108_v32 = vsel %vm4910_vm2, %v1106_v23, %v1107_v16  ;;  %v1161_v33 = vsel %vm4910_vm2, %v3831_v20, %v1160_v24  ;;  %v3991_v36 = vld [vmem:[%s4900_s26 + $0x6c] sm:$0xe]  ;;  %v3992_v37 = vld [vmem:[%s4900_s26 + $0x70] sm:$0xf]  ;;  %s4673_s9 = smov 8  }
  0x7f   : > { %v1162_v34 = vrot.slane %v1160_v24, 4  ;;  %v516_v35 = vshll.u32 %v456_v26, 16  ;;  %v3839_v38 = vcombine.low %v1105_v22, %v1108_v32  ;;  %v509_v39 = vrot.slane %v507_v30, 4  ;;  %v3993_v42 = vld [vmem:[%s4900_s26 + $0x74] sm:$0x1]  ;;  %s4674_s7 = smov 4  }
  0x80   : > { %2309 = vrot.lane.b32.xlu0 %v4031_v27, %s4672_s6  ;;  %v512_v40 = vrot.slane %v510_v31, 5  ;;  %v520_v41 = vshrl.u32 %v456_v26, 16  ;;  %v526_v45 = vshll.u32 %v457_v29, 16  ;;  %v4023_v46 = vrot.slane %v3991_v36, 9  ;;  %v479_v47 = vld [vmem:[%s4900_s26 + $0x60] sm:$0xf] }
  0x81   : > { %v1164_v43 = vsel %vm4910_vm2, %v1162_v34, %v1163_v28  ;;  %v518_v44 = vrot.slane %v516_v35, 5  ;;  %1262 = vrot.lane.b32.xlu1 %v3839_v38, %s4673_s9  ;;  %v2207_v51 = vrot.slane %v3992_v37, 5  ;;  %v480_v52 = vld [vmem:[%s4900_s26 + $0x64] sm:$0xf]  ;;  %v2210_v55 = vrot.slane %v3993_v42, 5  ;;  %s4675_s25 = smov 16  }
  0x82   : > { %v3847_v48 = vcombine.low %v1161_v33, %v1164_v43  ;;  %v513_v49 = vor.u32 %v512_v40, %v509_v39  ;;  %v522_v50 = vrot.slane %v520_v41, 4  ;;  %v528_v54 = vrot.slane %v526_v45, 5  ;;  %v481_v56 = vld [vmem:[%s4900_s26 + $0x68] sm:$0x1]  ;;  %v3927_v63 = vld [vmem:[%s4900_s26 + $0x6c] sm:$0xf] }
  0x83   : > { %v699_v57 = vshrl.u32 %v479_v47, 16  ;;  %v702_v58 = vshll.u32 %v479_v47, 16  ;;  %v2208_v61 = vsel %vm4910_vm2, %v4023_v46, %v2207_v51  ;;  %v2209_v62 = vrot.slane %v2207_v51, 4  ;;  %v3928_v5 = vld [vmem:[%s4900_s26 + $0x70] sm:$0xf]  ;;  %s4676_s13 = smov 24  }
  0x84   : > { %v514_v59 = vrot.slane %v513_v49, 4  ;;  %v523_v60 = vor.u32 %v522_v50, %v518_v44  ;;  %v708_v3 = vshll.u32 %v480_v52, 16  ;;  %v712_v4 = vshrl.u32 %v480_v52, 16  ;;  %v3929_v10 = vld [vmem:[%s4900_s26 + $0x74] sm:$0x1]  ;;  %s4677_s15 = smov 28  }
  0x85   : > { %v701_v1 = vrot.slane %v699_v57, 4  ;;  %v704_v2 = vrot.slane %v702_v58, 5  ;;  %1278 = vrot.lane.b32.xlu1 %v3847_v48, %s4673_s9  ;;  %v2211_v8 = vsel %vm4910_vm2, %v2209_v62, %v2210_v55  ;;  %v718_v9 = vshll.u32 %v481_v56, 16  ;;  %v3903_v11 = vld [vmem:[%s4900_s26 + $0xc] sm:$0xf]  ;;  %s4678_s8 = smov 32  }
  0x86   : > { %v519_v6 = vsel %vm4951_vm5, %v514_v59, %v518_v44  ;;  %v524_v7 = vrot.slane %v523_v60, 4  ;;  %v4039_v12 = vcombine.low %v2208_v61, %v2211_v8  ;;  %v710_v14 = vrot.slane %v708_v3, 5  ;;  %v3904_v28 = vld [vmem:[%s4900_s26 + $0x10] sm:$0xf]  ;;  %v3905_v32 = vld [vmem:[%s4900_s26 + $0x14] sm:$0x1] }
  0x87   : > { %v705_v13 = vor.u32 %v704_v2, %v701_v1  ;;  %v714_v15 = vrot.slane %v712_v4, 4  ;;  %v720_v17 = vrot.slane %v718_v9, 5  ;;  %v1749_v18 = vshrl.u32 %v3927_v63, 16  ;;  %v4119_v38 = vld [vmem:[%s4900_s26 + $0x78] sm:$0xf]  ;;  %s3788_s16 = sshll.u32 %s4896_s17, 4 }
  0x88   : > { %v529_v16 = vsel %vm4951_vm5, %v524_v7, %v528_v54  ;;  %v1752_v19 = vshll.u32 %v3927_v63, 16  ;;  %v1758_v23 = vshll.u32 %v3928_v5, 16  ;;  %v1762_v26 = vshrl.u32 %v3928_v5, 16  ;;  %v4120_v47 = vld [vmem:[%s4900_s26 + $0x7c] sm:$0xf]  ;;  %s289_s1 = scalar_lea.vmem [#allocation9], %s3788_s16 }
  0x89   : > { %v3807_v20 = vcombine.low %v519_v6, %v529_v16  ;;  %v706_v21 = vrot.slane %v705_v13, 4  ;;  %v715_v22 = vor.u32 %v714_v15, %v710_v14  ;;  %2325 = vrot.lane.b32.xlu1 %v4039_v12, %s4672_s6  ;;  %v1751_v24 = vrot.slane %v1749_v18, 4  ;;  %v4121_v56 = vld [vmem:[%s4900_s26 + $0x80] sm:$0x1]  ;;  %v4095_v62 = vld [vmem:[%s4900_s26 + $0x18] sm:$0xf] }
  0x8a   : > { %v1754_v25 = vrot.slane %v1752_v19, 5  ;;  %v1768_v27 = vshll.u32 %v3929_v10, 16  ;;  %v1760_v31 = vrot.slane %v1758_v23, 5  ;;  %v1557_v33 = vshrl.u32 %v3903_v11, 16  ;;  %v4096_v4 = vld [vmem:[%s4900_s26 + $0x1c] sm:$0xf] }
  0x8b   : > { %938 = vrot.lane.b32.xlu0 %v3807_v20, %s4674_s7  ;;  %v711_v29 = vsel %vm4951_vm5, %v706_v21, %v710_v14  ;;  %v716_v30 = vrot.slane %v715_v22, 4  ;;  %v1764_v35 = vrot.slane %v1762_v26, 4  ;;  %v1560_v37 = vshll.u32 %v3903_v11, 16  ;;  %v4097_v12 = vld [vmem:[%s4900_s26 + $0x20] sm:$0x1]  ;;  %v4386_v16 = vld [vmem:[%s4900_s26 + $0x78] sm:$0xff]  }
  0x8c   : > { %v1755_v34 = vor.u32 %v1754_v25, %v1751_v24  ;;  %v1770_v36 = vrot.slane %v1768_v27, 5  ;;  %v1559_v40 = vrot.slane %v1557_v33, 4  ;;  %v1566_v41 = vshll.u32 %v3904_v28, 16  ;;  %v4183_v14 = vld [vmem:[%s4900_s26 + $0x78] sm:$0xe]  ;;  %s4249_s12 = sshll.u32 %s4656_s21, 8 }
  0x8d   : > { %v721_v39 = vsel %vm4951_vm5, %v716_v30, %v720_v17  ;;  %v1570_v42 = vshrl.u32 %v3904_v28, 16  ;;  %v1765_v45 = vor.u32 %v1764_v35, %v1760_v31  ;;  %v1562_v46 = vrot.slane %v1560_v37, 5  ;;  %v4184_v20 = vld [vmem:[%s4900_s26 + $0x7c] sm:$0xf]  ;;  %v4185_v25 = vld [vmem:[%s4900_s26 + $0x80] sm:$0x1] }
  0x8e   : > { %v3815_v43 = vcombine.low %v711_v29, %v721_v39  ;;  %v1756_v44 = vrot.slane %v1755_v34, 4  ;;  %v1568_v48 = vrot.slane %v1566_v41, 5  ;;  %v1576_v50 = vshll.u32 %v3905_v32, 16  ;;  %v4159_v26 = vld [vmem:[%s4900_s26 + $0x18] sm:$0xe]  ;;  %s3577_s27 = sshll.u32 %s289_s1, 4  ;;  %s3578_s27 = int_to_ptr.vmem [resolvable:$true] %s3577_s27 }
  0x8f   : > { %v1572_v49 = vrot.slane %v1570_v42, 4  ;;  %v2796_v51 = vshrl.u32 %v4119_v38, 16  ;;  %v1766_v54 = vrot.slane %v1765_v45, 4  ;;  %v1563_v55 = vor.u32 %v1562_v46, %v1559_v40  ;;  %v4387_v32 = vld [vmem:[%s4900_s26 + $0x18] sm:$0xff]   ;;  %v4161_v37 = vld [vmem:[%s4900_s26 + $0x20] sm:$0x1] }
  0x90   : > { %954 = vrot.lane.b32.xlu0 %v3815_v43, %s4674_s7  ;;  %v1761_v52 = vsel %vm4951_vm5, %v1756_v44, %v1760_v31  ;;  %v2799_v57 = vshll.u32 %v4119_v38, 16  ;;  %v1578_v59 = vrot.slane %v1576_v50, 5  ;;  %v2805_v61 = vshll.u32 %v4120_v47, 16  ;;  %v4160_v31 = vld [vmem:[%s4900_s26 + $0x1c] sm:$0xf]  ;;  %p6120_p11 = scmp.ne.s32.totalorder %s6105_s29, 0 }
  0x91   : > { %v1573_v58 = vor.u32 %v1572_v49, %v1568_v48  ;;  %v2798_v60 = vrot.slane %v2796_v51, 4  ;;  %v1771_v63 = vsel %vm4951_vm5, %v1766_v54, %v1770_v36  ;;  %v1564_v1 = vrot.slane %v1563_v55, 4  ;;  %v482_v42 = vld [vmem:[%s4900_s26 + $0x6c] sm:$0xf]  ;;  %v5902_v53 = vld [vmem:[#allocation6] sm:$0xf] }
  0x92   : > { %v2801_v2 = vrot.slane %v2799_v57, 5  ;;  %v2809_v3 = vshrl.u32 %v4120_v47, 16  ;;  %v3959_v5 = vcombine.low %v1761_v52, %v1771_v63  ;;  %v2807_v7 = vrot.slane %v2805_v61, 5  ;;  %v483_v47 = vld [vmem:[%s4900_s26 + $0x70] sm:$0xf] }
  0x93   : > { %v1574_v6 = vrot.slane %v1573_v58, 4  ;;  %v2815_v8 = vshll.u32 %v4121_v56, 16  ;;  %v1569_v9 = vsel %vm4951_vm5, %v1564_v1, %v1568_v48  ;;  %v2604_v13 = vshrl.u32 %v4095_v62, 16  ;;  %v484_v48 = vld [vmem:[%s4900_s26 + $0x74] sm:$0x1] }
  0x94   : > { %v2802_v10 = vor.u32 %v2801_v2, %v2798_v60  ;;  %v2811_v11 = vrot.slane %v2809_v3, 4  ;;  %2004 = vrot.lane.b32.xlu1 %v3959_v5, %s4675_s25  ;;  %v2607_v18 = vshll.u32 %v4095_v62, 16  ;;  %v2613_v19 = vshll.u32 %v4096_v4, 16  ;;  %v458_v54 = vld [vmem:[%s4900_s26 + $0xc] sm:$0xf] }
  0x95   : > { %v1579_v15 = vsel %vm4951_vm5, %v1574_v6, %v1578_v59  ;;  %v2817_v17 = vrot.slane %v2815_v8, 5  ;;  %v2606_v24 = vrot.slane %v2604_v13, 4  ;;  %v2617_v29 = vshrl.u32 %v4096_v4, 16  ;;  %v459_v4 = vld [vmem:[%s4900_s26 + $0x10] sm:$0xf] }
  0x96   : > { %v3951_v21 = vcombine.low %v1569_v9, %v1579_v15  ;;  %v2803_v22 = vrot.slane %v2802_v10, 4  ;;  %v2812_v23 = vor.u32 %v2811_v11, %v2807_v7  ;;  %v2609_v27 = vrot.slane %v2607_v18, 5  ;;  %v460_v8 = vld [vmem:[%s4900_s26 + $0x14] sm:$0x1]  ;;  %v1031_v15 = vld [vmem:[%s4900_s26 + $0x70] sm:$0xf] }
  0x97   : > { %v2615_v28 = vrot.slane %v2613_v19, 5  ;;  %v2623_v30 = vshll.u32 %v4097_v12, 16  ;;  %v4215_v35 = vrot.slane %v4183_v14, 9  ;;  %v3254_v36 = vrot.slane %v4184_v20, 5  ;;  %v1030_v14 = vld [vmem:[%s4900_s26 + $0x6c] sm:$0xe] }
  0x98   : > { %1988 = vrot.lane.b32.xlu0 %v3951_v21, %s4675_s25  ;;  %v2808_v33 = vsel %vm4951_vm5, %v2803_v22, %v2807_v7  ;;  %v2813_v34 = vrot.slane %v2812_v23, 4  ;;  %2506 = vrot.lane.b32.xlu1 %v4386_v16, %s4676_s13  ;;  %v2610_v38 = vor.u32 %v2609_v27, %v2606_v24  ;;  %v2619_v39 = vrot.slane %v2617_v29, 4  ;;  %v1032_v20 = vld [vmem:[%s4900_s26 + $0x74] sm:$0x1]  ;;  %v1006_v21 = vld [vmem:[%s4900_s26 + $0xc] sm:$0xe] }
  0x99   : > { %v2625_v40 = vrot.slane %v2623_v30, 5  ;;  %v3257_v41 = vrot.slane %v4185_v25, 5  ;;  %v3255_v44 = vsel %vm4910_vm2, %v4215_v35, %v3254_v36  ;;  %v3256_v45 = vrot.slane %v3254_v36, 4  ;;  %v3930_v36 = vld [vmem:[%s4900_s26 + $0x78] sm:$0xf] }
  0x9a   : > { %v2818_v43 = vsel %vm4951_vm5, %v2813_v34, %v2817_v17  ;;  %v4207_v46 = vrot.slane %v4159_v26, 9  ;;  %v2611_v50 = vrot.slane %v2610_v38, 4  ;;  %v2620_v51 = vor.u32 %v2619_v39, %v2615_v28  ;;  %v1007_v26 = vld [vmem:[%s4900_s26 + $0x10] sm:$0xf] }
  0x9b   : > { %v4151_v49 = vcombine.low %v2808_v33, %v2818_v43  ;;  %v3198_v52 = vrot.slane %v4160_v31, 5  ;;  %v3258_v55 = vsel %vm4910_vm2, %v3256_v45, %v3257_v41  ;;  %v3201_v56 = vrot.slane %v4161_v37, 5  ;;  %v1008_v31 = vld [vmem:[%s4900_s26 + $0x14] sm:$0x1]  ;;  %v3931_v45 = vld [vmem:[%s4900_s26 + $0x7c] sm:$0xf] }
  0x9c   : > { %2490 = vrot.lane.b32.xlu0 %v4387_v32, %s4676_s13  ;;  %v723_v57 = vshrl.u32 %v482_v42, 16  ;;  %v726_v58 = vshll.u32 %v482_v42, 16  ;;  %v2616_v59 = vsel %vm4951_vm5, %v2611_v50, %v2615_v28  ;;  %v2621_v60 = vrot.slane %v2620_v51, 4  ;;  %v3906_v51 = vld [vmem:[%s4900_s26 + $0x18] sm:$0xf] }
  0x9d   : > { %3051 = vrot.lane.b32.xlu1 %v4151_v49, %s4677_s15  ;;  %v4231_v61 = vcombine.low %v3255_v44, %v3258_v55  ;;  %v3199_v62 = vsel %vm4910_vm2, %v4207_v46, %v3198_v52  ;;  %v3200_v63 = vrot.slane %v3198_v52, 4  ;;  %v732_v3 = vshll.u32 %v483_v47, 16  ;;  %v3932_v46 = vld [vmem:[%s4900_s26 + $0x80] sm:$0x1] }
  0x9e   : > { %v725_v1 = vrot.slane %v723_v57, 4  ;;  %v728_v2 = vrot.slane %v726_v58, 5  ;;  %v2626_v5 = vsel %vm4951_vm5, %v2621_v60, %v2625_v40  ;;  %v736_v6 = vshrl.u32 %v483_v47, 16 }
  0x9f   : > { %v742_v7 = vshll.u32 %v484_v48, 16  ;;  %v531_v9 = vshrl.u32 %v458_v54, 16  ;;  %v4143_v10 = vcombine.low %v2616_v59, %v2626_v5  ;;  %v3202_v11 = vsel %vm4910_vm2, %v3200_v63, %v3201_v56 }
  0xa0   : > { %v729_v12 = vor.u32 %v728_v2, %v725_v1  ;;  %v734_v13 = vrot.slane %v732_v3, 5  ;;  %v4223_v16 = vcombine.low %v3199_v62, %v3202_v11  ;;  %v738_v17 = vrot.slane %v736_v6, 4  ;;  %v3907_v2 = vld [vmem:[%s4900_s26 + $0x1c] sm:$0xf] }
  0xa1   : > { %3372 = vrot.lane.b32.xlu1 %v4231_v61, %s4678_s8  ;;  %v744_v18 = vrot.slane %v742_v7, 5  ;;  %v533_v19 = vrot.slane %v531_v9, 4  ;;  %3035 = vrot.lane.b32.xlu0 %v4143_v10, %s4677_s15  ;;  %v534_v23 = vshll.u32 %v458_v54, 16  ;;  %v540_v24 = vshll.u32 %v459_v4, 16  ;;  %v3908_v7 = vld [vmem:[%s4900_s26 + $0x20] sm:$0x1] }
  0xa2   : > { %v730_v22 = vrot.slane %v729_v12, 4  ;;  %v544_v25 = vshrl.u32 %v459_v4, 16  ;;  %v739_v27 = vor.u32 %v738_v17, %v734_v13  ;;  %v550_v28 = vshll.u32 %v460_v8, 16  ;;  %v3994_v8 = vld [vmem:[%s4900_s26 + $0x78] sm:$0xe] }
  0xa3   : > { %v3832_v29 = vrot.slane %v1030_v14, 9  ;;  %v1167_v30 = vrot.slane %v1031_v15, 5  ;;  %v536_v33 = vrot.slane %v534_v23, 5  ;;  %v542_v34 = vrot.slane %v540_v24, 5  ;;  %v3970_v24 = vld [vmem:[%s4900_s26 + $0x18] sm:$0xe] }
  0xa4   : > { %v735_v32 = vsel %vm4951_vm5, %v730_v22, %v734_v13  ;;  %v546_v35 = vrot.slane %v544_v25, 4  ;;  %v740_v37 = vrot.slane %v739_v27, 4  ;;  %v552_v38 = vrot.slane %v550_v28, 5  ;;  %v3995_v13 = vld [vmem:[%s4900_s26 + $0x7c] sm:$0xf] }
  0xa5   : > { %v1168_v39 = vsel %vm4910_vm2, %v3832_v29, %v1167_v30  ;;  %v1169_v40 = vrot.slane %v1167_v30, 4  ;;  %3356 = vrot.lane.b32.xlu0 %v4223_v16, %s4678_s8  ;;  %v537_v41 = vor.u32 %v536_v33, %v533_v19  ;;  %v1170_v43 = vrot.slane %v1032_v20, 5  ;;  %v4388_v19 = vld [vmem:[%s4900_s26 + $0x78] sm:$0xff]  }
  0xa6   : > { %v547_v42 = vor.u32 %v546_v35, %v542_v34  ;;  %v3824_v44 = vrot.slane %v1006_v21, 9  ;;  %v745_v47 = vsel %vm4951_vm5, %v740_v37, %v744_v18  ;;  %v1111_v48 = vrot.slane %v1007_v26, 5  ;;  %v3996_v18 = vld [vmem:[%s4900_s26 + $0x80] sm:$0x1]  ;;  %v3971_v29 = vld [vmem:[%s4900_s26 + $0x1c] sm:$0xf] }
  0xa7   : > { %v1114_v49 = vrot.slane %v1008_v31, 5  ;;  %v1773_v50 = vshrl.u32 %v3930_v36, 16  ;;  %v3816_v52 = vcombine.low %v735_v32, %v745_v47  ;;  %v538_v54 = vrot.slane %v537_v41, 4  ;;  %v4389_v35 = vld [vmem:[%s4900_s26 + $0x18] sm:$0xff]  }
  0xa8   : > { %v548_v55 = vrot.slane %v547_v42, 4  ;;  %v1171_v56 = vsel %vm4910_vm2, %v1169_v40, %v1170_v43  ;;  %v1112_v58 = vsel %vm4910_vm2, %v3824_v44, %v1111_v48  ;;  %v1113_v59 = vrot.slane %v1111_v48, 4  ;;  %v4122_v40 = vld [vmem:[%s4900_s26 + $0x84] sm:$0xf] }
  0xa9   : > { %v3848_v57 = vcombine.low %v1168_v39, %v1171_v56  ;;  %v1775_v60 = vrot.slane %v1773_v50, 4  ;;  %956 = vrot.lane.b32.xlu1 %v3816_v52, %s4674_s7  ;;  %v543_v61 = vsel %vm4951_vm5, %v538_v54, %v542_v34  ;;  %v1776_v63 = vshll.u32 %v3930_v36, 16  ;;  %v3972_v34 = vld [vmem:[%s4900_s26 + $0x20] sm:$0x1]  ;;  %v4124_v54 = vld [vmem:[%s4900_s26 + $0x8c] sm:$0x1] }
  0xaa   : > { %v553_v62 = vsel %vm4951_vm5, %v548_v55, %v552_v38  ;;  %v1782_v1 = vshll.u32 %v3931_v45, 16  ;;  %v1115_v4 = vsel %vm4910_vm2, %v1113_v59, %v1114_v49  ;;  %v1786_v5 = vshrl.u32 %v3931_v45, 16  ;;  %v4123_v49 = vld [vmem:[%s4900_s26 + $0x88] sm:$0xf] }
  0xab   : > { %v3808_v3 = vcombine.low %v543_v61, %v553_v62  ;;  %v1792_v6 = vshll.u32 %v3932_v46, 16  ;;  %v3840_v9 = vcombine.low %v1112_v58, %v1115_v4  ;;  %v1778_v10 = vrot.slane %v1776_v63, 5  ;;  %v4099_v61 = vld [vmem:[%s4900_s26 + $0x28] sm:$0xf] }
  0xac   : > { %v1784_v11 = vrot.slane %v1782_v1, 5  ;;  %v1581_v12 = vshrl.u32 %v3906_v51, 16  ;;  %v1788_v14 = vrot.slane %v1786_v5, 4  ;;  %v1584_v16 = vshll.u32 %v3906_v51, 16 }
  0xad   : > { %940 = vrot.lane.b32.xlu0 %v3808_v3, %s4674_s7  ;;  %v1794_v15 = vrot.slane %v1792_v6, 5  ;;  %v1590_v17 = vshll.u32 %v3907_v2, 16  ;;  %1280 = vrot.lane.b32.xlu1 %v3848_v57, %s4673_s9  ;;  %v1779_v20 = vor.u32 %v1778_v10, %v1775_v60  ;;  %v1594_v22 = vshrl.u32 %v3907_v2, 16  ;;  %v4098_v60 = vld [vmem:[%s4900_s26 + $0x24] sm:$0xf] }
  0xae   : > { %v1583_v21 = vrot.slane %v1581_v12, 4  ;;  %v1600_v23 = vshll.u32 %v3908_v7, 16  ;;  %v1789_v25 = vor.u32 %v1788_v14, %v1784_v11  ;;  %v1586_v26 = vrot.slane %v1584_v16, 5  ;;  %v4100_v3 = vld [vmem:[%s4900_s26 + $0x2c] sm:$0x1] }
  0xaf   : > { %v1592_v27 = vrot.slane %v1590_v17, 5  ;;  %v4024_v28 = vrot.slane %v3994_v8, 9  ;;  %v1780_v30 = vrot.slane %v1779_v20, 4  ;;  %v1596_v31 = vrot.slane %v1594_v22, 4  ;;  %v4186_v8 = vld [vmem:[%s4900_s26 + $0x84] sm:$0xe] }
  0xb0   : > { %v1602_v32 = vrot.slane %v1600_v23, 5  ;;  %v2214_v33 = vrot.slane %v3995_v13, 5  ;;  %v1790_v36 = vrot.slane %v1789_v25, 4  ;;  %v1587_v37 = vor.u32 %v1586_v26, %v1583_v21  ;;  %v4188_v14 = vld [vmem:[%s4900_s26 + $0x8c] sm:$0x1]  ;;  %v4390_v20 = vld [vmem:[%s4900_s26 + $0x84] sm:$0xff]  }
  0xb1   : > { %1264 = vrot.lane.b32.xlu0 %v3840_v9, %s4673_s9  ;;  %v2217_v38 = vrot.slane %v3996_v18, 5  ;;  %v4016_v39 = vrot.slane %v3970_v24, 9  ;;  %1461 = vrot.lane.b32.xlu1 %v4388_v19, %s4671_s28  ;;  %v1785_v41 = vsel %vm4951_vm5, %v1780_v30, %v1784_v11  ;;  %v1597_v42 = vor.u32 %v1596_v31, %v1592_v27  ;;  %v4187_v9 = vld [vmem:[%s4900_s26 + $0x88] sm:$0xf]  ;;  %v4162_v19 = vld [vmem:[%s4900_s26 + $0x24] sm:$0xe] }
  0xb2   : > { %v2215_v43 = vsel %vm4910_vm2, %v4024_v28, %v2214_v33  ;;  %v2216_v44 = vrot.slane %v2214_v33, 4  ;;  %v1795_v45 = vsel %vm4951_vm5, %v1790_v36, %v1794_v15  ;;  %v1588_v46 = vrot.slane %v1587_v37, 4  ;;  %v4163_v25 = vld [vmem:[%s4900_s26 + $0x28] sm:$0xf]  ;;  %v4164_v26 = vld [vmem:[%s4900_s26 + $0x2c] sm:$0x1] }
  0xb3   : > { %v2158_v47 = vrot.slane %v3971_v29, 5  ;;  %v2161_v48 = vrot.slane %v3972_v34, 5  ;;  %v3960_v50 = vcombine.low %v1785_v41, %v1795_v45  ;;  %v1598_v51 = vrot.slane %v1597_v42, 4  ;;  %v485_v31 = vld [vmem:[%s4900_s26 + $0x78] sm:$0xf]  ;;  %v4391_v36 = vld [vmem:[%s4900_s26 + $0x24] sm:$0xff]  }
  0xb4   : > { %v2218_v52 = vsel %vm4910_vm2, %v2216_v44, %v2217_v38  ;;  %v2820_v55 = vshrl.u32 %v4122_v40, 16  ;;  %v1593_v56 = vsel %vm4951_vm5, %v1588_v46, %v1592_v27  ;;  %v2823_v1 = vshll.u32 %v4122_v40, 16 }
  0xb5   : > { %1445 = vrot.lane.b32.xlu0 %v4389_v35, %s4671_s28  ;;  %v4040_v57 = vcombine.low %v2215_v43, %v2218_v52  ;;  %v2159_v58 = vsel %vm4910_vm2, %v4016_v39, %v2158_v47  ;;  %v2160_v59 = vrot.slane %v2158_v47, 4  ;;  %2006 = vrot.lane.b32.xlu1 %v3960_v50, %s4675_s25  ;;  %v1603_v62 = vsel %vm4951_vm5, %v1598_v51, %v1602_v32 }
  0xb6   : > { %v2822_v63 = vrot.slane %v2820_v55, 4  ;;  %v2829_v2 = vshll.u32 %v4123_v49, 16  ;;  %v3952_v4 = vcombine.low %v1593_v56, %v1603_v62  ;;  %v2833_v6 = vshrl.u32 %v4123_v49, 16  ;;  %v486_v49 = vld [vmem:[%s4900_s26 + $0x7c] sm:$0xf] }
  0xb7   : > { %v2162_v5 = vsel %vm4910_vm2, %v2160_v59, %v2161_v48  ;;  %v2839_v7 = vshll.u32 %v4124_v54, 16  ;;  %v2825_v11 = vrot.slane %v2823_v1, 5  ;;  %v2628_v13 = vshrl.u32 %v4098_v60, 16  ;;  %v487_v54 = vld [vmem:[%s4900_s26 + $0x80] sm:$0x1] }
  0xb8   : > { %v4032_v10 = vcombine.low %v2159_v58, %v2162_v5  ;;  %v2831_v12 = vrot.slane %v2829_v2, 5  ;;  %v2835_v15 = vrot.slane %v2833_v6, 4  ;;  %v2631_v17 = vshll.u32 %v4098_v60, 16  ;;  %v461_v60 = vld [vmem:[%s4900_s26 + $0x18] sm:$0xf] }
  0xb9   : > { %1990 = vrot.lane.b32.xlu0 %v3952_v4, %s4675_s25  ;;  %v2841_v16 = vrot.slane %v2839_v7, 5  ;;  %v2637_v18 = vshll.u32 %v4099_v61, 16  ;;  %2327 = vrot.lane.b32.xlu1 %v4040_v57, %s4672_s6  ;;  %v2826_v21 = vor.u32 %v2825_v11, %v2822_v63  ;;  %v2630_v22 = vrot.slane %v2628_v13, 4 }
  0xba   : > { %v2641_v23 = vshrl.u32 %v4099_v61, 16  ;;  %v2647_v24 = vshll.u32 %v4100_v3, 16  ;;  %v2836_v27 = vor.u32 %v2835_v15, %v2831_v12  ;;  %v2633_v28 = vrot.slane %v2631_v17, 5  ;;  %v462_v61 = vld [vmem:[%s4900_s26 + $0x1c] sm:$0xf] }
  0xbb   : > { %v2639_v29 = vrot.slane %v2637_v18, 5  ;;  %v4216_v30 = vrot.slane %v4186_v8, 9  ;;  %v2827_v32 = vrot.slane %v2826_v21, 4  ;;  %v3261_v35 = vrot.slane %v4187_v9, 5  ;;  %v463_v3 = vld [vmem:[%s4900_s26 + $0x20] sm:$0x1] }
  0xbc   : > { %v2643_v33 = vrot.slane %v2641_v23, 4  ;;  %v2649_v34 = vrot.slane %v2647_v24, 5  ;;  %v2837_v37 = vrot.slane %v2836_v27, 4  ;;  %v2634_v38 = vor.u32 %v2633_v28, %v2630_v22  ;;  %v1033_v8 = vld [vmem:[%s4900_s26 + $0x78] sm:$0xe] }
  0xbd   : > { %2311 = vrot.lane.b32.xlu0 %v4032_v10, %s4672_s6  ;;  %v3264_v39 = vrot.slane %v4188_v14, 5  ;;  %v4208_v40 = vrot.slane %v4162_v19, 9  ;;  %2508 = vrot.lane.b32.xlu1 %v4390_v20, %s4676_s13  ;;  %v2832_v41 = vsel %vm4951_vm5, %v2827_v32, %v2831_v12  ;;  %v3262_v43 = vsel %vm4910_vm2, %v4216_v30, %v3261_v35  ;;  %v1034_v9 = vld [vmem:[%s4900_s26 + $0x7c] sm:$0xf]  ;;  %v1035_v14 = vld [vmem:[%s4900_s26 + $0x80] sm:$0x1] }
  0xbe   : > { %v2644_v42 = vor.u32 %v2643_v33, %v2639_v29  ;;  %v3263_v44 = vrot.slane %v3261_v35, 4  ;;  %v2842_v45 = vsel %vm4951_vm5, %v2837_v37, %v2841_v16  ;;  %v2635_v46 = vrot.slane %v2634_v38, 4  ;;  %v1009_v19 = vld [vmem:[%s4900_s26 + $0x18] sm:$0xe]  ;;  %v1010_v24 = vld [vmem:[%s4900_s26 + $0x1c] sm:$0xf] }
  0xbf   : > { %v3205_v47 = vrot.slane %v4163_v25, 5  ;;  %v3208_v48 = vrot.slane %v4164_v26, 5  ;;  %v4152_v50 = vcombine.low %v2832_v41, %v2842_v45  ;;  %v747_v55 = vshrl.u32 %v485_v31, 16  ;;  %v1011_v25 = vld [vmem:[%s4900_s26 + $0x20] sm:$0x1] }
  0xc0   : > { %v2645_v51 = vrot.slane %v2644_v42, 4  ;;  %v3265_v52 = vsel %vm4910_vm2, %v3263_v44, %v3264_v39  ;;  %v2640_v56 = vsel %vm4951_vm5, %v2635_v46, %v2639_v29  ;;  %v750_v1 = vshll.u32 %v485_v31, 16  ;;  %v3933_v30 = vld [vmem:[%s4900_s26 + $0x84] sm:$0xf] }
  0xc1   : > { %2492 = vrot.lane.b32.xlu0 %v4391_v36, %s4676_s13  ;;  %v4232_v57 = vcombine.low %v3262_v43, %v3265_v52  ;;  %v3206_v58 = vsel %vm4910_vm2, %v4208_v40, %v3205_v47  ;;  %v3207_v59 = vrot.slane %v3205_v47, 4  ;;  %3053 = vrot.lane.b32.xlu1 %v4152_v50, %s4677_s15  ;;  %v749_v63 = vrot.slane %v747_v55, 4  ;;  %v3934_v47 = vld [vmem:[%s4900_s26 + $0x88] sm:$0xf] }
  0xc2   : > { %v2650_v62 = vsel %vm4951_vm5, %v2645_v51, %v2649_v34  ;;  %v756_v2 = vshll.u32 %v486_v49, 16  ;;  %v760_v6 = vshrl.u32 %v486_v49, 16  ;;  %v766_v7 = vshll.u32 %v487_v54, 16  ;;  %v3935_v51 = vld [vmem:[%s4900_s26 + $0x8c] sm:$0x1] }
  0xc3   : > { %v4144_v4 = vcombine.low %v2640_v56, %v2650_v62  ;;  %v3209_v5 = vsel %vm4910_vm2, %v3207_v59, %v3208_v48  ;;  %v752_v11 = vrot.slane %v750_v1, 5  ;;  %v555_v13 = vshrl.u32 %v461_v60, 16 }
  0xc4   : > { %v4224_v10 = vcombine.low %v3206_v58, %v3209_v5  ;;  %v758_v12 = vrot.slane %v756_v2, 5  ;;  %v762_v15 = vrot.slane %v760_v6, 4  ;;  %v768_v16 = vrot.slane %v766_v7, 5  ;;  %v3909_v58 = vld [vmem:[%s4900_s26 + $0x24] sm:$0xf] }
  0xc5   : > { %3037 = vrot.lane.b32.xlu0 %v4144_v4, %s4677_s15  ;;  %v558_v17 = vshll.u32 %v461_v60, 16  ;;  %v564_v18 = vshll.u32 %v462_v61, 16  ;;  %3374 = vrot.lane.b32.xlu1 %v4232_v57, %s4678_s8  ;;  %v753_v20 = vor.u32 %v752_v11, %v749_v63  ;;  %v557_v21 = vrot.slane %v555_v13, 4  ;;  %v3910_v63 = vld [vmem:[%s4900_s26 + $0x28] sm:$0xf] }
  0xc6   : > { %v568_v22 = vshrl.u32 %v462_v61, 16  ;;  %v574_v23 = vshll.u32 %v463_v3, 16  ;;  %v763_v26 = vor.u32 %v762_v15, %v758_v12  ;;  %v3833_v29 = vrot.slane %v1033_v8, 9  ;;  %v3911_v5 = vld [vmem:[%s4900_s26 + $0x2c] sm:$0x1] }
  0xc7   : > { %v560_v27 = vrot.slane %v558_v17, 5  ;;  %v566_v28 = vrot.slane %v564_v18, 5  ;;  %v754_v31 = vrot.slane %v753_v20, 4  ;;  %v1174_v34 = vrot.slane %v1034_v9, 5  ;;  %v3997_v6 = vld [vmem:[%s4900_s26 + $0x84] sm:$0xe] }
  0xc8   : > { %v570_v32 = vrot.slane %v568_v22, 4  ;;  %v576_v33 = vrot.slane %v574_v23, 5  ;;  %v764_v35 = vrot.slane %v763_v26, 4  ;;  %v1177_v37 = vrot.slane %v1035_v14, 5  ;;  %v3998_v11 = vld [vmem:[%s4900_s26 + $0x88] sm:$0xf] }
  0xc9   : > { %3358 = vrot.lane.b32.xlu0 %v4224_v10, %s4678_s8  ;;  %v561_v36 = vor.u32 %v560_v27, %v557_v21  ;;  %v3825_v38 = vrot.slane %v1009_v19, 9  ;;  %v759_v39 = vsel %vm4951_vm5, %v754_v31, %v758_v12  ;;  %v1175_v41 = vsel %vm4910_vm2, %v3833_v29, %v1174_v34  ;;  %v4392_v17 = vld [vmem:[%s4900_s26 + $0x84] sm:$0xff]  }
  0xca   : > { %v571_v40 = vor.u32 %v570_v32, %v566_v28  ;;  %v1176_v42 = vrot.slane %v1174_v34, 4  ;;  %v769_v43 = vsel %vm4951_vm5, %v764_v35, %v768_v16  ;;  %v1118_v45 = vrot.slane %v1010_v24, 5  ;;  %v3999_v16 = vld [vmem:[%s4900_s26 + $0x8c] sm:$0x1]  ;;  %v3973_v22 = vld [vmem:[%s4900_s26 + $0x24] sm:$0xe] }
  0xcb   : > { %v562_v44 = vrot.slane %v561_v36, 4  ;;  %v1121_v46 = vrot.slane %v1011_v25, 5  ;;  %v3817_v48 = vcombine.low %v759_v39, %v769_v43  ;;  %v1797_v52 = vshrl.u32 %v3933_v30, 16  ;;  %v3974_v27 = vld [vmem:[%s4900_s26 + $0x28] sm:$0xf] }
  0xcc   : > { %v572_v49 = vrot.slane %v571_v40, 4  ;;  %v1178_v50 = vsel %vm4910_vm2, %v1176_v42, %v1177_v37  ;;  %v1119_v56 = vsel %vm4910_vm2, %v3825_v38, %v1118_v45  ;;  %v1120_v57 = vrot.slane %v1118_v45, 4  ;;  %v3975_v32 = vld [vmem:[%s4900_s26 + $0x2c] sm:$0x1]  ;;  %v4125_v38 = vld [vmem:[%s4900_s26 + $0x90] sm:$0xf] }
  0xcd   : > { %v567_v54 = vsel %vm4951_vm5, %v562_v44, %v566_v28  ;;  %v3849_v55 = vcombine.low %v1175_v41, %v1178_v50  ;;  %958 = vrot.lane.b32.xlu1 %v3817_v48, %s4674_s7  ;;  %v1799_v60 = vrot.slane %v1797_v52, 4  ;;  %v1800_v61 = vshll.u32 %v3933_v30, 16 }
  0xce   : > { %v577_v59 = vsel %vm4951_vm5, %v572_v49, %v576_v33  ;;  %v1806_v62 = vshll.u32 %v3934_v47, 16  ;;  %v1122_v2 = vsel %vm4910_vm2, %v1120_v57, %v1121_v46  ;;  %v1810_v3 = vshrl.u32 %v3934_v47, 16  ;;  %v4393_v33 = vld [vmem:[%s4900_s26 + $0x24] sm:$0xff]   ;;  %v4126_v47 = vld [vmem:[%s4900_s26 + $0x94] sm:$0xf] }
  0xcf   : > { %v3809_v1 = vcombine.low %v567_v54, %v577_v59  ;;  %v1816_v4 = vshll.u32 %v3935_v51, 16  ;;  %v3841_v7 = vcombine.low %v1119_v56, %v1122_v2  ;;  %v1802_v8 = vrot.slane %v1800_v61, 5  ;;  %v4127_v51 = vld [vmem:[%s4900_s26 + $0x98] sm:$0x1]  ;;  %v4102_v59 = vld [vmem:[%s4900_s26 + $0x34] sm:$0xf] }
  0xd0   : > { %v1808_v9 = vrot.slane %v1806_v62, 5  ;;  %v1605_v10 = vshrl.u32 %v3909_v58, 16  ;;  %v1812_v12 = vrot.slane %v1810_v3, 4  ;;  %v1608_v14 = vshll.u32 %v3909_v58, 16  ;;  %v4101_v58 = vld [vmem:[%s4900_s26 + $0x30] sm:$0xf] }
  0xd1   : > { %942 = vrot.lane.b32.xlu0 %v3809_v1, %s4674_s7  ;;  %v1818_v13 = vrot.slane %v1816_v4, 5  ;;  %v1614_v15 = vshll.u32 %v3910_v63, 16  ;;  %1282 = vrot.lane.b32.xlu1 %v3849_v55, %s4673_s9  ;;  %v1803_v18 = vor.u32 %v1802_v8, %v1799_v60  ;;  %v1618_v20 = vshrl.u32 %v3910_v63, 16  ;;  %v4103_v1 = vld [vmem:[%s4900_s26 + $0x38] sm:$0x1] }
  0xd2   : > { %v1607_v19 = vrot.slane %v1605_v10, 4  ;;  %v1624_v21 = vshll.u32 %v3911_v5, 16  ;;  %v1813_v23 = vor.u32 %v1812_v12, %v1808_v9  ;;  %v1610_v24 = vrot.slane %v1608_v14, 5  ;;  %v4191_v12 = vld [vmem:[%s4900_s26 + $0x98] sm:$0x1] }
  0xd3   : > { %v1616_v25 = vrot.slane %v1614_v15, 5  ;;  %v4025_v26 = vrot.slane %v3997_v6, 9  ;;  %v1804_v28 = vrot.slane %v1803_v18, 4  ;;  %v1620_v29 = vrot.slane %v1618_v20, 4  ;;  %v4189_v6 = vld [vmem:[%s4900_s26 + $0x90] sm:$0xe] }
  0xd4   : > { %v1626_v30 = vrot.slane %v1624_v21, 5  ;;  %v2221_v31 = vrot.slane %v3998_v11, 5  ;;  %v1814_v34 = vrot.slane %v1813_v23, 4  ;;  %v1611_v35 = vor.u32 %v1610_v24, %v1607_v19  ;;  %v4394_v18 = vld [vmem:[%s4900_s26 + $0x90] sm:$0xff]  }
  0xd5   : > { %1266 = vrot.lane.b32.xlu0 %v3841_v7, %s4673_s9  ;;  %v2224_v36 = vrot.slane %v3999_v16, 5  ;;  %v4017_v37 = vrot.slane %v3973_v22, 9  ;;  %1463 = vrot.lane.b32.xlu1 %v4392_v17, %s4671_s28  ;;  %v1809_v39 = vsel %vm4951_vm5, %v1804_v28, %v1808_v9  ;;  %v1621_v40 = vor.u32 %v1620_v29, %v1616_v25  ;;  %v4190_v7 = vld [vmem:[%s4900_s26 + $0x94] sm:$0xf] }
  0xd6   : > { %v2222_v41 = vsel %vm4910_vm2, %v4025_v26, %v2221_v31  ;;  %v2223_v42 = vrot.slane %v2221_v31, 4  ;;  %v1819_v43 = vsel %vm4951_vm5, %v1814_v34, %v1818_v13  ;;  %v1612_v44 = vrot.slane %v1611_v35, 4  ;;  %v4165_v13 = vld [vmem:[%s4900_s26 + $0x30] sm:$0xe]  ;;  %v4166_v23 = vld [vmem:[%s4900_s26 + $0x34] sm:$0xf] }
  0xd7   : > { %v2165_v45 = vrot.slane %v3974_v27, 5  ;;  %v2168_v46 = vrot.slane %v3975_v32, 5  ;;  %v3961_v48 = vcombine.low %v1809_v39, %v1819_v43  ;;  %v1622_v49 = vrot.slane %v1621_v40, 4  ;;  %v4167_v32 = vld [vmem:[%s4900_s26 + $0x38] sm:$0x1] }
  0xd8   : > { %v2225_v50 = vsel %vm4910_vm2, %v2223_v42, %v2224_v36  ;;  %v2844_v52 = vshrl.u32 %v4125_v38, 16  ;;  %v1617_v54 = vsel %vm4951_vm5, %v1612_v44, %v1616_v25  ;;  %v2847_v62 = vshll.u32 %v4125_v38, 16  ;;  %v488_v38 = vld [vmem:[%s4900_s26 + $0x84] sm:$0xf] }
  0xd9   : > { %1447 = vrot.lane.b32.xlu0 %v4393_v33, %s4671_s28  ;;  %v4041_v55 = vcombine.low %v2222_v41, %v2225_v50  ;;  %v2166_v56 = vsel %vm4910_vm2, %v4017_v37, %v2165_v45  ;;  %v2167_v57 = vrot.slane %v2165_v45, 4  ;;  %2008 = vrot.lane.b32.xlu1 %v3961_v48, %s4675_s25  ;;  %v1627_v60 = vsel %vm4951_vm5, %v1622_v49, %v1626_v30  ;;  %v4395_v33 = vld [vmem:[%s4900_s26 + $0x30] sm:$0xff]  }
  0xda   : > { %v2846_v61 = vrot.slane %v2844_v52, 4  ;;  %v2853_v63 = vshll.u32 %v4126_v47, 16  ;;  %v3953_v2 = vcombine.low %v1617_v54, %v1627_v60  ;;  %v2857_v4 = vshrl.u32 %v4126_v47, 16  ;;  %v489_v47 = vld [vmem:[%s4900_s26 + $0x88] sm:$0xf] }
  0xdb   : > { %v2169_v3 = vsel %vm4910_vm2, %v2167_v57, %v2168_v46  ;;  %v2863_v5 = vshll.u32 %v4127_v51, 16  ;;  %v2849_v9 = vrot.slane %v2847_v62, 5  ;;  %v2652_v11 = vshrl.u32 %v4101_v58, 16  ;;  %v490_v51 = vld [vmem:[%s4900_s26 + $0x8c] sm:$0x1] }
  0xdc   : > { %v4033_v8 = vcombine.low %v2166_v56, %v2169_v3  ;;  %v2855_v10 = vrot.slane %v2853_v63, 5  ;;  %v2859_v14 = vrot.slane %v2857_v4, 4  ;;  %v2655_v16 = vshll.u32 %v4101_v58, 16  ;;  %v464_v58 = vld [vmem:[%s4900_s26 + $0x24] sm:$0xf] }
  0xdd   : > { %1992 = vrot.lane.b32.xlu0 %v3953_v2, %s4675_s25  ;;  %v2865_v15 = vrot.slane %v2863_v5, 5  ;;  %v2661_v17 = vshll.u32 %v4102_v59, 16  ;;  %2329 = vrot.lane.b32.xlu1 %v4041_v55, %s4672_s6  ;;  %v2850_v19 = vor.u32 %v2849_v9, %v2846_v61  ;;  %v2654_v20 = vrot.slane %v2652_v11, 4 }
  0xde   : > { %v2665_v21 = vshrl.u32 %v4102_v59, 16  ;;  %v2671_v22 = vshll.u32 %v4103_v1, 16  ;;  %v2860_v24 = vor.u32 %v2859_v14, %v2855_v10  ;;  %v2657_v25 = vrot.slane %v2655_v16, 5  ;;  %v465_v59 = vld [vmem:[%s4900_s26 + $0x28] sm:$0xf] }
  0xdf   : > { %v2663_v26 = vrot.slane %v2661_v17, 5  ;;  %v4217_v27 = vrot.slane %v4189_v6, 9  ;;  %v2851_v28 = vrot.slane %v2850_v19, 4  ;;  %v3268_v31 = vrot.slane %v4190_v7, 5  ;;  %v466_v1 = vld [vmem:[%s4900_s26 + $0x2c] sm:$0x1] }
  0xe0   : > { %v2667_v29 = vrot.slane %v2665_v21, 4  ;;  %v2673_v30 = vrot.slane %v2671_v22, 5  ;;  %v2861_v34 = vrot.slane %v2860_v24, 4  ;;  %v2658_v35 = vor.u32 %v2657_v25, %v2654_v20  ;;  %v1036_v6 = vld [vmem:[%s4900_s26 + $0x84] sm:$0xe] }
  0xe1   : > { %2313 = vrot.lane.b32.xlu0 %v4033_v8, %s4672_s6  ;;  %v3271_v36 = vrot.slane %v4191_v12, 5  ;;  %v4209_v37 = vrot.slane %v4165_v13, 9  ;;  %2510 = vrot.lane.b32.xlu1 %v4394_v18, %s4676_s13  ;;  %v2856_v39 = vsel %vm4951_vm5, %v2851_v28, %v2855_v10  ;;  %v3269_v41 = vsel %vm4910_vm2, %v4217_v27, %v3268_v31  ;;  %v1037_v7 = vld [vmem:[%s4900_s26 + $0x88] sm:$0xf]  ;;  %v1038_v12 = vld [vmem:[%s4900_s26 + $0x8c] sm:$0x1] }
  0xe2   : > { %v2668_v40 = vor.u32 %v2667_v29, %v2663_v26  ;;  %v3270_v42 = vrot.slane %v3268_v31, 4  ;;  %v2866_v43 = vsel %vm4951_vm5, %v2861_v34, %v2865_v15  ;;  %v2659_v44 = vrot.slane %v2658_v35, 4  ;;  %v1012_v13 = vld [vmem:[%s4900_s26 + $0x24] sm:$0xe]  ;;  %v1013_v22 = vld [vmem:[%s4900_s26 + $0x28] sm:$0xf] }
  0xe3   : > { %v3212_v45 = vrot.slane %v4166_v23, 5  ;;  %v3215_v46 = vrot.slane %v4167_v32, 5  ;;  %v4153_v48 = vcombine.low %v2856_v39, %v2866_v43  ;;  %v771_v52 = vshrl.u32 %v488_v38, 16  ;;  %v1014_v31 = vld [vmem:[%s4900_s26 + $0x2c] sm:$0x1] }
  0xe4   : > { %v2669_v49 = vrot.slane %v2668_v40, 4  ;;  %v3272_v50 = vsel %vm4910_vm2, %v3270_v42, %v3271_v36  ;;  %v2664_v54 = vsel %vm4951_vm5, %v2659_v44, %v2663_v26  ;;  %v774_v62 = vshll.u32 %v488_v38, 16  ;;  %v3936_v36 = vld [vmem:[%s4900_s26 + $0x90] sm:$0xf] }
  0xe5   : > { %2494 = vrot.lane.b32.xlu0 %v4395_v33, %s4676_s13  ;;  %v4233_v55 = vcombine.low %v3269_v41, %v3272_v50  ;;  %v3213_v56 = vsel %vm4910_vm2, %v4209_v37, %v3212_v45  ;;  %v3214_v57 = vrot.slane %v3212_v45, 4  ;;  %3055 = vrot.lane.b32.xlu1 %v4153_v48, %s4677_s15  ;;  %v773_v61 = vrot.slane %v771_v52, 4  ;;  %v3937_v41 = vld [vmem:[%s4900_s26 + $0x94] sm:$0xf]  ;;  %v3912_v52 = vld [vmem:[%s4900_s26 + $0x30] sm:$0xf] }
  0xe6   : > { %v2674_v60 = vsel %vm4951_vm5, %v2669_v49, %v2673_v30  ;;  %v780_v63 = vshll.u32 %v489_v47, 16  ;;  %v784_v4 = vshrl.u32 %v489_v47, 16  ;;  %v790_v5 = vshll.u32 %v490_v51, 16 }
  0xe7   : > { %v4145_v2 = vcombine.low %v2664_v54, %v2674_v60  ;;  %v3216_v3 = vsel %vm4910_vm2, %v3214_v57, %v3215_v46  ;;  %v776_v9 = vrot.slane %v774_v62, 5  ;;  %v579_v11 = vshrl.u32 %v464_v58, 16  ;;  %v3938_v46 = vld [vmem:[%s4900_s26 + $0x98] sm:$0x1] }
  0xe8   : > { %v4225_v8 = vcombine.low %v3213_v56, %v3216_v3  ;;  %v782_v10 = vrot.slane %v780_v63, 5  ;;  %v786_v14 = vrot.slane %v784_v4, 4  ;;  %v792_v15 = vrot.slane %v790_v5, 5 }
  0xe9   : > { %3039 = vrot.lane.b32.xlu0 %v4145_v2, %s4677_s15  ;;  %v582_v16 = vshll.u32 %v464_v58, 16  ;;  %v588_v17 = vshll.u32 %v465_v59, 16  ;;  %3376 = vrot.lane.b32.xlu1 %v4233_v55, %s4678_s8  ;;  %v777_v18 = vor.u32 %v776_v9, %v773_v61  ;;  %v581_v19 = vrot.slane %v579_v11, 4  ;;  %v5253_v47 = vpop.permute.xlu1 %1459  ;;  %v3913_v58 = vld [vmem:[%s4900_s26 + $0x34] sm:$0xf] }
  0xea   : > { %v592_v20 = vshrl.u32 %v465_v59, 16  ;;  %v598_v21 = vshll.u32 %v466_v1, 16  ;;  %v787_v23 = vor.u32 %v786_v14, %v782_v10  ;;  %v3834_v26 = vrot.slane %v1036_v6, 9  ;;  %v5263_v59 = vpop.permute.xlu0 %1443  ;;  %v3914_v1 = vld [vmem:[%s4900_s26 + $0x38] sm:$0x1] }
  0xeb   : > { %v584_v24 = vrot.slane %v582_v16, 5  ;;  %v590_v25 = vrot.slane %v588_v17, 5  ;;  %v778_v27 = vrot.slane %v777_v18, 4  ;;  %v1181_v30 = vrot.slane %v1037_v7, 5  ;;  %v4000_v6 = vld [vmem:[%s4900_s26 + $0x90] sm:$0xe] }
  0xec   : > { %v594_v28 = vrot.slane %v592_v20, 4  ;;  %v600_v29 = vrot.slane %v598_v21, 5  ;;  %v788_v32 = vrot.slane %v787_v23, 4  ;;  %v1184_v34 = vrot.slane %v1038_v12, 5  ;;  %v4001_v7 = vld [vmem:[%s4900_s26 + $0x94] sm:$0xf] }
  0xed   : > { %3360 = vrot.lane.b32.xlu0 %v4225_v8, %s4678_s8  ;;  %v585_v33 = vor.u32 %v584_v24, %v581_v19  ;;  %v3826_v35 = vrot.slane %v1012_v13, 9  ;;  %v783_v37 = vsel %vm4951_vm5, %v778_v27, %v782_v10  ;;  %v1182_v39 = vsel %vm4910_vm2, %v3834_v26, %v1181_v30  ;;  %v4002_v12 = vld [vmem:[%s4900_s26 + $0x98] sm:$0x1]  ;;  %v3976_v17 = vld [vmem:[%s4900_s26 + $0x30] sm:$0xe] }
  0xee   : > { %v595_v38 = vor.u32 %v594_v28, %v590_v25  ;;  %v1183_v40 = vrot.slane %v1181_v30, 4  ;;  %v793_v42 = vsel %vm4951_vm5, %v788_v32, %v792_v15  ;;  %v1125_v44 = vrot.slane %v1013_v22, 5  ;;  %v4396_v19 = vld [vmem:[%s4900_s26 + $0x90] sm:$0xff]  }
  0xef   : > { %v586_v43 = vrot.slane %v585_v33, 4  ;;  %v1128_v45 = vrot.slane %v1014_v31, 5  ;;  %v3818_v48 = vcombine.low %v783_v37, %v793_v42  ;;  %v1821_v51 = vshrl.u32 %v3936_v36, 16  ;;  %v3977_v24 = vld [vmem:[%s4900_s26 + $0x34] sm:$0xf] }
  0xf0   : > { %v596_v49 = vrot.slane %v595_v38, 4  ;;  %v1185_v50 = vsel %vm4910_vm2, %v1183_v40, %v1184_v34  ;;  %v1126_v56 = vsel %vm4910_vm2, %v3826_v35, %v1125_v44  ;;  %v1127_v57 = vrot.slane %v1125_v44, 4  ;;  %v3978_v34 = vld [vmem:[%s4900_s26 + $0x38] sm:$0x1]  ;;  %v4397_v35 = vld [vmem:[%s4900_s26 + $0x30] sm:$0xff]  }
  0xf1   : > { %v591_v54 = vsel %vm4951_vm5, %v586_v43, %v590_v25  ;;  %v3850_v55 = vcombine.low %v1182_v39, %v1185_v50  ;;  %960 = vrot.lane.b32.xlu1 %v3818_v48, %s4674_s7  ;;  %v1823_v61 = vrot.slane %v1821_v51, 4  ;;  %v1824_v62 = vshll.u32 %v3936_v36, 16  ;;  %v4128_v40 = vld [vmem:[%s4900_s26 + $0x9c] sm:$0xf]  ;;  %v4129_v50 = vld [vmem:[%s4900_s26 + $0xa0] sm:$0xf] }
  0xf2   : > { %v601_v60 = vsel %vm4951_vm5, %v596_v49, %v600_v29  ;;  %v1830_v63 = vshll.u32 %v3937_v41, 16  ;;  %v1129_v3 = vsel %vm4910_vm2, %v1127_v57, %v1128_v45  ;;  %v1834_v4 = vshrl.u32 %v3937_v41, 16  ;;  %v5281_v29 = vpop.permute.xlu0 %2309 }
  0xf3   : > { %v3810_v2 = vcombine.low %v591_v54, %v601_v60  ;;  %v1840_v5 = vshll.u32 %v3938_v46, 16  ;;  %v3842_v8 = vcombine.low %v1126_v56, %v1129_v3  ;;  %v1826_v9 = vrot.slane %v1824_v62, 5  ;;  %v5276_v18 = vpop.permute.xlu1 %1262  ;;  %v4130_v56 = vld [vmem:[%s4900_s26 + $0xa4] sm:$0x1] }
  0xf4   : > { %v1832_v10 = vrot.slane %v1830_v63, 5  ;;  %v1629_v11 = vshrl.u32 %v3912_v52, 16  ;;  %v1836_v13 = vrot.slane %v1834_v4, 4  ;;  %v1632_v15 = vshll.u32 %v3912_v52, 16  ;;  %v4104_v63 = vld [vmem:[%s4900_s26 + $0x3c] sm:$0xf] }
  0xf5   : > { %944 = vrot.lane.b32.xlu0 %v3810_v2, %s4674_s7  ;;  %v1842_v14 = vrot.slane %v1840_v5, 5  ;;  %v1638_v16 = vshll.u32 %v3913_v58, 16  ;;  %1284 = vrot.lane.b32.xlu1 %v3850_v55, %s4673_s9  ;;  %v1827_v20 = vor.u32 %v1826_v9, %v1823_v61  ;;  %v1642_v22 = vshrl.u32 %v3913_v58, 16  ;;  %v4404_v9 = vld [vmem:[%s4900_s26 + $0x6c] sm:$0xff]  }
  0xf6   : > { %v1631_v21 = vrot.slane %v1629_v11, 4  ;;  %v1648_v23 = vshll.u32 %v3914_v1, 16  ;;  %v1837_v25 = vor.u32 %v1836_v13, %v1832_v10  ;;  %v1634_v26 = vrot.slane %v1632_v15, 5  ;;  %v4410_v11 = vld [vmem:[%s4900_s26 + $0x78] sm:$0xff]  }
  0xf7   : > { %v1640_v27 = vrot.slane %v1638_v16, 5  ;;  %v4026_v28 = vrot.slane %v4000_v6, 9  ;;  %v1828_v30 = vrot.slane %v1827_v20, 4  ;;  %v1644_v31 = vrot.slane %v1642_v22, 4  ;;  %v5295_v51 = vpop.permute.xlu1 %1278  ;;  %v4105_v6 = vld [vmem:[%s4900_s26 + $0x40] sm:$0xf] }
  0xf8   : > { %v1650_v32 = vrot.slane %v1648_v23, 5  ;;  %v2228_v33 = vrot.slane %v4001_v7, 5  ;;  %v1838_v36 = vrot.slane %v1837_v25, 4  ;;  %v1635_v37 = vor.u32 %v1634_v26, %v1631_v21  ;;  %v4400_v7 = vld [vmem:[%s4900_s26] sm:$0xff]  }
  0xf9   : > { %1268 = vrot.lane.b32.xlu0 %v3842_v8, %s4673_s9  ;;  %v2231_v38 = vrot.slane %v4002_v12, 5  ;;  %v4018_v39 = vrot.slane %v3976_v17, 9  ;;  %1465 = vrot.lane.b32.xlu1 %v4396_v19, %s4671_s28  ;;  %v1833_v41 = vsel %vm4951_vm5, %v1828_v30, %v1832_v10  ;;  %v1645_v42 = vor.u32 %v1644_v31, %v1640_v27  ;;  %v4401_v8 = vld [vmem:[%s4900_s26 + $0x60] sm:$0xff]   ;;  %v4405_v10 = vld [vmem:[%s4900_s26 + $0xc] sm:$0xff]  }
  0xfa   : > { %v2229_v43 = vsel %vm4910_vm2, %v4026_v28, %v2228_v33  ;;  %v2230_v44 = vrot.slane %v2228_v33, 4  ;;  %v1843_v45 = vsel %vm4951_vm5, %v1838_v36, %v1842_v14  ;;  %v1636_v46 = vrot.slane %v1635_v37, 4  ;;  %v4106_v16 = vld [vmem:[%s4900_s26 + $0x44] sm:$0x1]  ;;  %v4411_v17 = vld [vmem:[%s4900_s26 + $0x18] sm:$0xff]  }
  0xfb   : > { %v2172_v48 = vrot.slane %v3977_v24, 5  ;;  %v2175_v49 = vrot.slane %v3978_v34, 5  ;;  %v3962_v52 = vcombine.low %v1833_v41, %v1843_v45  ;;  %v1646_v54 = vrot.slane %v1645_v42, 4  ;;  %v4416_v19 = vld [vmem:[%s4900_s26 + $0x84] sm:$0xff]   ;;  %v4192_v24 = vld [vmem:[%s4900_s26 + $0x9c] sm:$0xe]  ;;  %v5329_v33 = vpop.permute.xlu1 %2325 }
  0xfc   : > { %v2232_v55 = vsel %vm4910_vm2, %v2230_v44, %v2231_v38  ;;  %v2868_v57 = vshrl.u32 %v4128_v40, 16  ;;  %v1641_v58 = vsel %vm4951_vm5, %v1636_v46, %v1640_v27  ;;  %v2871_v4 = vshll.u32 %v4128_v40, 16  ;;  %v4417_v25 = vld [vmem:[%s4900_s26 + $0x24] sm:$0xff]   ;;  %v4193_v31 = vld [vmem:[%s4900_s26 + $0xa0] sm:$0xf] }
  0xfd   : > { %1449 = vrot.lane.b32.xlu0 %v4397_v35, %s4671_s28  ;;  %v4042_v60 = vcombine.low %v2229_v43, %v2232_v55  ;;  %v2173_v61 = vsel %vm4910_vm2, %v4018_v39, %v2172_v48  ;;  %v2174_v62 = vrot.slane %v2172_v48, 4  ;;  %v5306_v1 = vpop.permute.xlu0 %938  ;;  %2010 = vrot.lane.b32.xlu1 %v3962_v52, %s4675_s25  ;;  %v1651_v2 = vsel %vm4951_vm5, %v1646_v54, %v1650_v32  ;;  %v5327_v32 = vld [vmem:[%s4900_s26 + $0xa4] sm:$0x1]  ;;  %v4398_v34 = vld [vmem:[%s4900_s26 + $0x9c] sm:$0xff]  }
  0xfe   : > { %v2870_v3 = vrot.slane %v2868_v57, 4  ;;  %v2877_v5 = vshll.u32 %v4129_v50, 16  ;;  %v3954_v12 = vcombine.low %v1641_v58, %v1651_v2  ;;  %v2881_v14 = vshrl.u32 %v4129_v50, 16  ;;  %v4168_v39 = vld [vmem:[%s4900_s26 + $0x3c] sm:$0xe] }
  0xff   : > { %v2176_v13 = vsel %vm4910_vm2, %v2174_v62, %v2175_v49  ;;  %v2887_v15 = vshll.u32 %v4130_v56, 16  ;;  %v2873_v21 = vrot.slane %v2871_v4, 5  ;;  %v2676_v23 = vshrl.u32 %v4104_v63, 16  ;;  %v4169_v48 = vld [vmem:[%s4900_s26 + $0x40] sm:$0xf] }
 0x100   : > { %v4034_v20 = vcombine.low %v2173_v61, %v2176_v13  ;;  %v2879_v22 = vrot.slane %v2877_v5, 5  ;;  %v2883_v26 = vrot.slane %v2881_v14, 4  ;;  %v2679_v28 = vshll.u32 %v4104_v63, 16  ;;  %v4399_v49 = vld [vmem:[%s4900_s26 + $0x3c] sm:$0xff]   ;;  %v491_v2 = vld [vmem:[%s4900_s26 + $0x90] sm:$0xf] }
 0x101   : > { %1994 = vrot.lane.b32.xlu0 %v3954_v12, %s4675_s25  ;;  %v2889_v27 = vrot.slane %v2887_v15, 5  ;;  %v2685_v30 = vshll.u32 %v4105_v6, 16  ;;  %2331 = vrot.lane.b32.xlu1 %v4042_v60, %s4672_s6  ;;  %v2874_v35 = vor.u32 %v2873_v21, %v2870_v3  ;;  %v2678_v36 = vrot.slane %v2676_v23, 4  ;;  %v4170_v60 = vld [vmem:[%s4900_s26 + $0x44] sm:$0x1] }
 0x102   : > { %v2689_v37 = vshrl.u32 %v4105_v6, 16  ;;  %v2695_v38 = vshll.u32 %v4106_v16, 16  ;;  %v955_v40 = vpop.permute.xlu0 %954  ;;  %v2884_v41 = vor.u32 %v2883_v26, %v2879_v22  ;;  %v2681_v42 = vrot.slane %v2679_v28, 5  ;;  %v467_v16 = vld [vmem:[%s4900_s26 + $0x30] sm:$0xf] }
 0x103   : > { %v2687_v43 = vrot.slane %v2685_v30, 5  ;;  %vm438_vm6 = vcmask 31744   ;;  %v2875_v44 = vrot.slane %v2874_v35, 4  ;;  %vm986_vm7 = vcmask 64544  }
 0x104   : > { %v2691_v45 = vrot.slane %v2689_v37, 4  ;;  %v2697_v46 = vrot.slane %v2695_v38, 5  ;;  %439 = vst.msk [vmem:[#allocation2] sm:$0xff] %vm438_vm6, %v4400_v7  ;;  %447 = vst.msk [vmem:[#allocation2 + $0x40] sm:$0xff] %vm438_vm6, %v4401_v8  ;;  %v2885_v50 = vrot.slane %v2884_v41, 4  ;;  %v2682_v52 = vor.u32 %v2681_v42, %v2678_v36 }
 0x105   : > { %448 = vst.msk [vmem:[#allocation2 + $0x48] sm:$0xff] %vm438_vm6, %v4404_v9  ;;  %440 = vst.msk [vmem:[#allocation2 + $0x8] sm:$0xff] %vm438_vm6, %v4405_v10  ;;  %2315 = vrot.lane.b32.xlu0 %v4034_v20, %s4672_s6  ;;  %vm1310_vm8 = vcmask 97344   ;;  %v4218_v54 = vrot.slane %v4192_v24, 9  ;;  %2512 = vrot.lane.b32.xlu1 %v4398_v34, %s4676_s13  ;;  %v2880_v55 = vsel %vm4951_vm5, %v2875_v44, %v2879_v22  ;;  %v3275_v57 = vrot.slane %v4193_v31, 5 }
 0x106   : > { %449 = vst.msk [vmem:[#allocation2 + $0x50] sm:$0xff] %vm438_vm6, %v4410_v11  ;;  %441 = vst.msk [vmem:[#allocation2 + $0x10] sm:$0xff] %vm438_vm6, %v4411_v17  ;;  %v2692_v56 = vor.u32 %v2691_v45, %v2687_v43  ;;  %v3278_v58 = vrot.slane %v5327_v32, 5  ;;  %v2890_v61 = vsel %vm4951_vm5, %v2885_v50, %v2889_v27  ;;  %v2683_v62 = vrot.slane %v2682_v52, 4  ;;  %v5360_v3 = vpop.permute.xlu1 %2004  ;;  %v492_v7 = vld [vmem:[%s4900_s26 + $0x94] sm:$0xf] }
 0x107   : > { %450 = vst.msk [vmem:[#allocation2 + $0x58] sm:$0xff] %vm438_vm6, %v4416_v19  ;;  %442 = vst.msk [vmem:[#allocation2 + $0x18] sm:$0xff] %vm438_vm6, %v4417_v25  ;;  %v4210_v63 = vrot.slane %v4168_v39, 9  ;;  %v4154_v4 = vcombine.low %v2880_v55, %v2890_v61  ;;  %v3276_v5 = vsel %vm4910_vm2, %v4218_v54, %v3275_v57  ;;  %v3277_v6 = vrot.slane %v3275_v57, 4  ;;  %v493_v11 = vld [vmem:[%s4900_s26 + $0x98] sm:$0x1] }
 0x108   : > { %987 = vst.msk [vmem:[#allocation2] sm:$0xff] %vm986_vm7, %v5306_v1  ;;  %995 = vst.msk [vmem:[#allocation2 + $0x40] sm:$0xff] %vm986_vm7, %v955_v40  ;;  %v3219_v1 = vrot.slane %v4169_v48, 5  ;;  %v3222_v10 = vrot.slane %v4170_v60, 5  ;;  %v795_v14 = vshrl.u32 %v491_v2, 16  ;;  %v798_v15 = vshll.u32 %v491_v2, 16 }
 0x109   : > { %1311 = vst.msk [vmem:[#allocation2] sm:$0xff] %vm1310_vm8, %v5276_v18  ;;  %1319 = vst.msk [vmem:[#allocation2 + $0x40] sm:$0xff] %vm1310_vm8, %v5295_v51  ;;  %v2693_v18 = vrot.slane %v2692_v56, 4  ;;  %2496 = vrot.lane.b32.xlu0 %v4399_v49, %s4676_s13  ;;  %v2688_v51 = vsel %vm4951_vm5, %v2683_v62, %v2687_v43  ;;  %3057 = vrot.lane.b32.xlu1 %v4154_v4, %s4677_s15  ;;  %v3279_v13 = vsel %vm4910_vm2, %v3277_v6, %v3278_v58  ;;  %v468_v17 = vld [vmem:[%s4900_s26 + $0x34] sm:$0xf]  ;;  %vm1491_vm9 = vcmask 130144  }
 0x10a   : > { %v3220_v8 = vsel %vm4910_vm2, %v4210_v63, %v3219_v1  ;;  %v3221_v9 = vrot.slane %v3219_v1, 4  ;;  %v1989_v19 = vpop.permute.xlu0 %1988  ;;  %v4234_v21 = vcombine.low %v3276_v5, %v3279_v13  ;;  %v804_v23 = vshll.u32 %v492_v7, 16  ;;  %v469_v24 = vld [vmem:[%s4900_s26 + $0x38] sm:$0x1]  ;;  %v5381_v25 = vpop.permute.xlu1 %2506  ;;  %v1039_v36 = vld [vmem:[%s4900_s26 + $0x90] sm:$0xe] }
 0x10b   : > { %v2698_v12 = vsel %vm4951_vm5, %v2693_v18, %v2697_v46  ;;  %v797_v27 = vrot.slane %v795_v14, 4  ;;  %v800_v28 = vrot.slane %v798_v15, 5  ;;  %v808_v30 = vshrl.u32 %v492_v7, 16  ;;  %v1040_v41 = vld [vmem:[%s4900_s26 + $0x94] sm:$0xf]  ;;  %1500 = vst.msk [vmem:[#allocation2 + $0x40] sm:$0xff] %vm1491_vm9, %v5253_v47 }
 0x10c   : > { %v4146_v20 = vcombine.low %v2688_v51, %v2698_v12  ;;  %v3223_v22 = vsel %vm4910_vm2, %v3221_v9, %v3222_v10  ;;  %v806_v31 = vrot.slane %v804_v23, 5  ;;  %v814_v32 = vshll.u32 %v493_v11, 16  ;;  %v1041_v42 = vld [vmem:[%s4900_s26 + $0x98] sm:$0x1]  ;;  %v1015_v43 = vld [vmem:[%s4900_s26 + $0x30] sm:$0xe] }
 0x10d   : > { %v4226_v26 = vcombine.low %v3220_v8, %v3223_v22  ;;  %v603_v34 = vshrl.u32 %v467_v16, 16  ;;  %v606_v35 = vshll.u32 %v467_v16, 16  ;;  %3378 = vrot.lane.b32.xlu1 %v4234_v21, %s4678_s8  ;;  %v801_v37 = vor.u32 %v800_v28, %v797_v27  ;;  %v1016_v50 = vld [vmem:[%s4900_s26 + $0x34] sm:$0xf]  ;;  %v1017_v52 = vld [vmem:[%s4900_s26 + $0x38] sm:$0x1] }
 0x10e   : > { %3041 = vrot.lane.b32.xlu0 %v4146_v20, %s4677_s15  ;;  %v810_v38 = vrot.slane %v808_v30, 4  ;;  %v612_v39 = vshll.u32 %v468_v17, 16  ;;  %v616_v40 = vshrl.u32 %v468_v17, 16  ;;  %v2491_v44 = vpop.permute.xlu0 %2490  ;;  %v816_v45 = vrot.slane %v814_v32, 5  ;;  %1492 = vst.msk [vmem:[#allocation2] sm:$0xff] %vm1491_vm9, %v5263_v59 }
 0x10f   : > { %v605_v46 = vrot.slane %v603_v34, 4  ;;  %v608_v48 = vrot.slane %v606_v35, 5  ;;  %v622_v49 = vshll.u32 %v469_v24, 16  ;;  %v802_v54 = vrot.slane %v801_v37, 4  ;;  %v3052_v58 = vpop.permute.xlu1 %3051  ;;  %v3939_v12 = vld [vmem:[%s4900_s26 + $0x9c] sm:$0xf] }
 0x110   : > { %v811_v55 = vor.u32 %v810_v38, %v806_v31  ;;  %v614_v56 = vrot.slane %v612_v39, 5  ;;  %v618_v57 = vrot.slane %v616_v40, 4  ;;  %vm2036_vm10 = vcmask 162944   ;;  %v3940_v16 = vld [vmem:[%s4900_s26 + $0xa0] sm:$0xf]  ;;  %v4422_v35 = vld [vmem:[%s4900_s26 + $0x90] sm:$0xff]  }
 0x111   : > { %v609_v60 = vor.u32 %v608_v48, %v605_v46  ;;  %v624_v61 = vrot.slane %v622_v49, 5  ;;  %v807_v62 = vsel %vm4951_vm5, %v802_v54, %v806_v31  ;;  %v3835_v2 = vrot.slane %v1039_v36, 9  ;;  %2045 = vst.msk [vmem:[#allocation2 + $0x40] sm:$0xff] %vm2036_vm10, %v5360_v3  ;;  %2037 = vst.msk [vmem:[#allocation2] sm:$0xff] %vm2036_vm10, %v1989_v19  ;;  %v3941_v17 = vld [vmem:[%s4900_s26 + $0xa4] sm:$0x1] }
 0x112   : > { %3362 = vrot.lane.b32.xlu0 %v4226_v26, %s4678_s8  ;;  %v812_v63 = vrot.slane %v811_v55, 4  ;;  %v619_v1 = vor.u32 %v618_v57, %v614_v56  ;;  %v1188_v18 = vrot.slane %v1040_v41, 5  ;;  %v1191_v5 = vrot.slane %v1041_v42, 5  ;;  %v3915_v22 = vld [vmem:[%s4900_s26 + $0x3c] sm:$0xf]  ;;  %451 = vst.msk [vmem:[#allocation2 + $0x60] sm:$0xff] %vm438_vm6, %v4422_v35 }
 0x113   : > { %v610_v4 = vrot.slane %v609_v60, 4  ;;  %v3827_v6 = vrot.slane %v1015_v43, 9  ;;  %v1132_v51 = vrot.slane %v1016_v50, 5  ;;  %v1135_v8 = vrot.slane %v1017_v52, 5  ;;  %v3036_v59 = vpop.permute.xlu0 %3035  ;;  %v3373_v19 = vpop.permute.xlu1 %3372  ;;  %v3916_v28 = vld [vmem:[%s4900_s26 + $0x40] sm:$0xf] }
 0x114   : > { %v817_v7 = vsel %vm4951_vm5, %v812_v63, %v816_v45  ;;  %v620_v47 = vrot.slane %v619_v1, 4  ;;  %v1189_v3 = vsel %vm4910_vm2, %v3835_v2, %v1188_v18  ;;  %v1190_v11 = vrot.slane %v1188_v18, 4  ;;  %v3917_v34 = vld [vmem:[%s4900_s26 + $0x44] sm:$0x1]  ;;  %v4003_v40 = vld [vmem:[%s4900_s26 + $0x9c] sm:$0xe] }
 0x115   : > { %v3819_v9 = vcombine.low %v807_v62, %v817_v7  ;;  %v615_v10 = vsel %vm4951_vm5, %v610_v4, %v614_v56  ;;  %v1133_v14 = vsel %vm4910_vm2, %v3827_v6, %v1132_v51  ;;  %v1134_v15 = vrot.slane %v1132_v51, 4  ;;  %v4004_v45 = vld [vmem:[%s4900_s26 + $0xa0] sm:$0xf]  ;;  %v4005_v52 = vld [vmem:[%s4900_s26 + $0xa4] sm:$0x1]  ;;  %v4423_v55 = vld [vmem:[%s4900_s26 + $0x30] sm:$0xff]  }
 0x116   : > { %v625_v13 = vsel %vm4951_vm5, %v620_v47, %v624_v61  ;;  %vm2357_vm11 = vcmask 195744   ;;  %v1192_v21 = vsel %vm4910_vm2, %v1190_v11, %v1191_v5  ;;  %vm2538_vm12 = vcmask 228544   ;;  %v4403_v56 = vld [vmem:[%s4900_s26 + $0x3c] sm:$0xff]   ;;  %443 = vst.msk [vmem:[#allocation2 + $0x20] sm:$0xff] %vm438_vm6, %v4423_v55  ;;  %v3981_v47 = vld [vmem:[%s4900_s26 + $0x44] sm:$0x1] }
 0x117   : > { %962 = vrot.lane.b32.xlu1 %v3819_v9, %s4674_s7  ;;  %v3811_v20 = vcombine.low %v615_v10, %v625_v13  ;;  %2366 = vst.msk [vmem:[#allocation2 + $0x40] sm:$0xff] %vm2357_vm11, %v5329_v33  ;;  %2358 = vst.msk [vmem:[#allocation2] sm:$0xff] %vm2357_vm11, %v5281_v29  ;;  %vm3083_vm13 = vcmask 261344   ;;  %v3851_v23 = vcombine.low %v1189_v3, %v1192_v21  ;;  %v1136_v24 = vsel %vm4910_vm2, %v1134_v15, %v1135_v8  ;;  %v4402_v33 = vld [vmem:[%s4900_s26 + $0x9c] sm:$0xff]   ;;  %v4131_v15 = vld [vmem:[%s4900_s26 + $0xa8] sm:$0xf] }
 0x118   : > { %2547 = vst.msk [vmem:[#allocation2 + $0x40] sm:$0xff] %vm2538_vm12, %v5381_v25  ;;  %2539 = vst.msk [vmem:[#allocation2] sm:$0xff] %vm2538_vm12, %v2491_v44  ;;  %v1845_v26 = vshrl.u32 %v3939_v12, 16  ;;  %v1848_v27 = vshll.u32 %v3939_v12, 16  ;;  %v3843_v29 = vcombine.low %v1133_v14, %v1136_v24  ;;  %v1854_v30 = vshll.u32 %v3940_v16, 16  ;;  %v3357_v25 = vpop.permute.xlu0 %3356  ;;  %v4406_v55 = vld [vmem:[%s4900_s26 + $0xa8] sm:$0xff]  }
 0x119   : > { %946 = vrot.lane.b32.xlu0 %v3811_v20, %s4674_s7  ;;  %3092 = vst.msk [vmem:[#allocation2 + $0x40] sm:$0xff] %vm3083_vm13, %v3052_v58  ;;  %3084 = vst.msk [vmem:[#allocation2] sm:$0xff] %vm3083_vm13, %v3036_v59  ;;  %v1858_v31 = vshrl.u32 %v3940_v16, 16  ;;  %v1864_v32 = vshll.u32 %v3941_v17, 16  ;;  %v1653_v38 = vshrl.u32 %v3915_v22, 16  ;;  %v1656_v39 = vshll.u32 %v3915_v22, 16 }
 0x11a   : > { %v1847_v36 = vrot.slane %v1845_v26, 4  ;;  %v1850_v37 = vrot.slane %v1848_v27, 5  ;;  %v1856_v41 = vrot.slane %v1854_v30, 5  ;;  %v1662_v44 = vshll.u32 %v3916_v28, 16  ;;  %v3979_v61 = vld [vmem:[%s4900_s26 + $0x3c] sm:$0xe] }
 0x11b   : > { %1286 = vrot.lane.b32.xlu1 %v3851_v23, %s4673_s9  ;;  %v1860_v42 = vrot.slane %v1858_v31, 4  ;;  %v1866_v43 = vrot.slane %v1864_v32, 5  ;;  %v1655_v48 = vrot.slane %v1653_v38, 4  ;;  %v1658_v49 = vrot.slane %v1656_v39, 5  ;;  %v957_v54 = vpop.permute.xlu1 %956  ;;  %v3980_v4 = vld [vmem:[%s4900_s26 + $0x40] sm:$0xf] }
 0x11c   : > { %v1851_v46 = vor.u32 %v1850_v37, %v1847_v36  ;;  %v1666_v50 = vshrl.u32 %v3916_v28, 16  ;;  %v1664_v58 = vrot.slane %v1662_v44, 5  ;;  %v1672_v60 = vshll.u32 %v3917_v34, 16  ;;  %996 = vst.msk [vmem:[#allocation2 + $0x48] sm:$0xff] %vm986_vm7, %v957_v54  ;;  %v4132_v16 = vld [vmem:[%s4900_s26 + $0xac] sm:$0xf] }
 0x11d   : > { %1270 = vrot.lane.b32.xlu0 %v3843_v29, %s4673_s9  ;;  %v1861_v57 = vor.u32 %v1860_v42, %v1856_v41  ;;  %vm3404_vm14 = vcmask 294144   ;;  %v1659_v63 = vor.u32 %v1658_v49, %v1655_v48  ;;  %v4027_v2 = vrot.slane %v4003_v40, 9  ;;  %v4133_v22 = vld [vmem:[%s4900_s26 + $0xb0] sm:$0x1]  ;;  %v4107_v23 = vld [vmem:[%s4900_s26 + $0x48] sm:$0xf] }
 0x11e   : > { %v1852_v62 = vrot.slane %v1851_v46, 4  ;;  %v1668_v1 = vrot.slane %v1666_v50, 4  ;;  %3413 = vst.msk [vmem:[#allocation2 + $0x40] sm:$0xff] %vm3404_vm14, %v3373_v19  ;;  %3405 = vst.msk [vmem:[#allocation2] sm:$0xff] %vm3404_vm14, %v3357_v25  ;;  %v1674_v5 = vrot.slane %v1672_v60, 5  ;;  %v2235_v6 = vrot.slane %v4004_v45, 5 }
 0x11f   : > { %1467 = vrot.lane.b32.xlu1 %v4402_v33, %s4671_s28  ;;  %v1862_v18 = vrot.slane %v1861_v57, 4  ;;  %v2238_v7 = vrot.slane %v4005_v52, 5  ;;  %v941_v51 = vpop.permute.xlu0 %940  ;;  %v1660_v59 = vrot.slane %v1659_v63, 4  ;;  %v4019_v10 = vrot.slane %v3979_v61, 9  ;;  %v1281_v3 = vpop.permute.xlu1 %1280  ;;  %v4108_v29 = vld [vmem:[%s4900_s26 + $0x4c] sm:$0xf] }
 0x120   : > { %v1857_v8 = vsel %vm4951_vm5, %v1852_v62, %v1856_v41  ;;  %v1669_v9 = vor.u32 %v1668_v1, %v1664_v58  ;;  %988 = vst.msk [vmem:[#allocation2 + $0x8] sm:$0xff] %vm986_vm7, %v941_v51  ;;  %v2236_v12 = vsel %vm4910_vm2, %v4027_v2, %v2235_v6  ;;  %v2237_v13 = vrot.slane %v2235_v6, 4  ;;  %v4109_v39 = vld [vmem:[%s4900_s26 + $0x50] sm:$0x1]  ;;  %v4195_v44 = vld [vmem:[%s4900_s26 + $0xa8] sm:$0xe] }
 0x121   : > { %1451 = vrot.lane.b32.xlu0 %v4403_v56, %s4671_s28  ;;  %v1867_v11 = vsel %vm4951_vm5, %v1862_v18, %v1866_v43  ;;  %v2179_v14 = vrot.slane %v3980_v4, 5  ;;  %1320 = vst.msk [vmem:[#allocation2 + $0x48] sm:$0xff] %vm1310_vm8, %v1281_v3  ;;  %v1665_v19 = vsel %vm4951_vm5, %v1660_v59, %v1664_v58  ;;  %v2182_v21 = vrot.slane %v3981_v47, 5  ;;  %v4196_v54 = vld [vmem:[%s4900_s26 + $0xac] sm:$0xf] }
 0x122   : > { %v3963_v17 = vcombine.low %v1857_v8, %v1867_v11  ;;  %v1670_v20 = vrot.slane %v1669_v9, 4  ;;  %v2239_v24 = vsel %vm4910_vm2, %v2237_v13, %v2238_v7  ;;  %vm3444_vm15 = vcmask 293888   ;;  %v4197_v61 = vld [vmem:[%s4900_s26 + $0xb0] sm:$0x1]  ;;  %v4171_v18 = vld [vmem:[%s4900_s26 + $0x48] sm:$0xe] }
 0x123   : > { %v2180_v26 = vsel %vm4910_vm2, %v4019_v10, %v2179_v14  ;;  %v2181_v27 = vrot.slane %v2179_v14, 4  ;;  %v1265_v28 = vpop.permute.xlu0 %1264  ;;  %v4043_v30 = vcombine.low %v2236_v12, %v2239_v24  ;;  %v2892_v31 = vshrl.u32 %v4131_v15, 16  ;;  %v1462_v34 = vpop.permute.xlu1 %1461  ;;  %v4172_v51 = vld [vmem:[%s4900_s26 + $0x4c] sm:$0xf]  ;;  %v495_v24 = vld [vmem:[%s4900_s26 + $0xa0] sm:$0xf]  ;;  %4266 = vmatprep.mubr.msk.bf16.mxu0 %vm3444_vm15, %v5902_v53 }
 0x124   : > { %2012 = vrot.lane.b32.xlu1 %v3963_v17, %s4675_s25  ;;  %v1675_v33 = vsel %vm4951_vm5, %v1670_v20, %v1674_v5  ;;  %1312 = vst.msk [vmem:[#allocation2 + $0x8] sm:$0xff] %vm1310_vm8, %v1265_v28  ;;  %v2895_v32 = vshll.u32 %v4131_v15, 16  ;;  %v2901_v37 = vshll.u32 %v4132_v16, 16  ;;  %v2905_v38 = vshrl.u32 %v4132_v16, 16  ;;  %v4407_v8 = vld [vmem:[%s4900_s26 + $0x48] sm:$0xff]  }
 0x125   : > { %v3955_v25 = vcombine.low %v1665_v19, %v1675_v33  ;;  %v2183_v35 = vsel %vm4910_vm2, %v2181_v27, %v2182_v21  ;;  %v3430_v36 = vld [vmem:[#allocation2 + $0x40] sm:$0xff]  ;;  %1501 = vst.msk [vmem:[#allocation2 + $0x48] sm:$0xff] %vm1491_vm9, %v1462_v34  ;;  %v2894_v41 = vrot.slane %v2892_v31, 4  ;;  %v2911_v43 = vshll.u32 %v4133_v22, 16  ;;  %v4173_v16 = vld [vmem:[%s4900_s26 + $0x50] sm:$0x1] }
 0x126   : > { %v4035_v40 = vcombine.low %v2180_v26, %v2183_v35  ;;  %4268 = vmatprep.subr.msk.bf16.mxu0 %vm3444_vm15, %v3430_v36  ;;  %v2897_v42 = vrot.slane %v2895_v32, 5  ;;  %v2903_v45 = vrot.slane %v2901_v37, 5  ;;  %v2907_v46 = vrot.slane %v2905_v38, 4  ;;  %v3422_v50 = vld [vmem:[#allocation2] sm:$0xff]  ;;  %v494_v17 = vld [vmem:[%s4900_s26 + $0x9c] sm:$0xf] }
 0x127   : > { %1996 = vrot.lane.b32.xlu0 %v3955_v25, %s4675_s25  ;;  %v2700_v48 = vshrl.u32 %v4107_v23, 16  ;;  %v2703_v49 = vshll.u32 %v4107_v23, 16  ;;  %v1446_v52 = vpop.permute.xlu0 %1445  ;;  %v2913_v57 = vrot.slane %v2911_v43, 5  ;;  %v2709_v58 = vshll.u32 %v4108_v29, 16  ;;  %v2007_v62 = vpop.permute.xlu1 %2006  ;;  %v496_v33 = vld [vmem:[%s4900_s26 + $0xa4] sm:$0x1] }
 0x128   : > { %2333 = vrot.lane.b32.xlu1 %v4043_v30, %s4672_s6  ;;  %v2898_v56 = vor.u32 %v2897_v42, %v2894_v41  ;;  %v2713_v60 = vshrl.u32 %v4108_v29, 16  ;;  %1493 = vst.msk [vmem:[#allocation2 + $0x8] sm:$0xff] %vm1491_vm9, %v1446_v52  ;;  %v2908_v63 = vor.u32 %v2907_v46, %v2903_v45  ;;  %v2719_v4 = vshll.u32 %v4109_v39, 16  ;;  %v470_v30 = vld [vmem:[%s4900_s26 + $0x3c] sm:$0xf] }
 0x129   : > { %v2702_v1 = vrot.slane %v2700_v48, 4  ;;  %v2705_v2 = vrot.slane %v2703_v49, 5  ;;  %2046 = vst.msk [vmem:[#allocation2 + $0x48] sm:$0xff] %vm2036_vm10, %v2007_v62  ;;  %v2711_v6 = vrot.slane %v2709_v58, 5  ;;  %v3449_v47 = vsel %vm3444_vm15, %v3422_v50, 0  ;;  %v4426_v48 = vld [vmem:[%s4900_s26 + $0x9c] sm:$0xff]  }
 0x12a   : > { %v2899_v5 = vrot.slane %v2898_v56, 4  ;;  %v2715_v7 = vrot.slane %v2713_v60, 4  ;;  %v2909_v59 = vrot.slane %v2908_v63, 4  ;;  %v2721_v10 = vrot.slane %v2719_v4, 5  ;;  %4251 = vmatpush3.bf16.xpose.msra.mxu0 %v3449_v47  ;;  %v471_v35 = vld [vmem:[%s4900_s26 + $0x40] sm:$0xf] }
 0x12b   : > { %2317 = vrot.lane.b32.xlu0 %v4035_v40, %s4672_s6  ;;  %v2706_v9 = vor.u32 %v2705_v2, %v2702_v1  ;;  %v4219_v3 = vrot.slane %v4195_v44, 9  ;;  %v1991_v11 = vpop.permute.xlu0 %1990  ;;  %v3282_v14 = vrot.slane %v4196_v54, 5  ;;  %v3285_v15 = vrot.slane %v4197_v61, 5  ;;  %v2328_v19 = vpop.permute.xlu1 %2327  ;;  %v472_v41 = vld [vmem:[%s4900_s26 + $0x44] sm:$0x1]  ;;  %452 = vst.msk [vmem:[#allocation2 + $0x68] sm:$0xff] %vm438_vm6, %v4426_v48 }
 0x12c   : > { %2514 = vrot.lane.b32.xlu1 %v4406_v55, %s4676_s13  ;;  %v2904_v12 = vsel %vm4951_vm5, %v2899_v5, %v2903_v45  ;;  %v2716_v13 = vor.u32 %v2715_v7, %v2711_v6  ;;  %2038 = vst.msk [vmem:[#allocation2 + $0x8] sm:$0xff] %vm2036_vm10, %v1991_v11  ;;  %v2914_v20 = vsel %vm4951_vm5, %v2909_v59, %v2913_v57  ;;  %v4211_v22 = vrot.slane %v4171_v18, 9  ;;  %v1042_v55 = vld [vmem:[%s4900_s26 + $0x9c] sm:$0xe]  ;;  %v1043_v56 = vld [vmem:[%s4900_s26 + $0xa0] sm:$0xf] }
 0x12d   : > { %v2707_v21 = vrot.slane %v2706_v9, 4  ;;  %v3226_v23 = vrot.slane %v4172_v51, 5  ;;  %2367 = vst.msk [vmem:[#allocation2 + $0x48] sm:$0xff] %vm2357_vm11, %v2328_v19  ;;  %v4155_v26 = vcombine.low %v2904_v12, %v2914_v20  ;;  %v3283_v28 = vsel %vm4910_vm2, %v4219_v3, %v3282_v14  ;;  %v4427_v57 = vld [vmem:[%s4900_s26 + $0x3c] sm:$0xff]   ;;  %v1044_v5 = vld [vmem:[%s4900_s26 + $0xa4] sm:$0x1] }
 0x12e   : > { %v2717_v27 = vrot.slane %v2716_v13, 4  ;;  %v3284_v29 = vrot.slane %v3282_v14, 4  ;;  %v3229_v25 = vrot.slane %v4173_v16, 5  ;;  %v819_v39 = vshrl.u32 %v494_v17, 16  ;;  %444 = vst.msk [vmem:[#allocation2 + $0x28] sm:$0xff] %vm438_vm6, %v4427_v57 }
 0x12f   : > { %2498 = vrot.lane.b32.xlu0 %v4407_v8, %s4676_s13  ;;  %v2712_v31 = vsel %vm4951_vm5, %v2707_v21, %v2711_v6  ;;  %v3227_v32 = vsel %vm4910_vm2, %v4211_v22, %v3226_v23  ;;  %v3228_v34 = vrot.slane %v3226_v23, 4  ;;  %v2312_v36 = vpop.permute.xlu0 %2311  ;;  %v822_v40 = vshll.u32 %v494_v17, 16  ;;  %v2509_v42 = vpop.permute.xlu1 %2508  ;;  %v1018_v59 = vld [vmem:[%s4900_s26 + $0x3c] sm:$0xe]  ;;  %v1019_v12 = vld [vmem:[%s4900_s26 + $0x40] sm:$0xf] }
 0x130   : > { %3059 = vrot.lane.b32.xlu1 %v4155_v26, %s4677_s15  ;;  %v2722_v37 = vsel %vm4951_vm5, %v2717_v27, %v2721_v10  ;;  %v3286_v38 = vsel %vm4910_vm2, %v3284_v29, %v3285_v15  ;;  %2359 = vst.msk [vmem:[#allocation2 + $0x8] sm:$0xff] %vm2357_vm11, %v2312_v36  ;;  %v828_v46 = vshll.u32 %v495_v24, 16  ;;  %v821_v50 = vrot.slane %v819_v39, 4  ;;  %v1020_v17 = vld [vmem:[%s4900_s26 + $0x44] sm:$0x1] }
 0x131   : > { %v4147_v43 = vcombine.low %v2712_v31, %v2722_v37  ;;  %v4235_v44 = vcombine.low %v3283_v28, %v3286_v38  ;;  %v3230_v45 = vsel %vm4910_vm2, %v3228_v34, %v3229_v25  ;;  %2548 = vst.msk [vmem:[#allocation2 + $0x48] sm:$0xff] %vm2538_vm12, %v2509_v42  ;;  %v824_v52 = vrot.slane %v822_v40, 5  ;;  %v3943_v25 = vld [vmem:[%s4900_s26 + $0xac] sm:$0xf]  ;;  %v3944_v38 = vld [vmem:[%s4900_s26 + $0xb0] sm:$0x1] }
 0x132   : > { %v4227_v49 = vcombine.low %v3227_v32, %v3230_v45  ;;  %v832_v54 = vshrl.u32 %v495_v24, 16  ;;  %v830_v58 = vrot.slane %v828_v46, 5  ;;  %v838_v60 = vshll.u32 %v496_v33, 16  ;;  %v3942_v24 = vld [vmem:[%s4900_s26 + $0xa8] sm:$0xf] }
 0x133   : > { %3043 = vrot.lane.b32.xlu0 %v4147_v43, %s4677_s15  ;;  %v627_v61 = vshrl.u32 %v470_v30, 16  ;;  %v630_v62 = vshll.u32 %v470_v30, 16  ;;  %v2493_v63 = vpop.permute.xlu0 %2492  ;;  %v825_v1 = vor.u32 %v824_v52, %v821_v50  ;;  %v636_v4 = vshll.u32 %v471_v35, 16  ;;  %v3054_v6 = vpop.permute.xlu1 %3053  ;;  %v3918_v40 = vld [vmem:[%s4900_s26 + $0x48] sm:$0xf] }
 0x134   : > { %3380 = vrot.lane.b32.xlu1 %v4235_v44, %s4678_s8  ;;  %v834_v2 = vrot.slane %v832_v54, 4  ;;  %v640_v18 = vshrl.u32 %v471_v35, 16  ;;  %2540 = vst.msk [vmem:[#allocation2 + $0x8] sm:$0xff] %vm2538_vm12, %v2493_v63  ;;  %v840_v7 = vrot.slane %v838_v60, 5  ;;  %v646_v8 = vshll.u32 %v472_v41, 16 }
 0x135   : > { %v629_v47 = vrot.slane %v627_v61, 4  ;;  %v632_v51 = vrot.slane %v630_v62, 5  ;;  %3093 = vst.msk [vmem:[#allocation2 + $0x48] sm:$0xff] %vm3083_vm13, %v3054_v6  ;;  %v826_v9 = vrot.slane %v825_v1, 4  ;;  %v638_v3 = vrot.slane %v636_v4, 5 }
 0x136   : > { %v835_v10 = vor.u32 %v834_v2, %v830_v58  ;;  %v642_v11 = vrot.slane %v640_v18, 4  ;;  %v648_v14 = vrot.slane %v646_v8, 5  ;;  %v3836_v15 = vrot.slane %v1042_v55, 9  ;;  %v3919_v46 = vld [vmem:[%s4900_s26 + $0x4c] sm:$0xf] }
 0x137   : > { %3364 = vrot.lane.b32.xlu0 %v4227_v49, %s4678_s8  ;;  %v633_v13 = vor.u32 %v632_v51, %v629_v47  ;;  %v1195_v16 = vrot.slane %v1043_v56, 5  ;;  %v3038_v19 = vpop.permute.xlu0 %3037  ;;  %v831_v20 = vsel %vm4951_vm5, %v826_v9, %v830_v58  ;;  %v1198_v23 = vrot.slane %v1044_v5, 5  ;;  %v3375_v26 = vpop.permute.xlu1 %3374  ;;  %v3920_v48 = vld [vmem:[%s4900_s26 + $0x50] sm:$0x1]  ;;  %v4006_v55 = vld [vmem:[%s4900_s26 + $0xa8] sm:$0xe] }
 0x138   : > { %v836_v21 = vrot.slane %v835_v10, 4  ;;  %v643_v22 = vor.u32 %v642_v11, %v638_v3  ;;  %3085 = vst.msk [vmem:[#allocation2 + $0x8] sm:$0xff] %vm3083_vm13, %v3038_v19  ;;  %v3828_v33 = vrot.slane %v1018_v59, 9  ;;  %v1139_v32 = vrot.slane %v1019_v12, 5  ;;  %v4007_v61 = vld [vmem:[%s4900_s26 + $0xac] sm:$0xf] }
 0x139   : > { %v634_v27 = vrot.slane %v633_v13, 4  ;;  %v1196_v28 = vsel %vm4910_vm2, %v3836_v15, %v1195_v16  ;;  %v1197_v29 = vrot.slane %v1195_v16, 4  ;;  %3414 = vst.msk [vmem:[#allocation2 + $0x48] sm:$0xff] %vm3404_vm14, %v3375_v26  ;;  %v1142_v34 = vrot.slane %v1020_v17, 5  ;;  %v4008_v4 = vld [vmem:[%s4900_s26 + $0xb0] sm:$0x1] }
 0x13a   : > { %v841_v30 = vsel %vm4951_vm5, %v836_v21, %v840_v7  ;;  %v644_v31 = vrot.slane %v643_v22, 4  ;;  %v1869_v39 = vshrl.u32 %v3942_v24, 16  ;;  %v1140_v44 = vsel %vm4910_vm2, %v3828_v33, %v1139_v32  ;;  %v4408_v8 = vld [vmem:[%s4900_s26 + $0xa8] sm:$0xff]  }
 0x13b   : > { %v3820_v35 = vcombine.low %v831_v20, %v841_v30  ;;  %v639_v36 = vsel %vm4951_vm5, %v634_v27, %v638_v3  ;;  %v1199_v37 = vsel %vm4910_vm2, %v1197_v29, %v1198_v23  ;;  %v3359_v41 = vpop.permute.xlu0 %3358  ;;  %v1141_v45 = vrot.slane %v1139_v32, 4  ;;  %v3982_v11 = vld [vmem:[%s4900_s26 + $0x48] sm:$0xe]  ;;  %v3983_v16 = vld [vmem:[%s4900_s26 + $0x4c] sm:$0xf] }
 0x13c   : > { %v649_v42 = vsel %vm4951_vm5, %v644_v31, %v648_v14  ;;  %v3852_v43 = vcombine.low %v1196_v28, %v1199_v37  ;;  %3406 = vst.msk [vmem:[#allocation2 + $0x8] sm:$0xff] %vm3404_vm14, %v3359_v41  ;;  %v1871_v50 = vrot.slane %v1869_v39, 4  ;;  %v1872_v52 = vshll.u32 %v3942_v24, 16  ;;  %v4409_v17 = vld [vmem:[%s4900_s26 + $0x48] sm:$0xff]   ;;  %v3984_v23 = vld [vmem:[%s4900_s26 + $0x50] sm:$0x1] }
 0x13d   : > { %964 = vrot.lane.b32.xlu1 %v3820_v35, %s4674_s7  ;;  %v3812_v49 = vcombine.low %v639_v36, %v649_v42  ;;  %v1878_v54 = vshll.u32 %v3943_v25, 16  ;;  %v1143_v56 = vsel %vm4910_vm2, %v1141_v45, %v1142_v34  ;;  %v1882_v57 = vshrl.u32 %v3943_v25, 16  ;;  %v4134_v25 = vld [vmem:[%s4900_s26 + $0xb4] sm:$0xf]  ;;  %v4135_v39 = vld [vmem:[%s4900_s26 + $0xb8] sm:$0xf] }
 0x13e   : > { %v1888_v58 = vshll.u32 %v3944_v38, 16  ;;  %v1677_v60 = vshrl.u32 %v3918_v40, 16  ;;  %v3844_v62 = vcombine.low %v1140_v44, %v1143_v56  ;;  %v1874_v63 = vrot.slane %v1872_v52, 5 }
 0x13f   : > { %948 = vrot.lane.b32.xlu0 %v3812_v49, %s4674_s7  ;;  %v1880_v1 = vrot.slane %v1878_v54, 5  ;;  %v1680_v2 = vshll.u32 %v3918_v40, 16  ;;  %v1884_v18 = vrot.slane %v1882_v57, 4  ;;  %v1686_v7 = vshll.u32 %v3919_v46, 16  ;;  %v959_v47 = vpop.permute.xlu1 %958  ;;  %v4136_v40 = vld [vmem:[%s4900_s26 + $0xbc] sm:$0x1] }
 0x140   : > { %v1890_v5 = vrot.slane %v1888_v58, 5  ;;  %v1679_v6 = vrot.slane %v1677_v60, 4  ;;  %v3431_v51 = vld [vmem:[#allocation2 + $0x48] sm:$0xff]  ;;  %v1875_v59 = vor.u32 %v1874_v63, %v1871_v50  ;;  %v1690_v10 = vshrl.u32 %v3919_v46, 16  ;;  %997 = vst.msk [vmem:[#allocation2 + $0x50] sm:$0xff] %vm986_vm7, %v959_v47 }
 0x141   : > { %1288 = vrot.lane.b32.xlu1 %v3852_v43, %s4673_s9  ;;  %v1682_v9 = vrot.slane %v1680_v2, 5  ;;  %v1696_v3 = vshll.u32 %v3920_v48, 16  ;;  %4269 = vmatprep.subr.msk.bf16.mxu0 %vm3444_vm15, %v3431_v51  ;;  %v1885_v12 = vor.u32 %v1884_v18, %v1880_v1  ;;  %v1688_v13 = vrot.slane %v1686_v7, 5  ;;  %v4110_v46 = vld [vmem:[%s4900_s26 + $0x54] sm:$0xf] }
 0x142   : > { %v4028_v14 = vrot.slane %v4006_v55, 9  ;;  %v2242_v15 = vrot.slane %v4007_v61, 5  ;;  %v1876_v19 = vrot.slane %v1875_v59, 4  ;;  %v1692_v21 = vrot.slane %v1690_v10, 4  ;;  %v4111_v48 = vld [vmem:[%s4900_s26 + $0x58] sm:$0xf] }
 0x143   : > { %1272 = vrot.lane.b32.xlu0 %v3844_v62, %s4673_s9  ;;  %v1683_v20 = vor.u32 %v1682_v9, %v1679_v6  ;;  %v1698_v22 = vrot.slane %v1696_v3, 5  ;;  %v943_v24 = vpop.permute.xlu0 %942  ;;  %v1886_v26 = vrot.slane %v1885_v12, 4  ;;  %v2245_v29 = vrot.slane %v4008_v4, 5  ;;  %v1283_v33 = vpop.permute.xlu1 %1282  ;;  %v4112_v55 = vld [vmem:[%s4900_s26 + $0x5c] sm:$0x1]  ;;  %v3423_v4 = vld [vmem:[#allocation2 + $0x8] sm:$0xff] }
 0x144   : > { %v2243_v27 = vsel %vm4910_vm2, %v4028_v14, %v2242_v15  ;;  %v2244_v28 = vrot.slane %v2242_v15, 4  ;;  %989 = vst.msk [vmem:[#allocation2 + $0x10] sm:$0xff] %vm986_vm7, %v943_v24  ;;  %v1881_v30 = vsel %vm4951_vm5, %v1876_v19, %v1880_v1  ;;  %v1693_v32 = vor.u32 %v1692_v21, %v1688_v13  ;;  %v4198_v18 = vld [vmem:[%s4900_s26 + $0xb4] sm:$0xe]  ;;  %v4175_v24 = vld [vmem:[%s4900_s26 + $0x58] sm:$0xf] }
 0x145   : > { %1469 = vrot.lane.b32.xlu1 %v4408_v8, %s4671_s28  ;;  %v1684_v31 = vrot.slane %v1683_v20, 4  ;;  %v4020_v34 = vrot.slane %v3982_v11, 9  ;;  %1321 = vst.msk [vmem:[#allocation2 + $0x50] sm:$0xff] %vm1310_vm8, %v1283_v33  ;;  %v1891_v35 = vsel %vm4951_vm5, %v1886_v26, %v1890_v5  ;;  %v2186_v37 = vrot.slane %v3983_v16, 5  ;;  %v4199_v8 = vld [vmem:[%s4900_s26 + $0xb8] sm:$0xf] }
 0x146   : > { %v2246_v36 = vsel %vm4910_vm2, %v2244_v28, %v2245_v29  ;;  %v2189_v38 = vrot.slane %v3984_v23, 5  ;;  %v3964_v41 = vcombine.low %v1881_v30, %v1891_v35  ;;  %v1694_v43 = vrot.slane %v1693_v32, 4  ;;  %v4200_v11 = vld [vmem:[%s4900_s26 + $0xbc] sm:$0x1]  ;;  %v4174_v19 = vld [vmem:[%s4900_s26 + $0x54] sm:$0xe] }
 0x147   : > { %1453 = vrot.lane.b32.xlu0 %v4409_v17, %s4671_s28  ;;  %v1689_v42 = vsel %vm4951_vm5, %v1684_v31, %v1688_v13  ;;  %v4044_v44 = vcombine.low %v2243_v27, %v2246_v36  ;;  %v1267_v45 = vpop.permute.xlu0 %1266  ;;  %v2187_v49 = vsel %vm4910_vm2, %v4020_v34, %v2186_v37  ;;  %v2188_v50 = vrot.slane %v2186_v37, 4  ;;  %v1464_v56 = vpop.permute.xlu1 %1463  ;;  %v4412_v13 = vld [vmem:[%s4900_s26 + $0xb4] sm:$0xff]   ;;  %v4176_v35 = vld [vmem:[%s4900_s26 + $0x5c] sm:$0x1] }
 0x148   : > { %1313 = vst.msk [vmem:[#allocation2 + $0x10] sm:$0xff] %vm1310_vm8, %v1267_v45  ;;  %v2916_v52 = vshrl.u32 %v4134_v25, 16  ;;  %v2919_v54 = vshll.u32 %v4134_v25, 16  ;;  %v1699_v57 = vsel %vm4951_vm5, %v1694_v43, %v1698_v22  ;;  %v2925_v58 = vshll.u32 %v4135_v39, 16  ;;  %v4413_v30 = vld [vmem:[%s4900_s26 + $0x54] sm:$0xff]  }
 0x149   : > { %2014 = vrot.lane.b32.xlu1 %v3964_v41, %s4675_s25  ;;  %v2929_v60 = vshrl.u32 %v4135_v39, 16  ;;  %v2935_v61 = vshll.u32 %v4136_v40, 16  ;;  %1502 = vst.msk [vmem:[#allocation2 + $0x50] sm:$0xff] %vm1491_vm9, %v1464_v56  ;;  %v3956_v62 = vcombine.low %v1689_v42, %v1699_v57  ;;  %v2190_v63 = vsel %vm4910_vm2, %v2188_v50, %v2189_v38  ;;  %v497_v41 = vld [vmem:[%s4900_s26 + $0xa8] sm:$0xf] }
 0x14a   : > { %v2918_v1 = vrot.slane %v2916_v52, 4  ;;  %v2921_v2 = vrot.slane %v2919_v54, 5  ;;  %v4036_v5 = vcombine.low %v2187_v49, %v2190_v63  ;;  %v2927_v6 = vrot.slane %v2925_v58, 5  ;;  %v498_v42 = vld [vmem:[%s4900_s26 + $0xac] sm:$0xf] }
 0x14b   : > { %v2931_v7 = vrot.slane %v2929_v60, 4  ;;  %v2937_v47 = vrot.slane %v2935_v61, 5  ;;  %v1448_v51 = vpop.permute.xlu0 %1447  ;;  %1998 = vrot.lane.b32.xlu0 %v3956_v62, %s4675_s25  ;;  %v2724_v9 = vshrl.u32 %v4110_v46, 16  ;;  %v2727_v10 = vshll.u32 %v4110_v46, 16  ;;  %v2009_v12 = vpop.permute.xlu1 %2008  ;;  %v473_v49 = vld [vmem:[%s4900_s26 + $0x48] sm:$0xf] }
 0x14c   : > { %v2922_v59 = vor.u32 %v2921_v2, %v2918_v1  ;;  %v2733_v3 = vshll.u32 %v4111_v48, 16  ;;  %1494 = vst.msk [vmem:[#allocation2 + $0x10] sm:$0xff] %vm1491_vm9, %v1448_v51  ;;  %v2737_v15 = vshrl.u32 %v4111_v48, 16  ;;  %v2743_v16 = vshll.u32 %v4112_v55, 16  ;;  %v499_v48 = vld [vmem:[%s4900_s26 + $0xb0] sm:$0x1] }
 0x14d   : > { %2335 = vrot.lane.b32.xlu1 %v4044_v44, %s4672_s6  ;;  %v2932_v14 = vor.u32 %v2931_v7, %v2927_v6  ;;  %v3452_v17 = vsel %vm3444_vm15, %v3423_v4, 0  ;;  %2047 = vst.msk [vmem:[#allocation2 + $0x50] sm:$0xff] %vm2036_vm10, %v2009_v12  ;;  %v2726_v21 = vrot.slane %v2724_v9, 4  ;;  %v2729_v22 = vrot.slane %v2727_v10, 5  ;;  %v474_v56 = vld [vmem:[%s4900_s26 + $0x4c] sm:$0xf] }
 0x14e   : > { %v2923_v20 = vrot.slane %v2922_v59, 4  ;;  %v2735_v23 = vrot.slane %v2733_v3, 5  ;;  %4253 = vmatpush3.bf16.xpose.msra.mxu0 %v3452_v17  ;;  %v2739_v27 = vrot.slane %v2737_v15, 4  ;;  %v2745_v28 = vrot.slane %v2743_v16, 5  ;;  %v475_v63 = vld [vmem:[%s4900_s26 + $0x50] sm:$0x1] }
 0x14f   : > { %v2933_v26 = vrot.slane %v2932_v14, 4  ;;  %v4220_v29 = vrot.slane %v4198_v18, 9  ;;  %v1993_v33 = vpop.permute.xlu0 %1992  ;;  %2319 = vrot.lane.b32.xlu0 %v4036_v5, %s4672_s6  ;;  %v2730_v32 = vor.u32 %v2729_v22, %v2726_v21  ;;  %v3289_v34 = vrot.slane %v4199_v8, 5  ;;  %v2330_v36 = vpop.permute.xlu1 %2329  ;;  %v1045_v59 = vld [vmem:[%s4900_s26 + $0xa8] sm:$0xe] }
 0x150   : > { %v2928_v31 = vsel %vm4951_vm5, %v2923_v20, %v2927_v6  ;;  %v3292_v25 = vrot.slane %v4200_v11, 5  ;;  %2039 = vst.msk [vmem:[#allocation2 + $0x10] sm:$0xff] %vm2036_vm10, %v1993_v33  ;;  %v2740_v38 = vor.u32 %v2739_v27, %v2735_v23  ;;  %v4212_v39 = vrot.slane %v4174_v19, 9  ;;  %v4428_v6 = vld [vmem:[%s4900_s26 + $0xa8] sm:$0xff]   ;;  %v1047_v19 = vld [vmem:[%s4900_s26 + $0xb0] sm:$0x1] }
 0x151   : > { %2516 = vrot.lane.b32.xlu1 %v4412_v13, %s4676_s13  ;;  %v2938_v37 = vsel %vm4951_vm5, %v2933_v26, %v2937_v47  ;;  %v3233_v40 = vrot.slane %v4175_v24, 5  ;;  %2368 = vst.msk [vmem:[#allocation2 + $0x50] sm:$0xff] %vm2357_vm11, %v2330_v36  ;;  %v2731_v44 = vrot.slane %v2730_v32, 4  ;;  %v3290_v45 = vsel %vm4910_vm2, %v4220_v29, %v3289_v34  ;;  %v1046_v9 = vld [vmem:[%s4900_s26 + $0xac] sm:$0xf] }
 0x152   : > { %v4156_v43 = vcombine.low %v2928_v31, %v2938_v37  ;;  %v3291_v46 = vrot.slane %v3289_v34, 4  ;;  %v2741_v50 = vrot.slane %v2740_v38, 4  ;;  %v3236_v55 = vrot.slane %v4176_v35, 5  ;;  %453 = vst.msk [vmem:[#allocation2 + $0x70] sm:$0xff] %vm438_vm6, %v4428_v6  ;;  %v4429_v21 = vld [vmem:[%s4900_s26 + $0x48] sm:$0xff]  }
 0x153   : > { %v3234_v52 = vsel %vm4910_vm2, %v4212_v39, %v3233_v40  ;;  %v3235_v54 = vrot.slane %v3233_v40, 4  ;;  %v2314_v57 = vpop.permute.xlu0 %2313  ;;  %2500 = vrot.lane.b32.xlu0 %v4413_v30, %s4676_s13  ;;  %v2736_v58 = vsel %vm4951_vm5, %v2731_v44, %v2735_v23  ;;  %v843_v61 = vshrl.u32 %v497_v41, 16  ;;  %v2511_v1 = vpop.permute.xlu1 %2510  ;;  %v1021_v27 = vld [vmem:[%s4900_s26 + $0x48] sm:$0xe]  ;;  %v1022_v31 = vld [vmem:[%s4900_s26 + $0x4c] sm:$0xf] }
 0x154   : > { %v3293_v60 = vsel %vm4910_vm2, %v3291_v46, %v3292_v25  ;;  %v846_v62 = vshll.u32 %v497_v41, 16  ;;  %2360 = vst.msk [vmem:[#allocation2 + $0x10] sm:$0xff] %vm2357_vm11, %v2314_v57  ;;  %v2746_v2 = vsel %vm4951_vm5, %v2741_v50, %v2745_v28  ;;  %v852_v5 = vshll.u32 %v498_v42, 16  ;;  %v1023_v36 = vld [vmem:[%s4900_s26 + $0x50] sm:$0x1] }
 0x155   : > { %3061 = vrot.lane.b32.xlu1 %v4156_v43, %s4677_s15  ;;  %v4236_v4 = vcombine.low %v3290_v45, %v3293_v60  ;;  %v3237_v18 = vsel %vm4910_vm2, %v3235_v54, %v3236_v55  ;;  %2549 = vst.msk [vmem:[#allocation2 + $0x50] sm:$0xff] %vm2538_vm12, %v2511_v1  ;;  %v4148_v7 = vcombine.low %v2736_v58, %v2746_v2  ;;  %v845_v51 = vrot.slane %v843_v61, 4  ;;  %v3946_v57 = vld [vmem:[%s4900_s26 + $0xb8] sm:$0xf]  ;;  %v3947_v58 = vld [vmem:[%s4900_s26 + $0xbc] sm:$0x1] }
 0x156   : > { %v4228_v47 = vcombine.low %v3234_v52, %v3237_v18  ;;  %v848_v8 = vrot.slane %v846_v62, 5  ;;  %v854_v10 = vrot.slane %v852_v5, 5  ;;  %v856_v3 = vshrl.u32 %v498_v42, 16  ;;  %445 = vst.msk [vmem:[#allocation2 + $0x30] sm:$0xff] %vm438_vm6, %v4429_v21  ;;  %v3945_v42 = vld [vmem:[%s4900_s26 + $0xb4] sm:$0xf] }
 0x157   : > { %v862_v11 = vshll.u32 %v499_v48, 16  ;;  %v651_v12 = vshrl.u32 %v473_v49, 16  ;;  %v2495_v13 = vpop.permute.xlu0 %2494  ;;  %3045 = vrot.lane.b32.xlu0 %v4148_v7, %s4677_s15  ;;  %v654_v15 = vshll.u32 %v473_v49, 16  ;;  %v660_v16 = vshll.u32 %v474_v56, 16  ;;  %v3056_v20 = vpop.permute.xlu1 %3055  ;;  %v3921_v18 = vld [vmem:[%s4900_s26 + $0x54] sm:$0xf] }
 0x158   : > { %v849_v14 = vor.u32 %v848_v8, %v845_v51  ;;  %v664_v17 = vshrl.u32 %v474_v56, 16  ;;  %2541 = vst.msk [vmem:[#allocation2 + $0x10] sm:$0xff] %vm2538_vm12, %v2495_v13  ;;  %v858_v22 = vrot.slane %v856_v3, 4  ;;  %v670_v26 = vshll.u32 %v475_v63, 16  ;;  %v3922_v5 = vld [vmem:[%s4900_s26 + $0x58] sm:$0xf] }
 0x159   : > { %3382 = vrot.lane.b32.xlu1 %v4236_v4, %s4678_s8  ;;  %v864_v23 = vrot.slane %v862_v11, 5  ;;  %v653_v24 = vrot.slane %v651_v12, 4  ;;  %3094 = vst.msk [vmem:[#allocation2 + $0x50] sm:$0xff] %vm3083_vm13, %v3056_v20  ;;  %v656_v29 = vrot.slane %v654_v15, 5  ;;  %v662_v33 = vrot.slane %v660_v16, 5 }
 0x15a   : > { %v850_v28 = vrot.slane %v849_v14, 4  ;;  %v666_v30 = vrot.slane %v664_v17, 4  ;;  %v859_v32 = vor.u32 %v858_v22, %v854_v10  ;;  %v672_v34 = vrot.slane %v670_v26, 5  ;;  %v3923_v8 = vld [vmem:[%s4900_s26 + $0x5c] sm:$0x1] }
 0x15b   : > { %v3837_v25 = vrot.slane %v1045_v59, 9  ;;  %v1202_v35 = vrot.slane %v1046_v9, 5  ;;  %v3040_v37 = vpop.permute.xlu0 %3039  ;;  %3366 = vrot.lane.b32.xlu0 %v4228_v47, %s4678_s8  ;;  %v657_v39 = vor.u32 %v656_v29, %v653_v24  ;;  %v1205_v41 = vrot.slane %v1047_v19, 5  ;;  %v3377_v43 = vpop.permute.xlu1 %3376  ;;  %v4009_v11 = vld [vmem:[%s4900_s26 + $0xb4] sm:$0xe] }
 0x15c   : > { %v855_v38 = vsel %vm4951_vm5, %v850_v28, %v854_v10  ;;  %v667_v40 = vor.u32 %v666_v30, %v662_v33  ;;  %3086 = vst.msk [vmem:[#allocation2 + $0x10] sm:$0xff] %vm3083_vm13, %v3040_v37  ;;  %v860_v44 = vrot.slane %v859_v32, 4  ;;  %v3829_v48 = vrot.slane %v1021_v27, 9  ;;  %v4010_v12 = vld [vmem:[%s4900_s26 + $0xb8] sm:$0xf] }
 0x15d   : > { %v1203_v45 = vsel %vm4910_vm2, %v3837_v25, %v1202_v35  ;;  %v1204_v46 = vrot.slane %v1202_v35, 4  ;;  %3415 = vst.msk [vmem:[#allocation2 + $0x50] sm:$0xff] %vm3404_vm14, %v3377_v43  ;;  %v658_v49 = vrot.slane %v657_v39, 4  ;;  %v1146_v52 = vrot.slane %v1022_v31, 5  ;;  %v4011_v17 = vld [vmem:[%s4900_s26 + $0xbc] sm:$0x1] }
 0x15e   : > { %v668_v50 = vrot.slane %v667_v40, 4  ;;  %v1149_v54 = vrot.slane %v1023_v36, 5  ;;  %v865_v55 = vsel %vm4951_vm5, %v860_v44, %v864_v23  ;;  %v1893_v60 = vshrl.u32 %v3945_v42, 16  ;;  %v3985_v23 = vld [vmem:[%s4900_s26 + $0x54] sm:$0xe] }
 0x15f   : > { %v1206_v56 = vsel %vm4910_vm2, %v1204_v46, %v1205_v41  ;;  %v1896_v61 = vshll.u32 %v3945_v42, 16  ;;  %v3361_v62 = vpop.permute.xlu0 %3360  ;;  %v3821_v63 = vcombine.low %v855_v38, %v865_v55  ;;  %v663_v1 = vsel %vm4951_vm5, %v658_v49, %v662_v33  ;;  %v3986_v30 = vld [vmem:[%s4900_s26 + $0x58] sm:$0xf]  ;;  %v3987_v36 = vld [vmem:[%s4900_s26 + $0x5c] sm:$0x1] }
 0x160   : > { %v673_v2 = vsel %vm4951_vm5, %v668_v50, %v672_v34  ;;  %v3853_v4 = vcombine.low %v1203_v45, %v1206_v56  ;;  %3407 = vst.msk [vmem:[#allocation2 + $0x10] sm:$0xff] %vm3404_vm14, %v3361_v62  ;;  %v1147_v7 = vsel %vm4910_vm2, %v3829_v48, %v1146_v52  ;;  %v1148_v47 = vrot.slane %v1146_v52, 4  ;;  %v4414_v31 = vld [vmem:[%s4900_s26 + $0xb4] sm:$0xff]   ;;  %v4137_v43 = vld [vmem:[%s4900_s26 + $0xc0] sm:$0xf] }
 0x161   : > { %v3813_v6 = vcombine.low %v663_v1, %v673_v2  ;;  %v1895_v51 = vrot.slane %v1893_v60, 4  ;;  %966 = vrot.lane.b32.xlu1 %v3821_v63, %s4674_s7  ;;  %v1898_v59 = vrot.slane %v1896_v61, 5  ;;  %v1902_v9 = vshll.u32 %v3946_v57, 16  ;;  %v4415_v37 = vld [vmem:[%s4900_s26 + $0x54] sm:$0xff]   ;;  %v4138_v50 = vld [vmem:[%s4900_s26 + $0xc4] sm:$0xf] }
 0x162   : > { %v1906_v10 = vshrl.u32 %v3946_v57, 16  ;;  %v1912_v3 = vshll.u32 %v3947_v58, 16  ;;  %v1150_v13 = vsel %vm4910_vm2, %v1148_v47, %v1149_v54  ;;  %v1701_v14 = vshrl.u32 %v3921_v18, 16  ;;  %v4139_v57 = vld [vmem:[%s4900_s26 + $0xc8] sm:$0x1] }
 0x163   : > { %950 = vrot.lane.b32.xlu0 %v3813_v6, %s4674_s7  ;;  %v1704_v15 = vshll.u32 %v3921_v18, 16  ;;  %v1710_v16 = vshll.u32 %v3922_v5, 16  ;;  %v3845_v19 = vcombine.low %v1147_v7, %v1150_v13  ;;  %v1899_v20 = vor.u32 %v1898_v59, %v1895_v51  ;;  %v961_v24 = vpop.permute.xlu1 %960  ;;  %v4113_v63 = vld [vmem:[%s4900_s26 + $0x60] sm:$0xf] }
 0x164   : > { %v1904_v21 = vrot.slane %v1902_v9, 5  ;;  %v1908_v22 = vrot.slane %v1906_v10, 4  ;;  %v3432_v26 = vld [vmem:[#allocation2 + $0x50] sm:$0xff]  ;;  %v1914_v27 = vrot.slane %v1912_v3, 5  ;;  %v1703_v28 = vrot.slane %v1701_v14, 4  ;;  %998 = vst.msk [vmem:[#allocation2 + $0x58] sm:$0xff] %vm986_vm7, %v961_v24 }
 0x165   : > { %v1706_v29 = vrot.slane %v1704_v15, 5  ;;  %v5694_v33 = vrot.slane %v1710_v16, 5  ;;  %4270 = vmatprep.subr.msk.bf16.mxu0 %vm3444_vm15, %v3432_v26  ;;  %1290 = vrot.lane.b32.xlu1 %v3853_v4, %s4673_s9  ;;  %v1900_v32 = vrot.slane %v1899_v20, 4  ;;  %v1714_v25 = vshrl.u32 %v3922_v5, 16  ;;  %v4115_v15 = vld [vmem:[%s4900_s26 + $0x68] sm:$0x1] }
 0x166   : > { %v1909_v34 = vor.u32 %v1908_v22, %v1904_v21  ;;  %v1720_v35 = vshll.u32 %v3923_v8, 16  ;;  %v4029_v39 = vrot.slane %v4009_v11, 9  ;;  %v2249_v40 = vrot.slane %v4010_v12, 5  ;;  %v4114_v11 = vld [vmem:[%s4900_s26 + $0x64] sm:$0xf] }
 0x167   : > { %1274 = vrot.lane.b32.xlu0 %v3845_v19, %s4673_s9  ;;  %v1707_v38 = vor.u32 %v1706_v29, %v1703_v28  ;;  %v2252_v41 = vrot.slane %v4011_v17, 5  ;;  %v945_v42 = vpop.permute.xlu0 %944  ;;  %v1905_v44 = vsel %vm4951_vm5, %v1900_v32, %v1904_v21  ;;  %v1716_v46 = vrot.slane %v1714_v25, 4  ;;  %v1285_v49 = vpop.permute.xlu1 %1284  ;;  %v4201_v17 = vld [vmem:[%s4900_s26 + $0xc0] sm:$0xe]  ;;  %v4202_v26 = vld [vmem:[%s4900_s26 + $0xc4] sm:$0xf] }
 0x168   : > { %v1910_v45 = vrot.slane %v1909_v34, 4  ;;  %v1722_v48 = vrot.slane %v1720_v35, 5  ;;  %990 = vst.msk [vmem:[#allocation2 + $0x18] sm:$0xff] %vm986_vm7, %v945_v42  ;;  %v2250_v54 = vsel %vm4910_vm2, %v4029_v39, %v2249_v40  ;;  %v2251_v55 = vrot.slane %v2249_v40, 4  ;;  %v4178_v42 = vld [vmem:[%s4900_s26 + $0x64] sm:$0xf] }
 0x169   : > { %v1708_v52 = vrot.slane %v1707_v38, 4  ;;  %v4021_v56 = vrot.slane %v3985_v23, 9  ;;  %1322 = vst.msk [vmem:[#allocation2 + $0x58] sm:$0xff] %vm1310_vm8, %v1285_v49  ;;  %1471 = vrot.lane.b32.xlu1 %v4414_v31, %s4671_s28  ;;  %v1717_v60 = vor.u32 %v1716_v46, %v5694_v33  ;;  %v2193_v61 = vrot.slane %v3986_v30, 5  ;;  %v3424_v23 = vld [vmem:[#allocation2 + $0x10] sm:$0xff] }
 0x16a   : > { %v1915_v58 = vsel %vm4951_vm5, %v1910_v45, %v1914_v27  ;;  %v2196_v62 = vrot.slane %v3987_v36, 5  ;;  %v2253_v4 = vsel %vm4910_vm2, %v2251_v55, %v2252_v41  ;;  %v2940_v5 = vshrl.u32 %v4137_v43, 16  ;;  %v4203_v30 = vld [vmem:[%s4900_s26 + $0xc8] sm:$0x1]  ;;  %v4177_v36 = vld [vmem:[%s4900_s26 + $0x60] sm:$0xe] }
 0x16b   : > { %1455 = vrot.lane.b32.xlu0 %v4415_v37, %s4671_s28  ;;  %v3965_v1 = vcombine.low %v1905_v44, %v1915_v58  ;;  %v1713_v2 = vsel %vm4951_vm5, %v1708_v52, %v5694_v33  ;;  %v1269_v18 = vpop.permute.xlu0 %1268  ;;  %v1718_v6 = vrot.slane %v1717_v60, 4  ;;  %v4045_v7 = vcombine.low %v2250_v54, %v2253_v4  ;;  %v1466_v8 = vpop.permute.xlu1 %1465  ;;  %v4418_v37 = vld [vmem:[%s4900_s26 + $0xc0] sm:$0xff]  }
 0x16c   : > { %v2194_v47 = vsel %vm4910_vm2, %v4021_v56, %v2193_v61  ;;  %v2195_v51 = vrot.slane %v2193_v61, 4  ;;  %1314 = vst.msk [vmem:[#allocation2 + $0x18] sm:$0xff] %vm1310_vm8, %v1269_v18  ;;  %v2942_v59 = vrot.slane %v2940_v5, 4  ;;  %v2943_v9 = vshll.u32 %v4137_v43, 16 }
 0x16d   : > { %v2949_v10 = vshll.u32 %v4138_v50, 16  ;;  %v2953_v3 = vshrl.u32 %v4138_v50, 16  ;;  %1503 = vst.msk [vmem:[#allocation2 + $0x58] sm:$0xff] %vm1491_vm9, %v1466_v8  ;;  %2016 = vrot.lane.b32.xlu1 %v3965_v1, %s4675_s25  ;;  %v1723_v12 = vsel %vm4951_vm5, %v1718_v6, %v1722_v48  ;;  %v2959_v14 = vshll.u32 %v4139_v57, 16  ;;  %v4179_v48 = vld [vmem:[%s4900_s26 + $0x68] sm:$0x1] }
 0x16e   : > { %v2197_v13 = vsel %vm4910_vm2, %v2195_v51, %v2196_v62  ;;  %v2748_v16 = vshrl.u32 %v4113_v63, 16  ;;  %v3957_v19 = vcombine.low %v1713_v2, %v1723_v12  ;;  %v2945_v21 = vrot.slane %v2943_v9, 5  ;;  %v4419_v50 = vld [vmem:[%s4900_s26 + $0x60] sm:$0xff]   ;;  %v500_v57 = vld [vmem:[%s4900_s26 + $0xb4] sm:$0xf] }
 0x16f   : > { %v4037_v20 = vcombine.low %v2194_v47, %v2197_v13  ;;  %v2951_v22 = vrot.slane %v2949_v10, 5  ;;  %v1450_v24 = vpop.permute.xlu0 %1449  ;;  %v2955_v27 = vrot.slane %v2953_v3, 4  ;;  %v2961_v28 = vrot.slane %v2959_v14, 5  ;;  %v2011_v31 = vpop.permute.xlu1 %2010  ;;  %v501_v1 = vld [vmem:[%s4900_s26 + $0xb8] sm:$0xf] }
 0x170   : > { %v2750_v29 = vrot.slane %v2748_v16, 4  ;;  %v2751_v33 = vshll.u32 %v4113_v63, 16  ;;  %1495 = vst.msk [vmem:[#allocation2 + $0x18] sm:$0xff] %vm1491_vm9, %v1450_v24  ;;  %2000 = vrot.lane.b32.xlu0 %v3957_v19, %s4675_s25  ;;  %v2946_v32 = vor.u32 %v2945_v21, %v2942_v59  ;;  %v2757_v34 = vshll.u32 %v4114_v11, 16  ;;  %v502_v6 = vld [vmem:[%s4900_s26 + $0xbc] sm:$0x1] }
 0x171   : > { %v2761_v25 = vshrl.u32 %v4114_v11, 16  ;;  %v2767_v35 = vshll.u32 %v4115_v15, 16  ;;  %2048 = vst.msk [vmem:[#allocation2 + $0x58] sm:$0xff] %vm2036_vm10, %v2011_v31  ;;  %2337 = vrot.lane.b32.xlu1 %v4045_v7, %s4672_s6  ;;  %v2956_v38 = vor.u32 %v2955_v27, %v2951_v22  ;;  %v3455_v40 = vsel %vm3444_vm15, %v3424_v23, 0  ;;  %v476_v59 = vld [vmem:[%s4900_s26 + $0x54] sm:$0xf] }
 0x172   : > { %v2753_v39 = vrot.slane %v2751_v33, 5  ;;  %v4221_v41 = vrot.slane %v4201_v17, 9  ;;  %v2947_v43 = vrot.slane %v2946_v32, 4  ;;  %v2759_v44 = vrot.slane %v2757_v34, 5  ;;  %4255 = vmatpush3.bf16.xpose.msra.mxu0 %v3455_v40  ;;  %v477_v19 = vld [vmem:[%s4900_s26 + $0x58] sm:$0xf] }
 0x173   : > { %v2763_v45 = vrot.slane %v2761_v25, 4  ;;  %v2769_v46 = vrot.slane %v2767_v35, 5  ;;  %v1995_v49 = vpop.permute.xlu0 %1994  ;;  %v2957_v52 = vrot.slane %v2956_v38, 4  ;;  %v3296_v55 = vrot.slane %v4202_v26, 5  ;;  %v2332_v58 = vpop.permute.xlu1 %2331  ;;  %v478_v24 = vld [vmem:[%s4900_s26 + $0x5c] sm:$0x1] }
 0x174   : > { %v2754_v54 = vor.u32 %v2753_v39, %v2750_v29  ;;  %v3299_v56 = vrot.slane %v4203_v30, 5  ;;  %2040 = vst.msk [vmem:[#allocation2 + $0x18] sm:$0xff] %vm2036_vm10, %v1995_v49  ;;  %2321 = vrot.lane.b32.xlu0 %v4037_v20, %s4672_s6  ;;  %v2952_v60 = vsel %vm4951_vm5, %v2947_v43, %v2951_v22  ;;  %v4213_v62 = vrot.slane %v4177_v36, 9  ;;  %v1048_v26 = vld [vmem:[%s4900_s26 + $0xb4] sm:$0xe] }
 0x175   : > { %v2764_v61 = vor.u32 %v2763_v45, %v2759_v44  ;;  %v3240_v63 = vrot.slane %v4178_v42, 5  ;;  %2369 = vst.msk [vmem:[#allocation2 + $0x58] sm:$0xff] %vm2357_vm11, %v2332_v58  ;;  %2518 = vrot.lane.b32.xlu1 %v4418_v37, %s4676_s13  ;;  %v2962_v2 = vsel %vm4951_vm5, %v2957_v52, %v2961_v28  ;;  %v3297_v18 = vsel %vm4910_vm2, %v4221_v41, %v3296_v55  ;;  %v1049_v30 = vld [vmem:[%s4900_s26 + $0xb8] sm:$0xf]  ;;  %v1050_v37 = vld [vmem:[%s4900_s26 + $0xbc] sm:$0x1] }
 0x176   : > { %v2755_v4 = vrot.slane %v2754_v54, 4  ;;  %v3298_v5 = vrot.slane %v3296_v55, 4  ;;  %v4157_v7 = vcombine.low %v2952_v60, %v2962_v2  ;;  %v3243_v11 = vrot.slane %v4179_v48, 5  ;;  %v4430_v32 = vld [vmem:[%s4900_s26 + $0xb4] sm:$0xff]  }
 0x177   : > { %v2765_v47 = vrot.slane %v2764_v61, 4  ;;  %v5763_v51 = vsel %vm4910_vm2, %v4213_v62, %v3240_v63  ;;  %v3242_v8 = vrot.slane %v3240_v63, 4  ;;  %v2316_v9 = vpop.permute.xlu0 %2315  ;;  %v867_v12 = vshrl.u32 %v500_v57, 16  ;;  %v2513_v13 = vpop.permute.xlu1 %2512  ;;  %v1024_v43 = vld [vmem:[%s4900_s26 + $0x54] sm:$0xe]  ;;  %454 = vst.msk [vmem:[#allocation2 + $0x78] sm:$0xff] %vm438_vm6, %v4430_v32 }
 0x178   : > { %v2760_v10 = vsel %vm4951_vm5, %v2755_v4, %v2759_v44  ;;  %v3300_v3 = vsel %vm4910_vm2, %v3298_v5, %v3299_v56  ;;  %2361 = vst.msk [vmem:[#allocation2 + $0x18] sm:$0xff] %vm2357_vm11, %v2316_v9  ;;  %2502 = vrot.lane.b32.xlu0 %v4419_v50, %s4676_s13  ;;  %v870_v16 = vshll.u32 %v500_v57, 16  ;;  %v876_v17 = vshll.u32 %v501_v1, 16  ;;  %v4431_v44 = vld [vmem:[%s4900_s26 + $0x54] sm:$0xff]   ;;  %v1026_v63 = vld [vmem:[%s4900_s26 + $0x5c] sm:$0x1] }
 0x179   : > { %v2770_v14 = vsel %vm4951_vm5, %v2765_v47, %v2769_v46  ;;  %v4237_v15 = vcombine.low %v3297_v18, %v3300_v3  ;;  %2550 = vst.msk [vmem:[#allocation2 + $0x58] sm:$0xff] %vm2538_vm12, %v2513_v13  ;;  %3063 = vrot.lane.b32.xlu1 %v4157_v7, %s4677_s15  ;;  %v3244_v21 = vsel %vm4910_vm2, %v3242_v8, %v3243_v11  ;;  %v869_v22 = vrot.slane %v867_v12, 4  ;;  %v1025_v50 = vld [vmem:[%s4900_s26 + $0x58] sm:$0xf]  ;;  %v3949_v7 = vld [vmem:[%s4900_s26 + $0xc4] sm:$0xf] }
 0x17a   : > { %v4149_v20 = vcombine.low %v2760_v10, %v2770_v14  ;;  %v880_v23 = vshrl.u32 %v501_v1, 16  ;;  %v4229_v27 = vcombine.low %v5763_v51, %v3244_v21  ;;  %v872_v28 = vrot.slane %v870_v16, 5  ;;  %446 = vst.msk [vmem:[#allocation2 + $0x38] sm:$0xff] %vm438_vm6, %v4431_v44  ;;  %v3950_v9 = vld [vmem:[%s4900_s26 + $0xc8] sm:$0x1]  ;;  %v4420_v44 = vld [vmem:[%s4900_s26 + $0xc0] sm:$0xff]  }
 0x17b   : > { %v878_v29 = vrot.slane %v876_v17, 5  ;;  %v886_v33 = vshll.u32 %v502_v6, 16  ;;  %v2497_v31 = vpop.permute.xlu0 %2496  ;;  %v675_v25 = vshrl.u32 %v476_v59, 16  ;;  %v678_v35 = vshll.u32 %v476_v59, 16  ;;  %v3058_v38 = vpop.permute.xlu1 %3057  ;;  %v3948_v6 = vld [vmem:[%s4900_s26 + $0xc0] sm:$0xf] }
 0x17c   : > { %v882_v34 = vrot.slane %v880_v23, 4  ;;  %v684_v36 = vshll.u32 %v477_v19, 16  ;;  %2542 = vst.msk [vmem:[#allocation2 + $0x18] sm:$0xff] %vm2538_vm12, %v2497_v31  ;;  %3047 = vrot.lane.b32.xlu0 %v4149_v20, %s4677_s15  ;;  %v873_v39 = vor.u32 %v872_v28, %v869_v22  ;;  %v688_v41 = vshrl.u32 %v477_v19, 16  ;;  %v3924_v13 = vld [vmem:[%s4900_s26 + $0x60] sm:$0xf] }
 0x17d   : > { %v888_v40 = vrot.slane %v886_v33, 5  ;;  %v694_v42 = vshll.u32 %v478_v24, 16  ;;  %3095 = vst.msk [vmem:[#allocation2 + $0x58] sm:$0xff] %vm3083_vm13, %v3058_v38  ;;  %3384 = vrot.lane.b32.xlu1 %v4237_v15, %s4678_s8  ;;  %v677_v46 = vrot.slane %v675_v25, 4  ;;  %v680_v48 = vrot.slane %v678_v35, 5 }
 0x17e   : > { %v883_v45 = vor.u32 %v882_v34, %v878_v29  ;;  %v686_v49 = vrot.slane %v684_v36, 5  ;;  %v874_v52 = vrot.slane %v873_v39, 4  ;;  %v690_v54 = vrot.slane %v688_v41, 4  ;;  %v3925_v14 = vld [vmem:[%s4900_s26 + $0x64] sm:$0xf] }
 0x17f   : > { %v696_v55 = vrot.slane %v694_v42, 5  ;;  %v3838_v56 = vrot.slane %v1048_v26, 9  ;;  %v681_v60 = vor.u32 %v680_v48, %v677_v46  ;;  %v1209_v61 = vrot.slane %v1049_v30, 5  ;;  %v3379_v1 = vpop.permute.xlu1 %3378  ;;  %v3926_v21 = vld [vmem:[%s4900_s26 + $0x68] sm:$0x1] }
 0x180   : > { %v3042_v57 = vpop.permute.xlu0 %3041  ;;  %v884_v58 = vrot.slane %v883_v45, 4  ;;  %v1212_v62 = vrot.slane %v1050_v37, 5  ;;  %3368 = vrot.lane.b32.xlu0 %v4229_v27, %s4678_s8  ;;  %v879_v2 = vsel %vm4951_vm5, %v874_v52, %v878_v29  ;;  %v691_v4 = vor.u32 %v690_v54, %v686_v49  ;;  %3416 = vst.msk [vmem:[#allocation2 + $0x58] sm:$0xff] %vm3404_vm14, %v3379_v1  ;;  %v4012_v30 = vld [vmem:[%s4900_s26 + $0xc0] sm:$0xe] }
 0x181   : > { %3087 = vst.msk [vmem:[#allocation2 + $0x18] sm:$0xff] %vm3083_vm13, %v3042_v57  ;;  %v3830_v18 = vrot.slane %v1024_v43, 9  ;;  %v1153_v5 = vrot.slane %v1025_v50, 5  ;;  %v682_v51 = vrot.slane %v681_v60, 4  ;;  %v1210_v8 = vsel %vm4910_vm2, %v3838_v56, %v1209_v61  ;;  %v4013_v35 = vld [vmem:[%s4900_s26 + $0xc4] sm:$0xf] }
 0x182   : > { %v889_v47 = vsel %vm4951_vm5, %v884_v58, %v888_v40  ;;  %v1211_v59 = vrot.slane %v1209_v61, 4  ;;  %v692_v3 = vrot.slane %v691_v4, 4  ;;  %v1156_v19 = vrot.slane %v1026_v63, 5  ;;  %v4014_v36 = vld [vmem:[%s4900_s26 + $0xc8] sm:$0x1]  ;;  %v4421_v63 = vld [vmem:[%s4900_s26 + $0x60] sm:$0xff]  }
 0x183   : > { %v3822_v10 = vcombine.low %v879_v2, %v889_v47  ;;  %v1154_v11 = vsel %vm4910_vm2, %v3830_v18, %v1153_v5  ;;  %v1155_v12 = vrot.slane %v1153_v5, 4  ;;  %v687_v16 = vsel %vm4951_vm5, %v682_v51, %v686_v49  ;;  %v3988_v41 = vld [vmem:[%s4900_s26 + $0x60] sm:$0xe]  ;;  %v3989_v42 = vld [vmem:[%s4900_s26 + $0x64] sm:$0xf] }
 0x184   : > { %v3363_v15 = vpop.permute.xlu0 %3362  ;;  %v1213_v17 = vsel %vm4910_vm2, %v1211_v59, %v1212_v62  ;;  %v1917_v20 = vshrl.u32 %v3948_v6, 16  ;;  %v697_v22 = vsel %vm4951_vm5, %v692_v3, %v696_v55  ;;  %v1920_v24 = vshll.u32 %v3948_v6, 16  ;;  %v4140_v59 = vld [vmem:[%s4900_s26 + $0xcc] sm:$0xf] }
 0x185   : > { %3408 = vst.msk [vmem:[#allocation2 + $0x18] sm:$0xff] %vm3404_vm14, %v3363_v15  ;;  %968 = vrot.lane.b32.xlu1 %v3822_v10, %s4674_s7  ;;  %v3854_v23 = vcombine.low %v1210_v8, %v1213_v17  ;;  %v1926_v26 = vshll.u32 %v3949_v7, 16  ;;  %v3814_v27 = vcombine.low %v687_v16, %v697_v22  ;;  %v1157_v28 = vsel %vm4910_vm2, %v1155_v12, %v1156_v19  ;;  %v4141_v12 = vld [vmem:[%s4900_s26 + $0xd0] sm:$0xf]  ;;  %v4142_v22 = vld [vmem:[%s4900_s26 + $0xd4] sm:$0x1] }
 0x186   : > { %v1919_v29 = vrot.slane %v1917_v20, 4  ;;  %v1930_v33 = vshrl.u32 %v3949_v7, 16  ;;  %v3846_v31 = vcombine.low %v1154_v11, %v1157_v28  ;;  %v1922_v32 = vrot.slane %v1920_v24, 5  ;;  %v3990_v7 = vld [vmem:[%s4900_s26 + $0x68] sm:$0x1] }
 0x187   : > { %v1928_v34 = vrot.slane %v1926_v26, 5  ;;  %v1936_v25 = vshll.u32 %v3950_v9, 16  ;;  %952 = vrot.lane.b32.xlu0 %v3814_v27, %s4674_s7  ;;  %v1725_v38 = vshrl.u32 %v3924_v13, 16  ;;  %v1728_v39 = vshll.u32 %v3924_v13, 16  ;;  %v3433_v43 = vld [vmem:[#allocation2 + $0x58] sm:$0xff]  ;;  %s4680_s7 = smov [#allocation9]  }
 0x188   : > { %v1932_v37 = vrot.slane %v1930_v33, 4  ;;  %v1734_v40 = vshll.u32 %v3925_v14, 16  ;;  %v1923_v45 = vor.u32 %v1922_v32, %v1919_v29  ;;  %v1738_v48 = vshrl.u32 %v3925_v14, 16  ;;  %4271 = vmatprep.subr.msk.bf16.mxu0 %vm3444_vm15, %v3433_v43  ;;  %v4116_v29 = vld [vmem:[%s4900_s26 + $0x6c] sm:$0xf] }
 0x189   : > { %1292 = vrot.lane.b32.xlu1 %v3854_v23, %s4673_s9  ;;  %v1938_v46 = vrot.slane %v1936_v25, 5  ;;  %v1744_v49 = vshll.u32 %v3926_v21, 16  ;;  %v963_v50 = vpop.permute.xlu1 %962  ;;  %v1727_v54 = vrot.slane %v1725_v38, 4  ;;  %v1730_v55 = vrot.slane %v1728_v39, 5  ;;  %v4117_v33 = vld [vmem:[%s4900_s26 + $0x70] sm:$0xf] }
 0x18a   : > { %v1933_v52 = vor.u32 %v1932_v37, %v1928_v34  ;;  %v1736_v56 = vrot.slane %v1734_v40, 5  ;;  %999 = vst.msk [vmem:[#allocation2 + $0x60] sm:$0xff] %vm986_vm7, %v963_v50  ;;  %v1924_v57 = vrot.slane %v1923_v45, 4  ;;  %v1740_v58 = vrot.slane %v1738_v48, 4 }
 0x18b   : > { %v1746_v60 = vrot.slane %v1744_v49, 5  ;;  %v4030_v61 = vrot.slane %v4012_v30, 9  ;;  %v947_v62 = vpop.permute.xlu0 %946  ;;  %1276 = vrot.lane.b32.xlu0 %v3846_v31, %s4673_s9  ;;  %v1731_v2 = vor.u32 %v1730_v55, %v1727_v54  ;;  %v2256_v4 = vrot.slane %v4013_v35, 5  ;;  %v4118_v35 = vld [vmem:[%s4900_s26 + $0x74] sm:$0x1]  ;;  %v4424_v49 = vld [vmem:[%s4900_s26 + $0xcc] sm:$0xff]  }
 0x18c   : > { %v1934_v1 = vrot.slane %v1933_v52, 4  ;;  %v2259_v18 = vrot.slane %v4014_v36, 5  ;;  %991 = vst.msk [vmem:[#allocation2 + $0x20] sm:$0xff] %vm986_vm7, %v947_v62  ;;  %v1929_v5 = vsel %vm4951_vm5, %v1924_v57, %v1928_v34  ;;  %v1741_v6 = vor.u32 %v1740_v58, %v1736_v56  ;;  %v3425_v48 = vld [vmem:[#allocation2 + $0x18] sm:$0xff]  ;;  %v4180_v62 = vld [vmem:[%s4900_s26 + $0x6c] sm:$0xe] }
 0x18d   : > { %1473 = vrot.lane.b32.xlu1 %v4420_v44, %s4671_s28  ;;  %v4022_v47 = vrot.slane %v3988_v41, 9  ;;  %v2200_v51 = vrot.slane %v3989_v42, 5  ;;  %v1287_v8 = vpop.permute.xlu1 %1286  ;;  %v1732_v10 = vrot.slane %v1731_v2, 4  ;;  %v2257_v3 = vsel %vm4910_vm2, %v4030_v61, %v2256_v4  ;;  %v4204_v41 = vld [vmem:[%s4900_s26 + $0xcc] sm:$0xe]  ;;  %s4518_s9 = scalar_lea.vmem %s3578_s27, 256 }
 0x18e   : > { %v1939_v9 = vsel %vm4951_vm5, %v1934_v1, %v1938_v46  ;;  %v2258_v11 = vrot.slane %v2256_v4, 4  ;;  %1323 = vst.msk [vmem:[#allocation2 + $0x60] sm:$0xff] %vm1310_vm8, %v1287_v8  ;;  %v1742_v14 = vrot.slane %v1741_v6, 4  ;;  %v2203_v21 = vrot.slane %v3990_v7, 5  ;;  %v4205_v42 = vld [vmem:[%s4900_s26 + $0xd0] sm:$0xf]  ;;  %p4519_p10 = scmp.ne.s32.totalorder %s3578_s27, %s4518_s9 }
 0x18f   : > { %v3966_v13 = vcombine.low %v1929_v5, %v1939_v9  ;;  %v2201_v15 = vsel %vm4910_vm2, %v4022_v47, %v2200_v51  ;;  %v2202_v16 = vrot.slane %v2200_v51, 4  ;;  %v1271_v17 = vpop.permute.xlu0 %1270  ;;  %1457 = vrot.lane.b32.xlu0 %v4421_v63, %s4671_s28  ;;  %v1737_v19 = vsel %vm4951_vm5, %v1732_v10, %v1736_v56  ;;  %v4206_v56 = vld [vmem:[%s4900_s26 + $0xd4] sm:$0x1]  ;;  %v4181_v5 = vld [vmem:[%s4900_s26 + $0x70] sm:$0xf]  ;;  %s5976_s28 = scalar_lea.hbm %s6093_s3, %s4249_s12 }
 0x190   : > { %v2260_v20 = vsel %vm4910_vm2, %v2258_v11, %v2259_v18  ;;  %1315 = vst.msk [vmem:[#allocation2 + $0x20] sm:$0xff] %vm1310_vm8, %v1271_v17  ;;  %v2964_v23 = vshrl.u32 %v4140_v59, 16  ;;  %v1747_v24 = vsel %vm4951_vm5, %v1742_v14, %v1746_v60  ;;  %v2967_v27 = vshll.u32 %v4140_v59, 16  ;;  %v4425_v6 = vld [vmem:[%s4900_s26 + $0x6c] sm:$0xff]   ;;  %v4182_v59 = vld [vmem:[%s4900_s26 + $0x74] sm:$0x1]  ;;  %p4520_p1 = pnand %p4519_p10, %p6120_p11 }
 0x191   : > { %2018 = vrot.lane.b32.xlu1 %v3966_v13, %s4675_s25  ;;  %v4046_v26 = vcombine.low %v2257_v3, %v2260_v20  ;;  %v2973_v28 = vshll.u32 %v4141_v12, 16  ;;  %v1468_v30 = vpop.permute.xlu1 %1467  ;;  %v3958_v31 = vcombine.low %v1737_v19, %v1747_v24  ;;  %v2204_v32 = vsel %vm4910_vm2, %v2202_v16, %v2203_v21 }
 0x192   : > { %v2966_v34 = vrot.slane %v2964_v23, 4  ;;  %v2977_v25 = vshrl.u32 %v4141_v12, 16  ;;  %1504 = vst.msk [vmem:[#allocation2 + $0x60] sm:$0xff] %vm1491_vm9, %v1468_v30  ;;  %v4038_v36 = vcombine.low %v2201_v15, %v2204_v32  ;;  %v2969_v37 = vrot.slane %v2967_v27, 5  ;;  %p4521_p0 = pneg %p4520_p1 }
 0x193   : > { %v2975_v38 = vrot.slane %v2973_v28, 5  ;;  %v2983_v39 = vshll.u32 %v4142_v22, 16  ;;  %v1452_v40 = vpop.permute.xlu0 %1451  ;;  %2002 = vrot.lane.b32.xlu0 %v3958_v31, %s4675_s25  ;;  %v2772_v44 = vshrl.u32 %v4116_v29, 16  ;;  %v2775_v45 = vshll.u32 %v4116_v29, 16  ;;  %s4522_s25 = sshll.u32 %s4680_s7, 4  ;;  %s4523_s25 = int_to_ptr.vmem [resolvable:$false] %s4522_s25 }
 0x194   : > { %v2979_v43 = vrot.slane %v2977_v25, 4  ;;  %v2781_v46 = vshll.u32 %v4117_v33, 16  ;;  %1496 = vst.msk [vmem:[#allocation2 + $0x20] sm:$0xff] %vm1491_vm9, %v1452_v40  ;;  %v2970_v50 = vor.u32 %v2969_v37, %v2966_v34  ;;  %v2785_v54 = vshrl.u32 %v4117_v33, 16  ;;  %v3438_v37 = vld [vmem:[#allocation8] sm:$0xff]  ;;  %p4525_p6 = scmp.lt.s32.totalorder %s3578_s27, %s4523_s25 }
 0x195   : > { %2339 = vrot.lane.b32.xlu1 %v4046_v26, %s4672_s6  ;;  %v2985_v52 = vrot.slane %v2983_v39, 5  ;;  %v2791_v55 = vshll.u32 %v4118_v35, 16  ;;  %v2774_v58 = vrot.slane %v2772_v44, 4  ;;  %v2777_v60 = vrot.slane %v2775_v45, 5 }
 0x196   : > { %v2980_v57 = vor.u32 %v2979_v43, %v2975_v38  ;;  %v2783_v61 = vrot.slane %v2781_v46, 5  ;;  %v2013_v63 = vpop.permute.xlu1 %2012  ;;  %v2971_v1 = vrot.slane %v2970_v50, 4  ;;  %v2787_v2 = vrot.slane %v2785_v54, 4 }
 0x197   : > { %v2793_v4 = vrot.slane %v2791_v55, 5  ;;  %v3458_v18 = vsel %vm3444_vm15, %v3425_v48, 0  ;;  %2049 = vst.msk [vmem:[#allocation2 + $0x60] sm:$0xff] %vm2036_vm10, %v2013_v63  ;;  %2323 = vrot.lane.b32.xlu0 %v4038_v36, %s4672_s6  ;;  %v2778_v47 = vor.u32 %v2777_v60, %v2774_v58  ;;  %v4222_v51 = vrot.slane %v4204_v41, 9  ;;  %s3551_s6 = scalar_lea.sflag [#allocation5], %s4896_s17 }
 0x198   : > { %v2981_v7 = vrot.slane %v2980_v57, 4  ;;  %4257 = vmatpush3.bf16.xpose.msra.mxu0 %v3458_v18  ;;  %v3303_v8 = vrot.slane %v4205_v42, 5  ;;  %v2976_v9 = vsel %vm4951_vm5, %v2971_v1, %v2975_v38  ;;  %v2788_v10 = vor.u32 %v2787_v2, %v2783_v61 }
 0x199   : > { %2520 = vrot.lane.b32.xlu1 %v4424_v49, %s4676_s13  ;;  %v3306_v3 = vrot.slane %v4206_v56, 5  ;;  %v4214_v11 = vrot.slane %v4180_v62, 9  ;;  %v1997_v12 = vpop.permute.xlu0 %1996  ;;  %v2779_v14 = vrot.slane %v2778_v47, 4  ;;  %v3247_v21 = vrot.slane %v4181_v5, 5 }
 0x19a   : > { %v2986_v13 = vsel %vm4951_vm5, %v2981_v7, %v2985_v52  ;;  %v3304_v15 = vsel %vm4910_vm2, %v4222_v51, %v3303_v8  ;;  %v3305_v16 = vrot.slane %v3303_v8, 4  ;;  %2041 = vst.msk [vmem:[#allocation2 + $0x20] sm:$0xff] %vm2036_vm10, %v1997_v12  ;;  %v2334_v17 = vpop.permute.xlu1 %2333  ;;  %v2789_v20 = vrot.slane %v2788_v10, 4 }
 0x19b   : > { %v4158_v19 = vcombine.low %v2976_v9, %v2986_v13  ;;  %v3250_v22 = vrot.slane %v4182_v59, 5  ;;  %2370 = vst.msk [vmem:[#allocation2 + $0x60] sm:$0xff] %vm2357_vm11, %v2334_v17  ;;  %2504 = vrot.lane.b32.xlu0 %v4425_v6, %s4676_s13  ;;  %v2784_v23 = vsel %vm4951_vm5, %v2779_v14, %v2783_v61  ;;  %v3248_v28 = vsel %vm4910_vm2, %v4214_v11, %v3247_v21  ;;  %s4524_s13 = scalar_lea.vmem %s4523_s25, 512 }
 0x19c   : > { %v3307_v24 = vsel %vm4910_vm2, %v3305_v16, %v3306_v3  ;;  %v2794_v26 = vsel %vm4951_vm5, %v2789_v20, %v2793_v4  ;;  %v3249_v29 = vrot.slane %v3247_v21, 4  ;;  %v4679_v38 = vmov 0   ;;  %p4526_p3 = scmp.lt.s32.totalorder %s4524_s13, %s4518_s9 }
 0x19d   : > { %3065 = vrot.lane.b32.xlu1 %v4158_v19, %s4677_s15  ;;  %v4238_v27 = vcombine.low %v3304_v15, %v3307_v24  ;;  %v2318_v33 = vpop.permute.xlu0 %2317  ;;  %v4150_v30 = vcombine.low %v2784_v23, %v2794_v26  ;;  %4383 = vset.pattern.permute.xlu0 %v4679_v38 }
 0x19e   : > { %2362 = vst.msk [vmem:[#allocation2 + $0x20] sm:$0xff] %vm2357_vm11, %v2318_v33  ;;  %v2515_v31 = vpop.permute.xlu1 %2514  ;;  %v3251_v32 = vsel %vm4910_vm2, %v3249_v29, %v3250_v22  ;;  %p4527_p2 = por %p4526_p3, %p4525_p6 }
 0x19f   : > { %2551 = vst.msk [vmem:[#allocation2 + $0x60] sm:$0xff] %vm2538_vm12, %v2515_v31  ;;  %3049 = vrot.lane.b32.xlu0 %v4150_v30, %s4677_s15  ;;  %v4230_v34 = vcombine.low %v3248_v28, %v3251_v32 }
 0x1a0   : > { %p4528_p9 = pnand %p4527_p2, %p4521_p0 }
 0x1a1   : > { %3386 = vrot.lane.b32.xlu1 %v4238_v27, %s4678_s8  ;;  %v2499_v25 = vpop.permute.xlu0 %2498 }
 0x1a2   : > { %2543 = vst.msk [vmem:[#allocation2 + $0x20] sm:$0xff] %vm2538_vm12, %v2499_v25  ;;  %v3060_v35 = vpop.permute.xlu1 %3059 }
 0x1a3   : > { %3096 = vst.msk [vmem:[#allocation2 + $0x60] sm:$0xff] %vm3083_vm13, %v3060_v35  ;;  %3370 = vrot.lane.b32.xlu0 %v4230_v34, %s4678_s8 }
 0x1a5   : > { %v3044_v0 = vpop.permute.xlu0 %3043 }
 0x1a6   : > { %3088 = vst.msk [vmem:[#allocation2 + $0x20] sm:$0xff] %vm3083_vm13, %v3044_v0  ;;  %v3381_v36 = vpop.permute.xlu1 %3380 }
 0x1a7   : > { %3417 = vst.msk [vmem:[#allocation2 + $0x60] sm:$0xff] %vm3404_vm14, %v3381_v36  ;;  %3441 = vperm.xlu0 %4383, %v3438_v37  }
 0x1a9   : > { %v3365_v39 = vpop.permute.xlu0 %3364 }
 0x1aa   : > { %3409 = vst.msk [vmem:[#allocation2 + $0x20] sm:$0xff] %vm3404_vm14, %v3365_v39 }
 0x1ae   : > { %v3434_v40 = vld [vmem:[#allocation2 + $0x60] sm:$0xff] }
 0x1af   : > { %v965_v41 = vpop.permute.xlu1 %964  ;;  %4272 = vmatprep.subr.msk.bf16.mxu0 %vm3444_vm15, %v3434_v40 }
 0x1b0   : > { %1000 = vst.msk [vmem:[#allocation2 + $0x68] sm:$0xff] %vm986_vm7, %v965_v41 }
 0x1b1   : > { %v949_v42 = vpop.permute.xlu0 %948  ;;  %v3426_v43 = vld [vmem:[#allocation2 + $0x20] sm:$0xff] }
 0x1b2   : > { %992 = vst.msk [vmem:[#allocation2 + $0x28] sm:$0xff] %vm986_vm7, %v949_v42  ;;  %v3461_v44 = vsel %vm3444_vm15, %v3426_v43, 0 }
 0x1b3   : > { %v1289_v45 = vpop.permute.xlu1 %1288  ;;  %4259 = vmatpush3.bf16.xpose.msra.mxu0 %v3461_v44 }
 0x1b4   : > { %1324 = vst.msk [vmem:[#allocation2 + $0x68] sm:$0xff] %vm1310_vm8, %v1289_v45 }
 0x1b5   : > { %v1273_v46 = vpop.permute.xlu0 %1272 }
 0x1b6   : > { %1316 = vst.msk [vmem:[#allocation2 + $0x28] sm:$0xff] %vm1310_vm8, %v1273_v46 }
 0x1b7   : > { %v1470_v48 = vpop.permute.xlu1 %1469 }
 0x1b8   : > { %1505 = vst.msk [vmem:[#allocation2 + $0x68] sm:$0xff] %vm1491_vm9, %v1470_v48 }
 0x1b9   : > { %v1454_v49 = vpop.permute.xlu0 %1453 }
 0x1ba   : > { %1497 = vst.msk [vmem:[#allocation2 + $0x28] sm:$0xff] %vm1491_vm9, %v1454_v49 }
 0x1bb   : > { %v2015_v50 = vpop.permute.xlu1 %2014 }
 0x1bc   : > { %2050 = vst.msk [vmem:[#allocation2 + $0x68] sm:$0xff] %vm2036_vm10, %v2015_v50 }
 0x1bd   : > { %v1999_v52 = vpop.permute.xlu0 %1998 }
 0x1be   : > { %2042 = vst.msk [vmem:[#allocation2 + $0x28] sm:$0xff] %vm2036_vm10, %v1999_v52 }
 0x1bf   : > { %v2336_v54 = vpop.permute.xlu1 %2335 }
 0x1c0   : > { %2371 = vst.msk [vmem:[#allocation2 + $0x68] sm:$0xff] %vm2357_vm11, %v2336_v54 }
 0x1c1   : > { %v2320_v55 = vpop.permute.xlu0 %2319 }
 0x1c2   : > { %2363 = vst.msk [vmem:[#allocation2 + $0x28] sm:$0xff] %vm2357_vm11, %v2320_v55 }
 0x1c3   : > { %v2517_v56 = vpop.permute.xlu1 %2516 }
 0x1c4   : > { %2552 = vst.msk [vmem:[#allocation2 + $0x68] sm:$0xff] %vm2538_vm12, %v2517_v56 }
 0x1c5   : > { %v2501_v57 = vpop.permute.xlu0 %2500 }
 0x1c6   : > { %2544 = vst.msk [vmem:[#allocation2 + $0x28] sm:$0xff] %vm2538_vm12, %v2501_v57 }
 0x1c7   : > { %v3062_v58 = vpop.permute.xlu1 %3061 }
 0x1c8   : > { %3097 = vst.msk [vmem:[#allocation2 + $0x68] sm:$0xff] %vm3083_vm13, %v3062_v58 }
 0x1c9   : > { %v3046_v60 = vpop.permute.xlu0 %3045 }
 0x1ca   : > { %3089 = vst.msk [vmem:[#allocation2 + $0x28] sm:$0xff] %vm3083_vm13, %v3046_v60 }
 0x1cb   : > { %v3383_v61 = vpop.permute.xlu1 %3382 }
 0x1cc   : > { %3418 = vst.msk [vmem:[#allocation2 + $0x68] sm:$0xff] %vm3404_vm14, %v3383_v61 }
 0x1cd   : > { %v3367_v62 = vpop.permute.xlu0 %3366 }
 0x1ce   : > { %3410 = vst.msk [vmem:[#allocation2 + $0x28] sm:$0xff] %vm3404_vm14, %v3367_v62 }
 0x1d3   : > { %v3435_v63 = vld [vmem:[#allocation2 + $0x68] sm:$0xff]  ;;  %v967_v1 = vpop.permute.xlu1 %966 }
 0x1d4   : > { %4273 = vmatprep.subr.msk.bf16.mxu0 %vm3444_vm15, %v3435_v63  ;;  %1001 = vst.msk [vmem:[#allocation2 + $0x70] sm:$0xff] %vm986_vm7, %v967_v1 }
 0x1d5   : > { %v951_v2 = vpop.permute.xlu0 %950  ;;  %v3427_v4 = vld [vmem:[#allocation2 + $0x28] sm:$0xff] }
 0x1d6   : > { %993 = vst.msk [vmem:[#allocation2 + $0x30] sm:$0xff] %vm986_vm7, %v951_v2  ;;  %v3464_v18 = vsel %vm3444_vm15, %v3427_v4, 0 }
 0x1d7   : > { %v1291_v5 = vpop.permute.xlu1 %1290  ;;  %4261 = vmatpush3.bf16.xpose.msra.mxu0 %v3464_v18 }
 0x1d8   : > { %1325 = vst.msk [vmem:[#allocation2 + $0x70] sm:$0xff] %vm1310_vm8, %v1291_v5 }
 0x1d9   : > { %v1275_v6 = vpop.permute.xlu0 %1274 }
 0x1da   : > { %1317 = vst.msk [vmem:[#allocation2 + $0x30] sm:$0xff] %vm1310_vm8, %v1275_v6 }
 0x1db   : > { %v1472_v7 = vpop.permute.xlu1 %1471 }
 0x1dc   : > { %1506 = vst.msk [vmem:[#allocation2 + $0x70] sm:$0xff] %vm1491_vm9, %v1472_v7 }
 0x1dd   : > { %v1456_v47 = vpop.permute.xlu0 %1455 }
 0x1de   : > { %1498 = vst.msk [vmem:[#allocation2 + $0x30] sm:$0xff] %vm1491_vm9, %v1456_v47 }
 0x1df   : > { %v2017_v51 = vpop.permute.xlu1 %2016 }
 0x1e0   : > { %2051 = vst.msk [vmem:[#allocation2 + $0x70] sm:$0xff] %vm2036_vm10, %v2017_v51 }
 0x1e2   : > { %v2001_v8 = vpop.permute.xlu0 %2000 }
 0x1e3   : > { %2043 = vst.msk [vmem:[#allocation2 + $0x30] sm:$0xff] %vm2036_vm10, %v2001_v8  ;;  %v2338_v59 = vpop.permute.xlu1 %2337 }
 0x1e4   : > { %2372 = vst.msk [vmem:[#allocation2 + $0x70] sm:$0xff] %vm2357_vm11, %v2338_v59 }
 0x1e6   : > { %v2322_v9 = vpop.permute.xlu0 %2321 }
 0x1e7   : > { %2364 = vst.msk [vmem:[#allocation2 + $0x30] sm:$0xff] %vm2357_vm11, %v2322_v9  ;;  %v2519_v10 = vpop.permute.xlu1 %2518 }
 0x1e8   : > { %2553 = vst.msk [vmem:[#allocation2 + $0x70] sm:$0xff] %vm2538_vm12, %v2519_v10 }
 0x1ea   : > { %v2503_v3 = vpop.permute.xlu0 %2502 }
 0x1eb   : > { %2545 = vst.msk [vmem:[#allocation2 + $0x30] sm:$0xff] %vm2538_vm12, %v2503_v3  ;;  %v3064_v11 = vpop.permute.xlu1 %3063 }
 0x1ec   : > { %3098 = vst.msk [vmem:[#allocation2 + $0x70] sm:$0xff] %vm3083_vm13, %v3064_v11 }
 0x1ee   : > { %v3048_v12 = vpop.permute.xlu0 %3047 }
 0x1ef   : > { %3090 = vst.msk [vmem:[#allocation2 + $0x30] sm:$0xff] %vm3083_vm13, %v3048_v12  ;;  %v3385_v13 = vpop.permute.xlu1 %3384 }
 0x1f0   : > { %3419 = vst.msk [vmem:[#allocation2 + $0x70] sm:$0xff] %vm3404_vm14, %v3385_v13 }
 0x1f2   : > { %v3369_v14 = vpop.permute.xlu0 %3368 }
 0x1f3   : > { %3411 = vst.msk [vmem:[#allocation2 + $0x30] sm:$0xff] %vm3404_vm14, %v3369_v14 }
 0x1f7   : > { %v969_v15 = vpop.permute.xlu1 %968  ;;  %v3436_v16 = vld [vmem:[#allocation2 + $0x70] sm:$0xff] }
 0x1f8   : > { %1002 = vst.msk [vmem:[#allocation2 + $0x78] sm:$0xff] %vm986_vm7, %v969_v15  ;;  %4274 = vmatprep.subr.msk.bf16.mxu0 %vm3444_vm15, %v3436_v16 }
 0x1f9   : > { %v953_v17 = vpop.permute.xlu0 %952 }
 0x1fa   : > { %994 = vst.msk [vmem:[#allocation2 + $0x38] sm:$0xff] %vm986_vm7, %v953_v17  ;;  %v3428_v20 = vld [vmem:[#allocation2 + $0x30] sm:$0xff] }
 0x1fb   : > { %v1293_v19 = vpop.permute.xlu1 %1292  ;;  %v3467_v21 = vsel %vm3444_vm15, %v3428_v20, 0 }
 0x1fc   : > { %1326 = vst.msk [vmem:[#allocation2 + $0x78] sm:$0xff] %vm1310_vm8, %v1293_v19  ;;  %4263 = vmatpush3.bf16.xpose.msra.mxu0 %v3467_v21 }
 0x1fd   : > { %v1277_v22 = vpop.permute.xlu0 %1276 }
 0x1fe   : > { %1318 = vst.msk [vmem:[#allocation2 + $0x38] sm:$0xff] %vm1310_vm8, %v1277_v22 }
 0x1ff   : > { %v1474_v23 = vpop.permute.xlu1 %1473 }
 0x200   : > { %1507 = vst.msk [vmem:[#allocation2 + $0x78] sm:$0xff] %vm1491_vm9, %v1474_v23 }
 0x201   : > { %v1458_v24 = vpop.permute.xlu0 %1457 }
 0x202   : > { %1499 = vst.msk [vmem:[#allocation2 + $0x38] sm:$0xff] %vm1491_vm9, %v1458_v24 }
 0x203   : > { %v2019_v26 = vpop.permute.xlu1 %2018 }
 0x204   : > { %2052 = vst.msk [vmem:[#allocation2 + $0x78] sm:$0xff] %vm2036_vm10, %v2019_v26 }
 0x205   : > { %v2003_v27 = vpop.permute.xlu0 %2002 }
 0x206   : > { %2044 = vst.msk [vmem:[#allocation2 + $0x38] sm:$0xff] %vm2036_vm10, %v2003_v27 }
 0x207   : > { %v2340_v28 = vpop.permute.xlu1 %2339 }
 0x208   : > { %2373 = vst.msk [vmem:[#allocation2 + $0x78] sm:$0xff] %vm2357_vm11, %v2340_v28 }
 0x209   : > { %v2324_v29 = vpop.permute.xlu0 %2323 }
 0x20a   : > { %2365 = vst.msk [vmem:[#allocation2 + $0x38] sm:$0xff] %vm2357_vm11, %v2324_v29 }
 0x20b   : > { %v2521_v33 = vpop.permute.xlu1 %2520 }
 0x20c   : > { %2554 = vst.msk [vmem:[#allocation2 + $0x78] sm:$0xff] %vm2538_vm12, %v2521_v33 }
 0x20d   : > { %v2505_v30 = vpop.permute.xlu0 %2504 }
 0x20e   : > { %2546 = vst.msk [vmem:[#allocation2 + $0x38] sm:$0xff] %vm2538_vm12, %v2505_v30 }
 0x20f   : > { %v3066_v31 = vpop.permute.xlu1 %3065 }
 0x210   : > { %3099 = vst.msk [vmem:[#allocation2 + $0x78] sm:$0xff] %vm3083_vm13, %v3066_v31 }
 0x211   : > { %v3050_v32 = vpop.permute.xlu0 %3049 }
 0x212   : > { %3091 = vst.msk [vmem:[#allocation2 + $0x38] sm:$0xff] %vm3083_vm13, %v3050_v32 }
 0x213   : > { %v3387_v34 = vpop.permute.xlu1 %3386 }
 0x214   : > { %3420 = vst.msk [vmem:[#allocation2 + $0x78] sm:$0xff] %vm3404_vm14, %v3387_v34 }
 0x215   : > { %v3371_v25 = vpop.permute.xlu0 %3370 }
 0x216   : > { %3412 = vst.msk [vmem:[#allocation2 + $0x38] sm:$0xff] %vm3404_vm14, %v3371_v25 }
 0x21b   : > { %v3437_v35 = vld [vmem:[#allocation2 + $0x78] sm:$0xff] }
 0x21c   : > { %4275 = vmatprep.subr.msk.bf16.mxu0 %vm3444_vm15, %v3437_v35 }
 0x21d   : > { %v3429_v0 = vld [vmem:[#allocation2 + $0x38] sm:$0xff] }
 0x21e   : > { %v3470_v36 = vsel %vm3444_vm15, %v3429_v0, 0 }
 0x21f   : > { %4265 = vmatpush3.bf16.xpose.msra.mxu0 %v3470_v36 }
 0x226   : > { %4267 = vmatmul.mubr.msk.bf16.vlgmr.msra.gmra.mrb[0].mxu0 %vm3444_vm15, %v5902_v53  ;;  %v3442_v37 = vpop.permute.xlu0 %3441 }
 0x2f9   : > { %v3530_v38 = vpop.f32.mrb[0].mxu0 }
 0x2fa   : > { %v3531_v39 = vadd.f32 %v3530_v38, %v3442_v37  ;;  %v3532_v40 = vpop.f32.mrb[1].mxu0 }
 0x2fb   : > { %v3533_v41 = vadd.f32 %v3532_v40, %v3442_v37  ;;  %v3534_v42 = vpop.f32.mrb[2].mxu0 }
 0x2fc   : > { %3537 = vst [vmem:[%s289_s1] sm:$0xff] %v3531_v39  ;;  %v3544_v43 = vmul.f32 %v3531_v39, %v3531_v39  ;;  %v3535_v44 = vpop.f32.mrb[3].mxu0 }
 0x2fd   : > { %3538 = vst [vmem:[%s289_s1 + $0x8] sm:$0xff] %v3533_v41  ;;  %v3545_v45 = vmul.f32 %v3533_v41, %v3533_v41  ;;  %v3539_v46 = vadd.f32 %v3533_v41, %v3531_v39 }
 0x2ff   : > { %3540 = vadd.xlane.f32.xlu1 %v3539_v46  ;;  %v3546_v48 = vadd.f32 %v3545_v45, %v3544_v43 }
 0x301   : > { %3547 = vadd.xlane.f32.xlu0 %v3546_v48 }
 0x302   : > { %4531 = shalt.err (!%p4528_p9)
}
 0x303   : > { %s4532_s15 = scalar_lea.hbm %s5976_s28, 256  ;;  %s4536_s1 = scalar_lea.hbm %s6093_s3, 512 }
 0x304   : > { %p4533_p13 = scmp.ne.s32.totalorder %s5976_s28, %s4532_s15  ;;  %p4537_p12 = scmp.lt.u32.totalorder %s5976_s28, %s6093_s3 }
 0x305   : > { %p4538_p7 = scmp.lt.u32.totalorder %s4536_s1, %s4532_s15  ;;  %p4540_p10 = scmp.lt.u32.totalorder %s4532_s15, %s5976_s28 }
 0x306   : > { %p4534_p4 = pnand %p4533_p13, %p6120_p11 }
 0x307   : > { %p4539_p5 = por %p4538_p7, %p4537_p12 }
 0x308   : > { %p4535_p8 = pneg %p4534_p4 }
 0x309   : > { %p4541_p1 = por %p4540_p10, %p4539_p5 }
 0x30b   : > { %p4542_p0 = pnand %p4541_p1, %p4535_p8 }
 0x30d   : > { %4545 = shalt.err (!%p4542_p0)
}
 0x30e   : > { %4289 = dma.vmem_to_hbm [thread:$0]  (%p6120_p11), %s3578_s27, 256, %s5976_s28, %s3551_s6   ;;  %vm3542_vm0 = vcmask 7168  }
 0x30f   : > { %s3789_s26 = sshll.u32 %s4896_s17, 3  ;;  %s3555_s9 = sand.u32 1, %s4744_s24  }
 0x310   : > { %s4245_s7 = sshll.u32 %s4656_s21, 7  ;;  %s296_s25 = scalar_lea.vmem [#allocation10], %s3789_s26 }
 0x311   : > { %s3591_s13 = sshll.u32 %s296_s25, 4  ;;  %s5999_s8 = scalar_lea.vmem [#allocation12], %s3789_s26  ;;  %s6007_s13 = int_to_ptr.vmem [resolvable:$true] %s3591_s13 }
 0x312   : > { %s3605_s15 = sshll.u32 %s5999_s8, 4  ;;  %s6005_s12 = scalar_lea.hbm %s6094_s4, %s4245_s7  ;;  %s6015_s15 = int_to_ptr.vmem [resolvable:$true] %s3605_s15 }
 0x313   : > { %s6013_s17 = scalar_lea.hbm %s6095_s5, %s4245_s7  ;;  %s6017_s27 = scalar_lea.sflag [#allocation11], %s3555_s9 }
 0x314   : > { %s4546_s28 = scalar_lea.vmem %s6007_s13, 128  ;;  %s4681_s6 = smov [#allocation10]  }
 0x315   : > { %p4547_p6 = scmp.ne.s32.totalorder %s6007_s13, %s4546_s28  ;;  %s4550_s10 = sshll.u32 %s4681_s6, 4  ;;  %s4551_s10 = int_to_ptr.vmem [resolvable:$false] %s4550_s10 }
 0x316   : > { %s4552_s26 = scalar_lea.vmem %s4551_s10, 256  ;;  %p4553_p9 = scmp.lt.s32.totalorder %s6007_s13, %s4551_s10 }
 0x317   : > { %p4548_p3 = pnand %p4547_p6, %p6120_p11  ;;  %p4554_p13 = scmp.lt.s32.totalorder %s4552_s26, %s4546_s28 }
 0x319   : > { %p4549_p2 = pneg %p4548_p3  ;;  %p4555_p4 = por %p4554_p13, %p4553_p9 }
 0x31b   : > { %p4556_p8 = pnand %p4555_p4, %p4549_p2 }
 0x38c   : > { %v3541_v53 = vpop.xlane.xlu1 %3540 }
 0x38d   : > { %3543 = vst.msk [vmem:[%s296_s25] sm:$0xff] %vm3542_vm0, %v3541_v53 }
 0x38e   : > { %v3548_v49 = vpop.xlane.xlu0 %3547 }
 0x38f   : > { %4559 = shalt.err (!%p4556_p8)
}
 0x390   : > { %s4560_s9 = scalar_lea.hbm %s6005_s12, 128  ;;  %s4564_s16 = scalar_lea.hbm %s6094_s4, 256 }
 0x391   : > { %p4561_p12 = scmp.ne.s32.totalorder %s6005_s12, %s4560_s9  ;;  %p4565_p10 = scmp.lt.u32.totalorder %s6005_s12, %s6094_s4 }
 0x392   : > { %p4566_p1 = scmp.lt.u32.totalorder %s4564_s16, %s4560_s9  ;;  %p4568_p6 = scmp.lt.u32.totalorder %s4560_s9, %s6005_s12 }
 0x393   : > { %p4562_p7 = pnand %p4561_p12, %p6120_p11 }
 0x394   : > { %p4567_p0 = por %p4566_p1, %p4565_p10 }
 0x395   : > { %p4563_p5 = pneg %p4562_p7 }
 0x396   : > { %p4569_p3 = por %p4568_p6, %p4567_p0 }
 0x398   : > { %p4570_p2 = pnand %p4569_p3, %p4563_p5 }
 0x39a   : > { %4573 = shalt.err (!%p4570_p2)
}
 0x39b   : > { %4290 = dma.vmem_to_hbm [thread:$0]  (%p6120_p11), %s6007_s13, 128, %s6005_s12, %s6017_s27   ;;  %3549 = vst.msk [vmem:[%s5999_s8] sm:$0xff] %vm3542_vm0, %v3548_v49 }
 0x39c   : > { %s4574_s24 = scalar_lea.vmem %s6015_s15, 128  ;;  %s4682_s28 = smov [#allocation12]  }
 0x39d   : > { %p4575_p9 = scmp.ne.s32.totalorder %s6015_s15, %s4574_s24  ;;  %s4578_s6 = sshll.u32 %s4682_s28, 4  ;;  %s4579_s6 = int_to_ptr.vmem [resolvable:$false] %s4578_s6 }
 0x39e   : > { %s4580_s10 = scalar_lea.vmem %s4579_s6, 256  ;;  %p4581_p8 = scmp.lt.s32.totalorder %s6015_s15, %s4579_s6 }
 0x39f   : > { %p4576_p13 = pnand %p4575_p9, %p6120_p11  ;;  %p4582_p12 = scmp.lt.s32.totalorder %s4580_s10, %s4574_s24 }
 0x3a1   : > { %p4577_p4 = pneg %p4576_p13  ;;  %p4583_p7 = por %p4582_p12, %p4581_p8 }
 0x3a3   : > { %p4584_p5 = pnand %p4583_p7, %p4577_p4 }
 0x3a5   : > { %4587 = shalt.err (!%p4584_p5)
}
 0x3a6   : > { %s4588_s13 = scalar_lea.hbm %s6013_s17, 128  ;;  %s4592_s26 = scalar_lea.hbm %s6095_s5, 256 }
 0x3a7   : > { %p4589_p10 = scmp.ne.s32.totalorder %s6013_s17, %s4588_s13  ;;  %p4593_p6 = scmp.lt.u32.totalorder %s6013_s17, %s6095_s5 }
 0x3a8   : > { %p4594_p3 = scmp.lt.u32.totalorder %s4592_s26, %s4588_s13  ;;  %p4596_p9 = scmp.lt.u32.totalorder %s4588_s13, %s6013_s17 }
 0x3a9   : > { %p4590_p1 = pnand %p4589_p10, %p6120_p11 }
 0x3aa   : > { %p4595_p2 = por %p4594_p3, %p4593_p6 }
 0x3ab   : > { %p4591_p0 = pneg %p4590_p1 }
 0x3ac   : > { %p4597_p13 = por %p4596_p9, %p4595_p2 }
 0x3ae   : > { %p4598_p4 = pnand %p4597_p13, %p4591_p0 }
 0x3b0   : > { %4601 = shalt.err (!%p4598_p4)
}
 0x3b1   : > { %4291 = dma.vmem_to_hbm [thread:$0]  (%p6120_p11), %s6015_s15, 128, %s6013_s17, %s6017_s27  }
 0x3b2 PF: > { %s3617_s25 = sand.u32 1, %s4644_s18   ;;  %p6121_p8 = scmp.ne.s32.totalorder %s6106_s30, 0 }
 0x3b3   : > { %p6122_p12 = scmp.ge.s32.totalorder %s4664_s23, 2  ;;  %s3618_s16 = scalar_lea.sflag [#allocation5], %s3617_s25 }
 0x3b5   : > { %p4307_p7 = pnand %p6122_p12, %p6121_p8 }
 0x3b7   : > { %4635 = dma.done.wait (!%p4307_p7), %s3618_s16, 256  }
 0x3b8   : > { %4637 = vsyncadd (!%p4307_p7), %s3618_s16, 4294967040  ;;  %s6123_s1 = sadd.s32 4294967294, %s4664_s23  }
 0x3b9   : > { %s3626_s21 = sand.u32 1, %s6123_s1  }
 0x3ba   : > { %s3627_s24 = scalar_lea.sflag [#allocation11], %s3626_s21 }
 0x3bb   : > { %4639 = dma.done.wait (!%p4307_p7), %s3627_s24, 256  }
 0x3bc   : > { %4641 = vsyncadd (!%p4307_p7), %s3627_s24, 4294967040  ;;  %s26_s23 = sadd.s32 1, %s4664_s23   ;;  %s6124_s18 = smov %s4648_s19 }
 0x3bd   : > { %p23_p11 = scmp.ge.s32.totalorder %s26_s23, 4   ;;  %s6125_s19 = smov %s4652_s20 }
 0x3be   : > { %s6126_s20 = smov %s4863_s11  ;;  %s6127_s21 = smov %s4660_s22 }
 0x3bf   : > { %s6128_s22 = smov %s6130_s14  ;;  %25 = sbr.rel (!%p23_p11) target bundleno = 11 (0xb), region = 120 }
 0x3c6   :  { %3641 = vsyncpa [#allocation4], 1 }
 0x3c7   :  { %3643 = vsyncpa [#allocation4 + $0x1], 1 }
 0x3c8   :  { %3644 = vsyncpa [#allocation7], 1 }
 0x3c9   :  { %3645 = vsyncpa [#allocation5], 1 }
 0x3ca   :  { %3647 = vsyncpa [#allocation5 + $0x1], 1 }
 0x3cb   :  { %3648 = vsyncpa [#allocation11], 1 }
 0x3cc   :  { %3650 = vsyncpa [#allocation11 + $0x1], 1 }

</bundles_post_ra>
